<compile_context>
chip_gen: v5e
topology: v5e:2x2
jax: 0.10.0
libtpu: 0.0.40
codegen_flags: <defaults>
</compile_context>

<pallas_src>
import jax
import jax.numpy as jnp
from jax.experimental import pallas as pl
from jax.experimental.pallas import tpu as pltpu


def _round_up(x, m):
    return ((x + m - 1) // m) * m


# ----------------------------------------------------------------------------
# Fused kernel: num_conv x (conv3x3 'same' + bias + ReLU) followed by a
# 2x2 / stride-2 / ceil_mode max pool.  One image per grid step (NHWC,
# channels padded to Cp=128 so the lane dim is dense everywhere).
# ----------------------------------------------------------------------------
def _make_fused_kernel(*, num_conv, H, W, K, Ho, Wo, Cp):
    p = K // 2                 # 'same' padding for odd K
    LM = 8                     # sublane-aligned left margin on the W axis
    Hpad = H + 2 * p
    Wpad = LM + W + p

    def kernel(*refs):
        # refs = (x, w0, b0, w1, b1, ..., out, pad_scratch, pool_scratch)
        x_ref = refs[0]
        o_ref = refs[1 + 2 * num_conv]
        pad_ref = refs[2 + 2 * num_conv]     # (Hpad, Wpad, Cp) f32 VMEM
        pool_ref = refs[3 + 2 * num_conv]    # (2*Ho, 2*Wo, Cp) f32 VMEM

        def conv_relu(act_hwc, w_ref, b_ref):
            # act_hwc: (H, W, Cp) f32 value.
            # 'same' padding done on-chip: zero the scratch, store the
            # activation in its interior (store is tile-aligned: H offset is on
            # the untiled dim, W offset = 8 sublanes, full 128 lanes).
            pad_ref[...] = jnp.zeros((Hpad, Wpad, Cp), jnp.float32)
            pad_ref[p:p + H, LM:LM + W, :] = act_hwc
            xp = pad_ref[...]                                    # (Hpad, Wpad, Cp)
            # im2col: 9 shifted views concatenated along the (128-aligned)
            # contraction dim -> one MXU matmul with K = 9*Cp.
            cols = [xp[kh:kh + H, LM - p + kw:LM - p + kw + W, :].reshape(H * W, Cp)
                    for kh in range(K) for kw in range(K)]
            xcol = jnp.concatenate(cols, axis=1).astype(jnp.bfloat16)
            y = jnp.dot(xcol, w_ref[...],                        # bf16 MXU, f32 acc
                        preferred_element_type=jnp.float32)
            return jnp.maximum(y + b_ref[...], 0.0)              # bias + ReLU in f32

        act = x_ref[0]                                           # (H, W, Cp) f32
        for i in range(num_conv):
            y = conv_relu(act, refs[1 + 2 * i], refs[2 + 2 * i])  # (H*W, Cp)
            act = y.reshape(H, W, Cp)

        # ---- fused 2x2 / stride-2 max pool, ceil_mode=True ----
        if (2 * Ho != H) or (2 * Wo != W):                       # static condition
            # ceil_mode pads only at the trailing edge; -inf is the max identity.
            pool_ref[...] = jnp.full((2 * Ho, 2 * Wo, Cp), -jnp.inf, jnp.float32)
        pool_ref[0:H, 0:W, :] = act
        q00 = pool_ref[pl.ds(0, Ho, stride=2), pl.ds(0, Wo, stride=2), :]
        q01 = pool_ref[pl.ds(0, Ho, stride=2), pl.ds(1, Wo, stride=2), :]
        q10 = pool_ref[pl.ds(1, Ho, stride=2), pl.ds(0, Wo, stride=2), :]
        q11 = pool_ref[pl.ds(1, Ho, stride=2), pl.ds(1, Wo, stride=2), :]
        o_ref[...] = jnp.maximum(jnp.maximum(q00, q01),
                                 jnp.maximum(q10, q11)).reshape(1, Ho, Wo, Cp)

    return kernel


# ----------------------------------------------------------------------------
# Public wrapper: NCHW in, NCHW out (PyTorch convention).
# params: list of (w (K,K,Ci,Co) f32, b (Co,) f32), HWIO layout.
# ----------------------------------------------------------------------------
def conv_block(x_nchw, params):
    N, Cin, H, W = x_nchw.shape
    num_conv = len(params)
    K = int(params[0][0].shape[0])
    Cout = int(params[0][0].shape[-1])
    assert K % 2 == 1, "'same' padding path assumes an odd kernel size"
    Cp = _round_up(max(Cin, Cout), 128)      # lane-dense channel count
    Ho, Wo = -(-H // 2), -(-W // 2)          # ceil_mode output size
    p = K // 2
    Hpad, Wpad = H + 2 * p, 8 + W + p

    # NCHW -> NHWC; zero-pad channels to Cp so every block is lane-dense.
    x = jnp.transpose(x_nchw, (0, 2, 3, 1)).astype(jnp.float32)
    x = jnp.pad(x, ((0, 0), (0, 0), (0, 0), (0, Cp - Cin)))

    # Weight prep: pad channels to Cp, fold (K,K,Ci) into the im2col
    # contraction dim, cast to bf16 for the MXU.  Biases stay f32.
    flat_inputs = [x]
    in_specs = [pl.BlockSpec((1, H, W, Cp), lambda n: (n, 0, 0, 0))]
    for w, b in params:
        kk, _, ci, co = w.shape
        w_p = jnp.pad(w, ((0, 0), (0, 0), (0, Cp - ci), (0, Cp - co)))
        w_m = w_p.reshape(kk * kk * Cp, Cp).astype(jnp.bfloat16)
        b_p = jnp.pad(b, (0, Cp - co)).reshape(1, Cp).astype(jnp.float32)
        flat_inputs += [w_m, b_p]
        in_specs += [pl.BlockSpec((kk * kk * Cp, Cp), lambda n: (0, 0)),
                     pl.BlockSpec((1, Cp), lambda n: (0, 0))]

    kernel = _make_fused_kernel(num_conv=num_conv, H=H, W=W, K=K,
                                Ho=Ho, Wo=Wo, Cp=Cp)

    out = pl.pallas_call(
        kernel,
        out_shape=jax.ShapeDtypeStruct((N, Ho, Wo, Cp), jnp.float32),
        grid=(N,),
        in_specs=in_specs,
        out_specs=pl.BlockSpec((1, Ho, Wo, Cp), lambda n: (n, 0, 0, 0)),
        scratch_shapes=[pltpu.VMEM((Hpad, Wpad, Cp), jnp.float32),
                        pltpu.VMEM((2 * Ho, 2 * Wo, Cp), jnp.float32)],
        compiler_params=pltpu.CompilerParams(
            dimension_semantics=("parallel",)),
    )(*flat_inputs)

    # Drop the channel padding and return NCHW like the PyTorch module.
    return jnp.transpose(out[..., :Cout], (0, 3, 1, 2))


# ----------------------------------------------------------------------------
# Pure-JAX reference for validation (f32 end to end).
# ----------------------------------------------------------------------------
def conv_block_ref(x_nchw, params):
    x = jnp.transpose(x_nchw, (0, 2, 3, 1))
    for w, b in params:
        x = jax.lax.conv_general_dilated(
            x, w, window_strides=(1, 1), padding="SAME",
            dimension_numbers=("NHWC", "HWIO", "NHWC"))
        x = jax.nn.relu(x + b)
    x = jax.lax.reduce_window(x, -jnp.inf, jax.lax.max,
                              (1, 2, 2, 1), (1, 2, 2, 1), "SAME")
    return jnp.transpose(x, (0, 3, 1, 2))


def _init_conv(key, cin, cout, ksz):
    # Deterministic, PyTorch-Conv2d-like uniform init (bound = 1/sqrt(fan_in)).
    kw, kb = jax.random.split(key)
    fan_in = cin * ksz * ksz
    bound = 1.0 / float(fan_in) ** 0.5
    w = jax.random.uniform(kw, (ksz, ksz, cin, cout), jnp.float32, -bound, bound)
    b = jax.random.uniform(kb, (cout,), jnp.float32, -bound, bound)
    return w, b


if __name__ == "__main__":
    key = jax.random.PRNGKey(0)
    N, Cin, H, W = 2, 4, 16, 16
    Cout = 8

    k1, k2, kx = jax.random.split(key, 3)
    params = [_init_conv(k1, Cin, Cout, 3), _init_conv(k2, Cout, Cout, 3)]
    x = jax.random.normal(kx, (N, Cin, H, W), jnp.float32)   # NCHW like PyTorch

    out = jax.block_until_ready(conv_block(x, params))
    ref = jax.block_until_ready(conv_block_ref(x, params))

    assert out.shape == (N, Cout, (H + 1) // 2, (W + 1) // 2), out.shape
    max_err = float(jnp.max(jnp.abs(out - ref)))
    # bf16 MXU inputs with f32 accumulation -> small error vs. the f32 reference.
    assert jnp.allclose(out, ref, atol=3e-2, rtol=3e-2), max_err
    print("KERNEL_OK")
</pallas_src>

<mosaic_0001>
module attributes {stable_mosaic.version = 11 : i64} {
  func.func @kernel(%arg0: i32, %arg1: memref<1x16x16x128xf32, #tpu.memory_space<vmem>>, %arg2: memref<1152x128xbf16, #tpu.memory_space<vmem>>, %arg3: memref<1x128xf32, #tpu.memory_space<vmem>>, %arg4: memref<1152x128xbf16, #tpu.memory_space<vmem>>, %arg5: memref<1x128xf32, #tpu.memory_space<vmem>>, %arg6: memref<1x8x8x128xf32, #tpu.memory_space<vmem>>, %arg7: memref<18x25x128xf32, #tpu.memory_space<vmem>>, %arg8: memref<16x16x128xf32, #tpu.memory_space<vmem>>) attributes {dimension_semantics = [#tpu.dimension_semantics<parallel>], iteration_bounds = array<i64: 2>, scalar_prefetch = 0 : i64, scratch_operands = 2 : i64, tpu.core_type = #tpu.core_type<tc>, window_params = [{transform_indices = @transform_0, window_bounds = array<i64: 1, 16, 16, 128>}, {pipeline_mode = #tpu.pipeline_mode<synchronous>, transform_indices = @transform_1, window_bounds = array<i64: 1152, 128>}, {pipeline_mode = #tpu.pipeline_mode<synchronous>, transform_indices = @transform_2, window_bounds = array<i64: 1, 128>}, {pipeline_mode = #tpu.pipeline_mode<synchronous>, transform_indices = @transform_3, window_bounds = array<i64: 1152, 128>}, {pipeline_mode = #tpu.pipeline_mode<synchronous>, transform_indices = @transform_4, window_bounds = array<i64: 1, 128>}, {transform_indices = @transform_5, window_bounds = array<i64: 1, 8, 8, 128>}]} {
    %c0 = arith.constant 0 : index
    %c0_0 = arith.constant 0 : index
    %c0_1 = arith.constant 0 : index
    %c0_2 = arith.constant 0 : index
    %0 = vector.load %arg1[%c0, %c0_0, %c0_1, %c0_2] : memref<1x16x16x128xf32, #tpu.memory_space<vmem>>, vector<1x16x16x128xf32>
    %1 = vector.shape_cast %0 : vector<1x16x16x128xf32> to vector<16x16x128xf32>
    %cst = arith.constant 0.000000e+00 : f32
    %2 = vector.broadcast %cst : f32 to vector<18x25x128xf32>
    %c0_3 = arith.constant 0 : index
    %c0_4 = arith.constant 0 : index
    %c0_5 = arith.constant 0 : index
    %3 = vector.load %arg7[%c0_3, %c0_4, %c0_5] : memref<18x25x128xf32, #tpu.memory_space<vmem>>, vector<18x25x128xf32>
    tpu.vector_store %arg7[%c0_3, %c0_4, %c0_5], %2 {strides = array<i32>} : memref<18x25x128xf32, #tpu.memory_space<vmem>>, vector<18x25x128xf32>,
    %c1 = arith.constant 1 : index
    %c8 = arith.constant 8 : index
    %c0_6 = arith.constant 0 : index
    %4 = vector.load %arg7[%c1, %c8, %c0_6] : memref<18x25x128xf32, #tpu.memory_space<vmem>>, vector<16x16x128xf32>
    tpu.vector_store %arg7[%c1, %c8, %c0_6], %1 {strides = array<i32>} : memref<18x25x128xf32, #tpu.memory_space<vmem>>, vector<16x16x128xf32>,
    %c0_7 = arith.constant 0 : index
    %c0_8 = arith.constant 0 : index
    %c0_9 = arith.constant 0 : index
    %5 = vector.load %arg7[%c0_7, %c0_8, %c0_9] : memref<18x25x128xf32, #tpu.memory_space<vmem>>, vector<18x25x128xf32>
    %6 = vector.extract_strided_slice %5 {offsets = [0, 7, 0], sizes = [16, 16, 128], strides = [1, 1, 1]} : vector<18x25x128xf32> to vector<16x16x128xf32>
    %7 = vector.shape_cast %6 : vector<16x16x128xf32> to vector<256x128xf32>
    %8 = vector.extract_strided_slice %5 {offsets = [0, 8, 0], sizes = [16, 16, 128], strides = [1, 1, 1]} : vector<18x25x128xf32> to vector<16x16x128xf32>
    %9 = vector.shape_cast %8 : vector<16x16x128xf32> to vector<256x128xf32>
    %10 = vector.extract_strided_slice %5 {offsets = [0, 9, 0], sizes = [16, 16, 128], strides = [1, 1, 1]} : vector<18x25x128xf32> to vector<16x16x128xf32>
    %11 = vector.shape_cast %10 : vector<16x16x128xf32> to vector<256x128xf32>
    %12 = vector.extract_strided_slice %5 {offsets = [1, 7, 0], sizes = [16, 16, 128], strides = [1, 1, 1]} : vector<18x25x128xf32> to vector<16x16x128xf32>
    %13 = vector.shape_cast %12 : vector<16x16x128xf32> to vector<256x128xf32>
    %14 = vector.extract_strided_slice %5 {offsets = [1, 8, 0], sizes = [16, 16, 128], strides = [1, 1, 1]} : vector<18x25x128xf32> to vector<16x16x128xf32>
    %15 = vector.shape_cast %14 : vector<16x16x128xf32> to vector<256x128xf32>
    %16 = vector.extract_strided_slice %5 {offsets = [1, 9, 0], sizes = [16, 16, 128], strides = [1, 1, 1]} : vector<18x25x128xf32> to vector<16x16x128xf32>
    %17 = vector.shape_cast %16 : vector<16x16x128xf32> to vector<256x128xf32>
    %18 = vector.extract_strided_slice %5 {offsets = [2, 7, 0], sizes = [16, 16, 128], strides = [1, 1, 1]} : vector<18x25x128xf32> to vector<16x16x128xf32>
    %19 = vector.shape_cast %18 : vector<16x16x128xf32> to vector<256x128xf32>
    %20 = vector.extract_strided_slice %5 {offsets = [2, 8, 0], sizes = [16, 16, 128], strides = [1, 1, 1]} : vector<18x25x128xf32> to vector<16x16x128xf32>
    %21 = vector.shape_cast %20 : vector<16x16x128xf32> to vector<256x128xf32>
    %22 = vector.extract_strided_slice %5 {offsets = [2, 9, 0], sizes = [16, 16, 128], strides = [1, 1, 1]} : vector<18x25x128xf32> to vector<16x16x128xf32>
    %23 = vector.shape_cast %22 : vector<16x16x128xf32> to vector<256x128xf32>
    %24 = tpu.concatenate %7, %9, %11, %13, %15, %17, %19, %21, %23 in 1 : vector<256x128xf32>, vector<256x128xf32>, vector<256x128xf32>, vector<256x128xf32>, vector<256x128xf32>, vector<256x128xf32>, vector<256x128xf32>, vector<256x128xf32>, vector<256x128xf32> -> vector<256x1152xf32>
    %25 = arith.truncf %24 : vector<256x1152xf32> to vector<256x1152xbf16>
    %c0_10 = arith.constant 0 : index
    %c0_11 = arith.constant 0 : index
    %26 = vector.load %arg2[%c0_10, %c0_11] : memref<1152x128xbf16, #tpu.memory_space<vmem>>, vector<1152x128xbf16>
    %cst_12 = arith.constant dense<0.000000e+00> : vector<256x128xf32>
    %27 = tpu.matmul %25, %26, %cst_12 {dimension_numbers = #tpu.dot_dimension_numbers<[1], [0], [0], [1], [0, 0, 1, 1], [], []>} : vector<256x1152xbf16>, vector<1152x128xbf16>, vector<256x128xf32> -> vector<256x128xf32>
    %c0_13 = arith.constant 0 : index
    %c0_14 = arith.constant 0 : index
    %28 = vector.load %arg3[%c0_13, %c0_14] : memref<1x128xf32, #tpu.memory_space<vmem>>, vector<1x128xf32>
    %29 = vector.broadcast %28 : vector<1x128xf32> to vector<256x128xf32>
    %30 = arith.addf %27, %29 : vector<256x128xf32>
    %cst_15 = arith.constant 0.000000e+00 : f32
    %31 = vector.broadcast %cst_15 : f32 to vector<256x128xf32>
    %32 = arith.maximumf %30, %31 : vector<256x128xf32>
    %33 = vector.shape_cast %32 : vector<256x128xf32> to vector<16x16x128xf32>
    %cst_16 = arith.constant 0.000000e+00 : f32
    %34 = vector.broadcast %cst_16 : f32 to vector<18x25x128xf32>
    %c0_17 = arith.constant 0 : index
    %c0_18 = arith.constant 0 : index
    %c0_19 = arith.constant 0 : index
    %35 = vector.load %arg7[%c0_17, %c0_18, %c0_19] : memref<18x25x128xf32, #tpu.memory_space<vmem>>, vector<18x25x128xf32>
    tpu.vector_store %arg7[%c0_17, %c0_18, %c0_19], %34 {strides = array<i32>} : memref<18x25x128xf32, #tpu.memory_space<vmem>>, vector<18x25x128xf32>,
    %c1_20 = arith.constant 1 : index
    %c8_21 = arith.constant 8 : index
    %c0_22 = arith.constant 0 : index
    %36 = vector.load %arg7[%c1_20, %c8_21, %c0_22] : memref<18x25x128xf32, #tpu.memory_space<vmem>>, vector<16x16x128xf32>
    tpu.vector_store %arg7[%c1_20, %c8_21, %c0_22], %33 {strides = array<i32>} : memref<18x25x128xf32, #tpu.memory_space<vmem>>, vector<16x16x128xf32>,
    %c0_23 = arith.constant 0 : index
    %c0_24 = arith.constant 0 : index
    %c0_25 = arith.constant 0 : index
    %37 = vector.load %arg7[%c0_23, %c0_24, %c0_25] : memref<18x25x128xf32, #tpu.memory_space<vmem>>, vector<18x25x128xf32>
    %38 = vector.extract_strided_slice %37 {offsets = [0, 7, 0], sizes = [16, 16, 128], strides = [1, 1, 1]} : vector<18x25x128xf32> to vector<16x16x128xf32>
    %39 = vector.shape_cast %38 : vector<16x16x128xf32> to vector<256x128xf32>
    %40 = vector.extract_strided_slice %37 {offsets = [0, 8, 0], sizes = [16, 16, 128], strides = [1, 1, 1]} : vector<18x25x128xf32> to vector<16x16x128xf32>
    %41 = vector.shape_cast %40 : vector<16x16x128xf32> to vector<256x128xf32>
    %42 = vector.extract_strided_slice %37 {offsets = [0, 9, 0], sizes = [16, 16, 128], strides = [1, 1, 1]} : vector<18x25x128xf32> to vector<16x16x128xf32>
    %43 = vector.shape_cast %42 : vector<16x16x128xf32> to vector<256x128xf32>
    %44 = vector.extract_strided_slice %37 {offsets = [1, 7, 0], sizes = [16, 16, 128], strides = [1, 1, 1]} : vector<18x25x128xf32> to vector<16x16x128xf32>
    %45 = vector.shape_cast %44 : vector<16x16x128xf32> to vector<256x128xf32>
    %46 = vector.extract_strided_slice %37 {offsets = [1, 8, 0], sizes = [16, 16, 128], strides = [1, 1, 1]} : vector<18x25x128xf32> to vector<16x16x128xf32>
    %47 = vector.shape_cast %46 : vector<16x16x128xf32> to vector<256x128xf32>
    %48 = vector.extract_strided_slice %37 {offsets = [1, 9, 0], sizes = [16, 16, 128], strides = [1, 1, 1]} : vector<18x25x128xf32> to vector<16x16x128xf32>
    %49 = vector.shape_cast %48 : vector<16x16x128xf32> to vector<256x128xf32>
    %50 = vector.extract_strided_slice %37 {offsets = [2, 7, 0], sizes = [16, 16, 128], strides = [1, 1, 1]} : vector<18x25x128xf32> to vector<16x16x128xf32>
    %51 = vector.shape_cast %50 : vector<16x16x128xf32> to vector<256x128xf32>
    %52 = vector.extract_strided_slice %37 {offsets = [2, 8, 0], sizes = [16, 16, 128], strides = [1, 1, 1]} : vector<18x25x128xf32> to vector<16x16x128xf32>
    %53 = vector.shape_cast %52 : vector<16x16x128xf32> to vector<256x128xf32>
    %54 = vector.extract_strided_slice %37 {offsets = [2, 9, 0], sizes = [16, 16, 128], strides = [1, 1, 1]} : vector<18x25x128xf32> to vector<16x16x128xf32>
    %55 = vector.shape_cast %54 : vector<16x16x128xf32> to vector<256x128xf32>
    %56 = tpu.concatenate %39, %41, %43, %45, %47, %49, %51, %53, %55 in 1 : vector<256x128xf32>, vector<256x128xf32>, vector<256x128xf32>, vector<256x128xf32>, vector<256x128xf32>, vector<256x128xf32>, vector<256x128xf32>, vector<256x128xf32>, vector<256x128xf32> -> vector<256x1152xf32>
    %57 = arith.truncf %56 : vector<256x1152xf32> to vector<256x1152xbf16>
    %c0_26 = arith.constant 0 : index
    %c0_27 = arith.constant 0 : index
    %58 = vector.load %arg4[%c0_26, %c0_27] : memref<1152x128xbf16, #tpu.memory_space<vmem>>, vector<1152x128xbf16>
    %cst_28 = arith.constant dense<0.000000e+00> : vector<256x128xf32>
    %59 = tpu.matmul %57, %58, %cst_28 {dimension_numbers = #tpu.dot_dimension_numbers<[1], [0], [0], [1], [0, 0, 1, 1], [], []>} : vector<256x1152xbf16>, vector<1152x128xbf16>, vector<256x128xf32> -> vector<256x128xf32>
    %c0_29 = arith.constant 0 : index
    %c0_30 = arith.constant 0 : index
    %60 = vector.load %arg5[%c0_29, %c0_30] : memref<1x128xf32, #tpu.memory_space<vmem>>, vector<1x128xf32>
    %61 = vector.broadcast %60 : vector<1x128xf32> to vector<256x128xf32>
    %62 = arith.addf %59, %61 : vector<256x128xf32>
    %cst_31 = arith.constant 0.000000e+00 : f32
    %63 = vector.broadcast %cst_31 : f32 to vector<256x128xf32>
    %64 = arith.maximumf %62, %63 : vector<256x128xf32>
    %65 = vector.shape_cast %64 : vector<256x128xf32> to vector<16x16x128xf32>
    %c0_32 = arith.constant 0 : index
    %c0_33 = arith.constant 0 : index
    %c0_34 = arith.constant 0 : index
    %66 = vector.load %arg8[%c0_32, %c0_33, %c0_34] : memref<16x16x128xf32, #tpu.memory_space<vmem>>, vector<16x16x128xf32>
    tpu.vector_store %arg8[%c0_32, %c0_33, %c0_34], %65 {strides = array<i32>} : memref<16x16x128xf32, #tpu.memory_space<vmem>>, vector<16x16x128xf32>,
    %c0_35 = arith.constant 0 : index
    %c0_36 = arith.constant 0 : index
    %c0_37 = arith.constant 0 : index
    %67 = tpu.strided_load %arg8[%c0_35, %c0_36, %c0_37] {strides = array<i32: 2, 2, 1>} : memref<16x16x128xf32, #tpu.memory_space<vmem>>, vector<8x8x128xf32>
    %c0_38 = arith.constant 0 : index
    %c1_39 = arith.constant 1 : index
    %c0_40 = arith.constant 0 : index
    %68 = tpu.strided_load %arg8[%c0_38, %c1_39, %c0_40] {strides = array<i32: 2, 2, 1>} : memref<16x16x128xf32, #tpu.memory_space<vmem>>, vector<8x8x128xf32>
    %c1_41 = arith.constant 1 : index
    %c0_42 = arith.constant 0 : index
    %c0_43 = arith.constant 0 : index
    %69 = tpu.strided_load %arg8[%c1_41, %c0_42, %c0_43] {strides = array<i32: 2, 2, 1>} : memref<16x16x128xf32, #tpu.memory_space<vmem>>, vector<8x8x128xf32>
    %c1_44 = arith.constant 1 : index
    %c1_45 = arith.constant 1 : index
    %c0_46 = arith.constant 0 : index
    %70 = tpu.strided_load %arg8[%c1_44, %c1_45, %c0_46] {strides = array<i32: 2, 2, 1>} : memref<16x16x128xf32, #tpu.memory_space<vmem>>, vector<8x8x128xf32>
    %71 = arith.maximumf %67, %68 : vector<8x8x128xf32>
    %72 = arith.maximumf %69, %70 : vector<8x8x128xf32>
    %73 = arith.maximumf %71, %72 : vector<8x8x128xf32>
    %74 = vector.shape_cast %73 : vector<8x8x128xf32> to vector<1x8x8x128xf32>
    %c0_47 = arith.constant 0 : index
    %c0_48 = arith.constant 0 : index
    %c0_49 = arith.constant 0 : index
    %c0_50 = arith.constant 0 : index
    %75 = vector.load %arg6[%c0_47, %c0_48, %c0_49, %c0_50] : memref<1x8x8x128xf32, #tpu.memory_space<vmem>>, vector<1x8x8x128xf32>
    tpu.vector_store %arg6[%c0_47, %c0_48, %c0_49, %c0_50], %74 {strides = array<i32>} : memref<1x8x8x128xf32, #tpu.memory_space<vmem>>, vector<1x8x8x128xf32>,
    return
  }
  func.func @transform_0(%arg0: i32) -> (i32, i32, i32, i32) {
    %c0_i32 = arith.constant 0 : i32
    %c0_i32_0 = arith.constant 0 : i32
    %c0_i32_1 = arith.constant 0 : i32
    %c0_i32_2 = arith.constant 0 : i32
    return %arg0, %c0_i32, %c0_i32_0, %c0_i32_1 : i32, i32, i32, i32
  }
  func.func @transform_1(%arg0: i32) -> (i32, i32) {
    %c0_i32 = arith.constant 0 : i32
    %c0_i32_0 = arith.constant 0 : i32
    %c0_i32_1 = arith.constant 0 : i32
    return %c0_i32, %c0_i32_0 : i32, i32
  }
  func.func @transform_2(%arg0: i32) -> (i32, i32) {
    %c0_i32 = arith.constant 0 : i32
    %c0_i32_0 = arith.constant 0 : i32
    %c0_i32_1 = arith.constant 0 : i32
    return %c0_i32, %c0_i32_0 : i32, i32
  }
  func.func @transform_3(%arg0: i32) -> (i32, i32) {
    %c0_i32 = arith.constant 0 : i32
    %c0_i32_0 = arith.constant 0 : i32
    %c0_i32_1 = arith.constant 0 : i32
    return %c0_i32, %c0_i32_0 : i32, i32
  }
  func.func @transform_4(%arg0: i32) -> (i32, i32) {
    %c0_i32 = arith.constant 0 : i32
    %c0_i32_0 = arith.constant 0 : i32
    %c0_i32_1 = arith.constant 0 : i32
    return %c0_i32, %c0_i32_0 : i32, i32
  }
  func.func @transform_5(%arg0: i32) -> (i32, i32, i32, i32) {
    %c0_i32 = arith.constant 0 : i32
    %c0_i32_0 = arith.constant 0 : i32
    %c0_i32_1 = arith.constant 0 : i32
    %c0_i32_2 = arith.constant 0 : i32
    return %arg0, %c0_i32, %c0_i32_0, %c0_i32_1 : i32, i32, i32, i32
  }
}

</mosaic_0001>

<bundles_post_ra>
// kernel: tpu_custom_call.1
= control target key start
LH: loop header
LB: loop body
LE: loop exit
PB: predicated region body
PF: predicated region fallthrough
CT: control target
= control target key end

     0   :  { %10 = vsyncpa [#allocation5], 0  ;;  %s7203_s0 = inlined_call_operand.hbm [shape: f32[2,16,16,128], index: 0, kind: input, shape index: {}]   ;;  %s7204_s1 = inlined_call_operand.hbm [shape: bf16[1152,128], index: 1, kind: input, shape index: {}]   ;;  %s7205_s2 = inlined_call_operand.vmem [shape: f32[1,128], index: 2, kind: input, shape index: {}]   ;;  %s7206_s3 = inlined_call_operand.hbm [shape: bf16[1152,128], index: 3, kind: input, shape index: {}]   ;;  %s7207_s4 = inlined_call_operand.vmem [shape: f32[1,128], index: 4, kind: input, shape index: {}]   ;;  %s7208_s5 = inlined_call_operand.hbm [shape: f32[2,8,8,128], index: 5, kind: output, shape index: {}]  }
   0x1   :  { %12 = vsyncpa [#allocation5 + $0x1], 0 }
   0x2   :  { %13 = vsyncpa [#allocation8], 0 }
   0x3   :  { %14 = vsyncpa [#allocation6], 0 }
   0x4   :  { %16 = vsyncpa [#allocation6 + $0x1], 0  ;;  %s5534_s18 = smov 0   ;;  %s5536_s19 = smov 0  }
   0x5   :  { %s5538_s20 = smov 0   ;;  %s5540_s21 = smov 0  }
   0x6 LB: > { %s5555_s22 = sadd.s32 4294967295, %s5492_s21   ;;  %s4497_s23 = sadd.s32 4294967294, %s5492_s21   ;;  %s5492_s21 = sphi %s5540_s21, %s7467_s21   ;;  %s5488_s20 = sphi %s5538_s20, %s7466_s20   ;;  %s5484_s19 = sphi %s5536_s19, %s7465_s19   ;;  %s5480_s18 = sphi %s5534_s18, %s7464_s18  }
   0x7   : > { %p42_p0 = scmp.ne.s32.totalorder %s5484_s19, %s5480_s18  ;;  %p43_p1 = scmp.eq.s32.totalorder %s5555_s22, 0 }
   0x8   : > { %p150_p2 = scmp.eq.s32.totalorder %s5555_s22, 1  ;;  %p156_p3 = scmp.eq.s32.totalorder %s4497_s23, 1 }
   0x9   : > { %p5564_p4 = por %p43_p1, %p42_p0  ;;  %p4498_p5 = scmp.ge.s32.totalorder %s5492_s21, 1 }
   0xa   : > { %p5569_p6 = por %p156_p3, %p42_p0  ;;  %p163_p7 = scmp.lt.s32.totalorder %s5492_s21, 3 }
   0xb   : > { %s174_s28 = sshll.u32 %s7204_s1, 4  ;;  %s5494_s30 = smov [#allocation7]   ;;  %s175_s28 = int_to_ptr.hbm [resolvable:$true] %s174_s28 }
   0xc   : > { %p5577_p8 = pnand %p4498_p5, %p163_p7  ;;  %s176_s6 = sshll.u32 %s5494_s30, 4  ;;  %s177_s6 = int_to_ptr.vmem [resolvable:$true] %s176_s6 }
   0xd   : > { %s191_s9 = sshll.u32 %s7206_s3, 4  ;;  %s5495_s10 = smov 64   ;;  %s192_s9 = int_to_ptr.hbm [resolvable:$true] %s191_s9 }
   0xe   : > { %p5265_p9 = pneg %p5577_p8  ;;  %s5496_s11 = smov 4  }
   0xf   : > { %s5497_s12 = smov [#allocation9]   ;;  %s5590_s14 = sadd.s32 1, %s5492_s21  }
  0x10   : > { %p5266_p10 = pnand %p5265_p9, %p43_p1  ;;  %s193_s13 = sshll.u32 %s5497_s12, 4  ;;  %s194_s13 = int_to_ptr.vmem [resolvable:$true] %s193_s13 }
  0x11   : > { %s29_s15 = sadd.s32 1, %s5488_s20  ;;  %s26_s16 = ssub.s32 %s5492_s21, %s5590_s14 }
  0x12   : > { %5268 = dma.hbm_to_vmem [thread:$0]  (!%p5266_p10), %s175_s28, 9216, %s177_s6, [#allocation8], %s5495_s10, %s5495_s10, %s5496_s11  }
  0x13   : > { %5271 = dma.hbm_to_vmem [thread:$0]  (!%p5266_p10), %s192_s9, 9216, %s194_s13, [#allocation8], %s5495_s10, %s5495_s10, %s5496_s11  }
  0x14   : > { %p36_p12 = scmp.ne.s32.totalorder %s5488_s20, %s5484_s19  ;;  %p27_p13 = scmp.eq.s32.totalorder %s26_s16, 0 }
  0x15   : > { %p37_p0 = scmp.eq.s32.totalorder %s5492_s21, 0  ;;  %p5282_p5 = scmp.lt.s32.totalorder %s5492_s21, 2 }
  0x16   : > { %p5600_p3 = por %p150_p2, %p36_p12  ;;  %s210_s26 = sand.u32 1, %s5488_s20  }
  0x17   : > { %s5606_s23 = scalar_select %p27_p13, %s5488_s20, %s29_s15  }
  0x18   : > { %p38_p7 = por %p37_p0, %p36_p12  ;;  %s4502_s27 = sshll.u32 %s210_s26, 8 }
  0x19   : > { %s5091_s28 = sshll.u32 %s5492_s21, 8  ;;  %s214_s8 = scalar_lea.vmem [#allocation4], %s4502_s27 }
  0x1a   : > { %s219_s7 = scalar_lea.hbm %s7203_s0, %s5091_s28  ;;  %s222_s9 = sshll.u32 %s214_s8, 4  ;;  %s223_s9 = int_to_ptr.vmem [resolvable:$true] %s222_s9 }
  0x1b   : > { %s220_s10 = sshll.u32 %s219_s7, 4  ;;  %p5613_p2 = pnand %p5282_p5, %p38_p7  ;;  %s221_s10 = int_to_ptr.hbm [resolvable:$true] %s220_s10 }
  0x1c   : > { %s211_s12 = scalar_lea.sflag [#allocation5], %s210_s26  ;;  %s5392_s13 = sshra.s32 %s221_s10, 4  ;;  %s5393_s13 = int_to_ptr.hbm [resolvable:$true] %s5392_s13 }
  0x1d   : > { %s5394_s15 = scalar_lea.hbm %s5393_s13, 256  ;;  %p5396_p10 = pneg %p5613_p2 }
  0x1e   : > { %p5395_p9 = scmp.ne.s32.totalorder %s5393_s13, %s5394_s15  ;;  %s5399_s28 = scalar_lea.hbm %s7203_s0, 512 }
  0x1f   : > { %p5400_p0 = scmp.lt.s32.totalorder %s5393_s13, %s7203_s0  ;;  %p5401_p5 = scmp.lt.s32.totalorder %s5399_s28, %s5394_s15 }
  0x20   : > { %p5397_p12 = pnand %p5396_p10, %p5395_p9 }
  0x21   : > { %p5402_p7 = por %p5401_p5, %p5400_p0 }
  0x22   : > { %p5398_p13 = pneg %p5397_p12 }
  0x24   : > { %p5403_p11 = pnand %p5402_p7, %p5398_p13 }
  0x26   : > { %5406 = shalt.err (!%p5403_p11)
}
  0x27   : > { %s5498_s26 = smov 128   ;;  %s5499_s7 = smov 8  }
  0x28   : > { %5275 = dma.hbm_to_vmem [thread:$0]  (!%p5613_p2), %s221_s10, 4096, %s223_s9, %s211_s12, %s5498_s26, %s5498_s26, %s5499_s7  }
  0x29   : > { %234 = sbr.rel (%p5577_p8) target bundleno = 1511 (0x5e7), region = 40 }
  0x2e   : > { %s5630_s8 = sand.u32 1, %s5484_s19  }
  0x2f   : > { %s4506_s16 = sshll.u32 %s5630_s8, 8  ;;  %s237_s13 = scalar_lea.sflag [#allocation5], %s5630_s8 }
  0x30   : > { %s5634_s15 = scalar_lea.vmem [#allocation4], %s4506_s16 }
  0x31   : > { %5467 = dma.done.wait (%p5564_p4), %s237_s13, 4096  }
  0x32   : > { %5469 = vsyncadd (%p5564_p4), %s237_s13, 4294963200 }
  0x33   : > { %5471 = dma.done.wait (%p43_p1), [#allocation8], 18432  }
  0x34   : > { %5473 = vsyncadd (%p43_p1), [#allocation8], 4294948864  ;;  %v7209_v0 = vmov 0.0   ;;  %v5099_v1 = vld [vmem:[#allocation7 + $0x38] sm:$0xff]  ;;  %v5098_v3 = vld [vmem:[#allocation7 + $0x30] sm:$0xff]  ;;  %vm535_vm0 = vcmask 1040384  }
  0x35   : > { %2280 = vst [vmem:[#allocation2 + $0xc8] sm:$0xff] %v7209_v0  ;;  %v5107_v2 = vld [vmem:[#allocation7 + $0x78] sm:$0xff]  ;;  %1447 = vmatpush.bf16.msra.mxu0 %v5099_v1  ;;  %5237 = vmatpush.bf16.msra.mxu2 %v5099_v1  ;;  %v5106_v4 = vld [vmem:[#allocation7 + $0x70] sm:$0xff]  ;;  %v5097_v5 = vld [vmem:[#allocation7 + $0x28] sm:$0xff]  ;;  %v5670_v16 = vrot.slane %v7209_v0, 7  ;;  %v5501_v35 = vmov 0.0|0.0  }
  0x36   : > { %313 = vst [vmem:[#allocation2 + $0x28] sm:$0x1] %v7209_v0  ;;  %5245 = vmatpush.bf16.msra.mxu3 %v5107_v2  ;;  %1536 = vmatpush.bf16.msra.mxu1 %v5107_v2  ;;  %v5105_v6 = vld [vmem:[#allocation7 + $0x68] sm:$0xff]  ;;  %v5096_v7 = vld [vmem:[#allocation7 + $0x20] sm:$0xff]  ;;  %v5095_v9 = vld [vmem:[#allocation7 + $0x18] sm:$0xff]  ;;  %vm664_vm1 = vcmask 1046528  }
  0x37   : > { %317 = vst [vmem:[#allocation2 + $0x120] sm:$0x1] %v7209_v0  ;;  %v5104_v8 = vld [vmem:[#allocation7 + $0x60] sm:$0xff]  ;;  %v5103_v10 = vld [vmem:[#allocation7 + $0x58] sm:$0xff]  ;;  %v5094_v11 = vld [vmem:[#allocation7 + $0x10] sm:$0xff]  ;;  %v813_v26 = vpack.c.bf16 %v5670_v16, %v5670_v16  ;;  %s4509_s11 = sshll.u32 %s5630_s8, 6 }
  0x38   : > { %321 = vst [vmem:[#allocation2 + $0x158] sm:$0x1] %v7209_v0  ;;  %v5102_v12 = vld [vmem:[#allocation7 + $0x50] sm:$0xff]  ;;  %v5667_v14 = vld [vmem:[%s5634_s15 + $0x78] sm:$0xff]  ;;  %v5093_v15 = vld [vmem:[#allocation7 + $0x8] sm:$0xff]  ;;  %s7120_s12 = scalar_lea.vmem [#allocation10], %s4509_s11 }
  0x39   : > { %325 = vst [vmem:[#allocation2 + $0xb8] sm:$0x1] %v7209_v0  ;;  %1448 = vmatpush.bf16.msra.mxu0 %v5098_v3  ;;  %5238 = vmatpush.bf16.msra.mxu2 %v5098_v3  ;;  %v5664_v13 = vld [vmem:[%s5634_s15 + $0x70] sm:$0xff]  ;;  %v579_v18 = vrot.slane %v5667_v14, 7  ;;  %v5101_v19 = vld [vmem:[#allocation7 + $0x48] sm:$0xff]  ;;  %v5092_v20 = vld [vmem:[#allocation7] sm:$0xff] }
  0x3a   : > { %329 = vst [vmem:[#allocation2 + $0x1c0] sm:$0x1] %v7209_v0  ;;  %5246 = vmatpush.bf16.msra.mxu3 %v5106_v4  ;;  %1537 = vmatpush.bf16.msra.mxu1 %v5106_v4  ;;  %v577_v17 = vrot.slane %v5664_v13, 7  ;;  %v5100_v23 = vld [vmem:[#allocation7 + $0x40] sm:$0xff]  ;;  %v5115_v24 = vld [vmem:[#allocation7 + $0xb8] sm:$0xff]  ;;  %v5683_v28 = vpack.c.bf16 %v5667_v14, %v5664_v13  ;;  %v5114_v30 = vld [vmem:[#allocation7 + $0xb0] sm:$0xff] }
  0x3b   : > { %333 = vst [vmem:[#allocation2 + $0x1b8] sm:$0x1] %v7209_v0  ;;  %v5123_v25 = vld [vmem:[#allocation7 + $0xf8] sm:$0xff]  ;;  %v5122_v31 = vld [vmem:[#allocation7 + $0xf0] sm:$0xff]  ;;  %v5688_v32 = vld [vmem:[%s5634_s15] sm:$0xff]  ;;  %s5236_s27 = sshll.u32 %s5555_s22, 6 }
  0x3c   : > { %337 = vst [vmem:[#allocation2 + $0x38] sm:$0x1] %v7209_v0  ;;  %v578_v21 = vsel %vm535_vm0, %v5670_v16, %v577_v17  ;;  %v580_v22 = vsel %vm535_vm0, %v577_v17, %v579_v18  ;;  %v5131_v29 = vld [vmem:[#allocation7 + $0x138] sm:$0xff]  ;;  %v5691_v33 = vld [vmem:[%s5634_s15 + $0x8] sm:$0xff]  ;;  %v5130_v34 = vld [vmem:[#allocation7 + $0x130] sm:$0xff]  ;;  %v542_v40 = vrot.slane %v5688_v32, 7  ;;  %s4386_s6 = scalar_lea.hbm %s7208_s5, %s5236_s27 }
  0x3d   : > { %341 = vst [vmem:[#allocation2 + $0x1c8] sm:$0x1] %v7209_v0  ;;  %1449 = vmatpush.bf16.msra.mxu0 %v5097_v5  ;;  %5239 = vmatpush.bf16.msra.mxu2 %v5097_v5  ;;  %v5679_v27 = vpack.c.bf16 %v580_v22, %v578_v21  ;;  %v5694_v36 = vld [vmem:[%s5634_s15 + $0x80] sm:$0xff]  ;;  %v5697_v37 = vld [vmem:[%s5634_s15 + $0x88] sm:$0xff]  ;;  %v544_v41 = vrot.slane %v5691_v33, 7  ;;  %v5719_v52 = vpack.c.bf16 %v5691_v33, %v5688_v32  ;;  %v5724_v53 = vld [vmem:[%s5634_s15 + $0x10] sm:$0xff] }
  0x3e   : > { %345 = vst [vmem:[#allocation2 + $0x170] sm:$0x1] %v7209_v0  ;;  %5247 = vmatpush.bf16.msra.mxu3 %v5105_v6  ;;  %1538 = vmatpush.bf16.msra.mxu1 %v5105_v6  ;;  %v5113_v38 = vld [vmem:[#allocation7 + $0xa8] sm:$0xff]  ;;  %v582_v42 = vrot.slane %v5694_v36, 7  ;;  %v584_v43 = vrot.slane %v5697_v37, 7  ;;  %v543_v45 = vsel %vm535_vm0, %v5670_v16, %v542_v40  ;;  %v5715_v51 = vpack.c.bf16 %v5697_v37, %v5694_v36  ;;  %v5728_v54 = vld [vmem:[%s5634_s15 + $0x18] sm:$0xff] }
  0x3f   : > { %349 = vst [vmem:[#allocation2 + $0x1f0] sm:$0x1] %v7209_v0  ;;  %v5121_v39 = vld [vmem:[#allocation7 + $0xe8] sm:$0xff]  ;;  %v545_v46 = vsel %vm535_vm0, %v542_v40, %v544_v41  ;;  %v5112_v55 = vld [vmem:[#allocation7 + $0xa0] sm:$0xff]  ;;  %v5732_v57 = vld [vmem:[%s5634_s15 + $0x90] sm:$0xff]  ;;  %v547_v60 = vrot.slane %v5724_v53, 7 }
  0x40   : > { %353 = vst [vmem:[#allocation2 + $0x160] sm:$0x1] %v7209_v0  ;;  %v5129_v44 = vld [vmem:[#allocation7 + $0x128] sm:$0xff]  ;;  %v583_v47 = vsel %vm535_vm0, %v5670_v16, %v582_v42  ;;  %v585_v48 = vsel %vm535_vm0, %v582_v42, %v584_v43  ;;  %v5709_v49 = vpack.c.bf16 %v545_v46, %v543_v45  ;;  %v5120_v56 = vld [vmem:[#allocation7 + $0xe0] sm:$0xff]  ;;  %v5735_v58 = vld [vmem:[%s5634_s15 + $0x98] sm:$0xff]  ;;  %v549_v61 = vrot.slane %v5728_v54, 7 }
  0x41   : > { %357 = vst [vmem:[#allocation2 + $0x1b0] sm:$0x1] %v7209_v0  ;;  %1450 = vmatpush.bf16.msra.mxu0 %v5096_v7  ;;  %5240 = vmatpush.bf16.msra.mxu2 %v5096_v7  ;;  %v5711_v50 = vpack.c.bf16 %v585_v48, %v583_v47  ;;  %v5128_v59 = vld [vmem:[#allocation7 + $0x120] sm:$0xff]  ;;  %v587_v62 = vrot.slane %v5732_v57, 7  ;;  %v589_v63 = vrot.slane %v5735_v58, 7  ;;  %v548_v1 = vsel %vm535_vm0, %v5670_v16, %v547_v60  ;;  %v5773_v17 = vld [vmem:[%s5634_s15 + $0xa8] sm:$0xff] }
  0x42   : > { %361 = vst [vmem:[#allocation2 + $0x230] sm:$0x1] %v7209_v0  ;;  %5248 = vmatpush.bf16.msra.mxu3 %v5104_v8  ;;  %1539 = vmatpush.bf16.msra.mxu1 %v5104_v8  ;;  %v550_v2 = vsel %vm535_vm0, %v547_v60, %v549_v61  ;;  %v5753_v7 = vpack.c.bf16 %v5735_v58, %v5732_v57  ;;  %v5127_v18 = vld [vmem:[#allocation7 + $0x118] sm:$0xff]  ;;  %v594_v22 = vrot.slane %v5773_v17, 7  ;;  %v5118_v40 = vld [vmem:[#allocation7 + $0xd0] sm:$0xff]  ;;  %s4387_s26 = sshll.u32 %s7120_s12, 4  ;;  %s4388_s26 = int_to_ptr.vmem [resolvable:$true] %s4387_s26 }
  0x43   : > { %365 = vst [vmem:[#allocation2 + $0x200] sm:$0x1] %v7209_v0  ;;  %v588_v3 = vsel %vm535_vm0, %v5670_v16, %v587_v62  ;;  %v590_v4 = vsel %vm535_vm0, %v587_v62, %v589_v63  ;;  %v5747_v5 = vpack.c.bf16 %v550_v2, %v548_v1  ;;  %v5757_v8 = vpack.c.bf16 %v5728_v54, %v5724_v53  ;;  %v5808_v41 = vld [vmem:[%s5634_s15 + $0xb0] sm:$0xff]  ;;  %v5811_v42 = vld [vmem:[%s5634_s15 + $0xb8] sm:$0xff]  ;;  %v5838_v1 = vld [vmem:[%s5634_s15 + $0x40] sm:$0xff]  ;;  %s4389_s7 = sshll.u32 %s4386_s6, 4  ;;  %s4390_s7 = int_to_ptr.hbm [resolvable:$true] %s4389_s7 }
  0x44   : > { %369 = vst [vmem:[#allocation2 + $0x208] sm:$0x1] %v7209_v0  ;;  %v5749_v6 = vpack.c.bf16 %v590_v4, %v588_v3  ;;  %v5126_v43 = vld [vmem:[#allocation7 + $0x110] sm:$0xff]  ;;  %v597_v46 = vrot.slane %v5808_v41, 7  ;;  %v599_v47 = vrot.slane %v5811_v42, 7  ;;  %v5829_v62 = vpack.c.bf16 %v5811_v42, %v5808_v41  ;;  %v5841_v2 = vld [vmem:[%s5634_s15 + $0x48] sm:$0xff] }
  0x45   : > { %373 = vst [vmem:[#allocation2 + $0xc0] sm:$0x1] %v7209_v0  ;;  %1451 = vmatpush.bf16.msra.mxu0 %v5095_v9  ;;  %5241 = vmatpush.bf16.msra.mxu2 %v5095_v9  ;;  %v5762_v9 = vld [vmem:[%s5634_s15 + $0x20] sm:$0xff]  ;;  %v5109_v4 = vld [vmem:[#allocation7 + $0x88] sm:$0xff]  ;;  %s4375_s16 = scalar_lea.sflag [#allocation6], %s5630_s8  ;;  %s5436_s13 = sshra.s32 %s4390_s7, 4  ;;  %s5437_s13 = int_to_ptr.hbm [resolvable:$true] %s5436_s13 }
  0x46   : > { %377 = vst [vmem:[#allocation2 + $0x20] sm:$0x1] %v7209_v0  ;;  %5249 = vmatpush.bf16.msra.mxu3 %v5103_v10  ;;  %1540 = vmatpush.bf16.msra.mxu1 %v5103_v10  ;;  %v5766_v10 = vld [vmem:[%s5634_s15 + $0x28] sm:$0xff]  ;;  %v5845_v3 = vld [vmem:[%s5634_s15 + $0xc0] sm:$0xff]  ;;  %s5438_s22 = scalar_lea.hbm %s5437_s13, 64  ;;  %s5442_s29 = scalar_lea.hbm %s7208_s5, 128 }
  0x47   : > { %381 = vst [vmem:[#allocation2 + $0xa0] sm:$0x1] %v7209_v0  ;;  %p5439_p1 = scmp.ne.s32.totalorder %s5437_s13, %s5438_s22  ;;  %p5443_p11 = scmp.lt.s32.totalorder %s5437_s13, %s7208_s5 }
  0x48   : > { %7288 = vst [vmem:[#allocation14_spill] sm:$0xff] %v5683_v28  ;;  %p5444_p2 = scmp.lt.s32.totalorder %s5442_s29, %s5438_s22 }
  0x49   : > { %1452 = vmatpush.bf16.msra.mxu0 %v5094_v11  ;;  %5242 = vmatpush.bf16.msra.mxu2 %v5094_v11  ;;  %7289 = vst [vmem:[#allocation15_spill] sm:$0xff] %v5711_v50  ;;  %v5111_v11 = vld [vmem:[#allocation7 + $0x98] sm:$0xff]  ;;  %p5440_p4 = pnand %p5439_p1, %p5600_p3 }
  0x4a   : > { %5250 = vmatpush.bf16.msra.mxu3 %v5102_v12  ;;  %1541 = vmatpush.bf16.msra.mxu1 %v5102_v12  ;;  %7290 = vst [vmem:[#allocation16_spill] sm:$0xff] %v5715_v51  ;;  %v5119_v12 = vld [vmem:[#allocation7 + $0xd8] sm:$0xff]  ;;  %p5445_p9 = por %p5444_p2, %p5443_p11 }
  0x4b   : > { %7294 = vst [vmem:[#allocation20_spill] sm:$0xff] %v5845_v3  ;;  %p5441_p8 = pneg %p5440_p4 }
  0x4d   : > { %1453 = vmatpush.bf16.msra.mxu0 %v5093_v15  ;;  %5243 = vmatpush.bf16.msra.mxu2 %v5093_v15  ;;  %v5770_v15 = vld [vmem:[%s5634_s15 + $0xa0] sm:$0xff]  ;;  %p5446_p10 = pnand %p5445_p9, %p5441_p8 }
  0x4e   : > { %5251 = vmatpush.bf16.msra.mxu3 %v5101_v19  ;;  %1542 = vmatpush.bf16.msra.mxu1 %v5101_v19  ;;  %v552_v19 = vrot.slane %v5762_v9, 7  ;;  %v592_v21 = vrot.slane %v5770_v15, 7 }
  0x51   : > { %1454 = vmatpush.bf16.msra.mxu0 %v5092_v20  ;;  %5244 = vmatpush.bf16.msra.mxu2 %v5092_v20  ;;  %v554_v20 = vrot.slane %v5766_v10, 7 }
  0x52   : > { %5252 = vmatpush.bf16.msra.mxu3 %v5100_v23  ;;  %1543 = vmatpush.bf16.msra.mxu1 %v5100_v23  ;;  %v553_v23 = vsel %vm535_vm0, %v5670_v16, %v552_v19 }
  0x54   : > { %1455 = vmatmul.bf16.vlgmr.msra.gmra.mxu0 %v813_v26  ;;  %1495 = vmatmul.bf16.vlgmr.msra.gmra.mxu2 %v5679_v27  ;;  %v595_v26 = vsel %vm535_vm0, %v592_v21, %v594_v22  ;;  %v602_v22 = vrot.slane %v5845_v3, 7 }
  0x55   : > { %1625 = vmatpush.bf16.msrb.mxu2 %v5115_v24  ;;  %1584 = vmatmul.bf16.vlgmr.msra.gmra.mxu3 %v5683_v28  ;;  %v555_v24 = vsel %vm535_vm0, %v552_v19, %v554_v20  ;;  %v5139_v19 = vld [vmem:[#allocation7 + $0x178] sm:$0xff]  ;;  %v562_v20 = vrot.slane %v5838_v1, 7 }
  0x56   : > { %1714 = vmatpush.bf16.msrb.mxu3 %v5123_v25  ;;  %1803 = vmatpush.bf16.msrb.mxu0 %v5131_v29  ;;  %v593_v25 = vsel %vm535_vm0, %v5670_v16, %v592_v21  ;;  %v5785_v29 = vpack.c.bf16 %v555_v24, %v553_v23  ;;  %v564_v21 = vrot.slane %v5841_v2, 7 }
  0x57   : > { %1544 = vmatmul.bf16.vlgmr.msra.gmra.mxu1 %v5501_v35  ;;  %v5800_v35 = vld [vmem:[%s5634_s15 + $0x30] sm:$0xff]  ;;  %v563_v24 = vsel %vm535_vm0, %v5670_v16, %v562_v20 }
  0x58   : > { %7291 = vst [vmem:[#allocation17_spill] sm:$0xff] %v5785_v29  ;;  %1892 = vmatpush.bf16.msrb.mxu1 %v5139_v19 }
  0x59   : > { %1626 = vmatpush.bf16.msrb.mxu2 %v5114_v30  ;;  %v5787_v30 = vpack.c.bf16 %v595_v26, %v593_v25  ;;  %v565_v25 = vsel %vm535_vm0, %v562_v20, %v564_v21  ;;  %v603_v26 = vsel %vm535_vm0, %v5670_v16, %v602_v22 }
  0x5a   : > { %1715 = vmatpush.bf16.msrb.mxu3 %v5122_v31  ;;  %1804 = vmatpush.bf16.msrb.mxu0 %v5130_v34  ;;  %v5791_v31 = vpack.c.bf16 %v5773_v17, %v5770_v15  ;;  %v5795_v34 = vpack.c.bf16 %v5766_v10, %v5762_v9 }
  0x5c   : > { %7292 = vst [vmem:[#allocation18_spill] sm:$0xff] %v5795_v34 }
  0x5d   : > { %1627 = vmatpush.bf16.msrb.mxu2 %v5113_v38  ;;  %v5804_v38 = vld [vmem:[%s5634_s15 + $0x38] sm:$0xff] }
  0x5e   : > { %1716 = vmatpush.bf16.msrb.mxu3 %v5121_v39  ;;  %1805 = vmatpush.bf16.msrb.mxu0 %v5129_v44  ;;  %v5110_v39 = vld [vmem:[#allocation7 + $0x90] sm:$0xff]  ;;  %v557_v44 = vrot.slane %v5800_v35, 7  ;;  %v559_v45 = vrot.slane %v5804_v38, 7  ;;  %v5833_v63 = vpack.c.bf16 %v5804_v38, %v5800_v35 }
  0x60   : > { %v558_v48 = vsel %vm535_vm0, %v5670_v16, %v557_v44 }
  0x61   : > { %1628 = vmatpush.bf16.msrb.mxu2 %v5112_v55  ;;  %v560_v55 = vsel %vm535_vm0, %v557_v44, %v559_v45  ;;  %v5871_v45 = vpack.c.bf16 %v5841_v2, %v5838_v1 }
  0x62   : > { %1717 = vmatpush.bf16.msrb.mxu3 %v5120_v56  ;;  %1806 = vmatpush.bf16.msrb.mxu0 %v5128_v59  ;;  %v598_v56 = vsel %vm535_vm0, %v5670_v16, %v597_v46  ;;  %v600_v59 = vsel %vm535_vm0, %v597_v46, %v599_v47  ;;  %v5823_v60 = vpack.c.bf16 %v560_v55, %v558_v48  ;;  %v5876_v46 = vld [vmem:[%s5634_s15 + $0x50] sm:$0xff]  ;;  %v5880_v48 = vld [vmem:[%s5634_s15 + $0x58] sm:$0xff]  ;;  %v5108_v55 = vld [vmem:[#allocation7 + $0x80] sm:$0xff] }
  0x63   : > { %v5825_v61 = vpack.c.bf16 %v600_v59, %v598_v56  ;;  %7299 = vst [vmem:[#allocation25_spill] sm:$0xff] %v5871_v45  ;;  %v5138_v47 = vld [vmem:[#allocation7 + $0x170] sm:$0xff]  ;;  %v5116_v56 = vld [vmem:[#allocation7 + $0xc0] sm:$0xff]  ;;  %v567_v19 = vrot.slane %v5876_v46, 7  ;;  %v569_v20 = vrot.slane %v5880_v48, 7 }
  0x64   : > { %1460 = vmatmul.bf16.gmra.mxu0 %v5709_v49  ;;  %1500 = vmatmul.bf16.gmra.mxu2 %v5711_v50  ;;  %v5884_v59 = vld [vmem:[%s5634_s15 + $0xd0] sm:$0xff] }
  0x65   : > { %1589 = vmatmul.bf16.gmra.mxu3 %v5715_v51  ;;  %1629 = vmatpush.bf16.msrb.mxu2 %v5111_v11  ;;  %7293 = vst [vmem:[#allocation19_spill] sm:$0xff] %v5825_v61  ;;  %v5117_v11 = vld [vmem:[#allocation7 + $0xc8] sm:$0xff]  ;;  %v607_v21 = vrot.slane %v5884_v59, 7 }
  0x66   : > { %1718 = vmatpush.bf16.msrb.mxu3 %v5119_v12  ;;  %1807 = vmatpush.bf16.msrb.mxu0 %v5127_v18  ;;  %v5849_v12 = vld [vmem:[%s5634_s15 + $0xc8] sm:$0xff]  ;;  %7300 = vst [vmem:[#allocation26_spill] sm:$0xff] %v5884_v59 }
  0x67   : > { %1549 = vmatmul.bf16.gmra.mxu1 %v5719_v52  ;;  %7295 = vst [vmem:[#allocation21_spill] sm:$0xff] %v5849_v12  ;;  %v5125_v18 = vld [vmem:[#allocation7 + $0x108] sm:$0xff]  ;;  %v604_v23 = vrot.slane %v5849_v12, 7  ;;  %v5867_v44 = vpack.c.bf16 %v5849_v12, %v5845_v3  ;;  %v7305_v12 = vmov 0.0  }
  0x68   : > { %1893 = vmatpush.bf16.msrb.mxu1 %v5138_v47  ;;  %v418_v47 = vld [vmem:[#allocation2 + $0x28] sm:$0x1] }
  0x69   : > { %1630 = vmatpush.bf16.msrb.mxu2 %v5110_v39  ;;  %v605_v39 = vsel %vm535_vm0, %v602_v22, %v604_v23  ;;  %7298 = vst [vmem:[#allocation24_spill] sm:$0xff] %v5867_v44  ;;  %v5136_v23 = vld [vmem:[#allocation7 + $0x160] sm:$0xff] }
  0x6a   : > { %1719 = vmatpush.bf16.msrb.mxu3 %v5118_v40  ;;  %1808 = vmatpush.bf16.msrb.mxu0 %v5126_v43  ;;  %v5861_v40 = vpack.c.bf16 %v565_v25, %v563_v24  ;;  %v5863_v43 = vpack.c.bf16 %v605_v39, %v603_v26  ;;  %v568_v24 = vsel %vm535_vm0, %v5670_v16, %v567_v19 }
  0x6b   : > { %v570_v25 = vsel %vm535_vm0, %v567_v19, %v569_v20  ;;  %v608_v26 = vsel %vm535_vm0, %v5670_v16, %v607_v21  ;;  %2283 = vst [vmem:[#allocation2 + $0x28] sm:$0x1] %v7209_v0  ;;  %v5910_v19 = vpack.c.bf16 %v5880_v48, %v5876_v46  ;;  %v5134_v20 = vld [vmem:[#allocation7 + $0x150] sm:$0xff] }
  0x6c   : > { %7296 = vst [vmem:[#allocation22_spill] sm:$0xff] %v5861_v40 }
  0x6d   : > { %1631 = vmatpush.bf16.msrb.mxu2 %v5109_v4  ;;  %7297 = vst [vmem:[#allocation23_spill] sm:$0xff] %v5863_v43  ;;  %v5887_v4 = vld [vmem:[%s5634_s15 + $0xd8] sm:$0xff] }
  0x6e   : > { %1720 = vmatpush.bf16.msrb.mxu3 %v5117_v11  ;;  %1809 = vmatpush.bf16.msrb.mxu0 %v5125_v18  ;;  %7301 = vst [vmem:[#allocation27_spill] sm:$0xff] %v5887_v4  ;;  %v5124_v11 = vld [vmem:[#allocation7 + $0x100] sm:$0xff]  ;;  %v5137_v18 = vld [vmem:[#allocation7 + $0x168] sm:$0xff]  ;;  %v609_v22 = vrot.slane %v5887_v4, 7 }
  0x6f   : > { %1894 = vmatpush.bf16.msrb.mxu1 %v5137_v18  ;;  %v5906_v18 = vpack.c.bf16 %v5887_v4, %v5884_v59  ;;  %v5132_v4 = vld [vmem:[#allocation7 + $0x140] sm:$0xff]  ;;  %v5163_v59 = vld [vmem:[#allocation7 + $0x238] sm:$0xff] }
  0x70   : > { %v610_v39 = vsel %vm535_vm0, %v607_v21, %v609_v22  ;;  %v5916_v21 = vld [vmem:[%s5634_s15 + $0x60] sm:$0xff]  ;;  %v5147_v22 = vld [vmem:[#allocation7 + $0x1b8] sm:$0xff] }
  0x71   : > { %1632 = vmatpush.bf16.msrb.mxu2 %v5108_v55  ;;  %v5899_v55 = vpack.c.bf16 %v570_v25, %v568_v24  ;;  %7303 = vst [vmem:[#allocation29_spill] sm:$0xff] %v5906_v18  ;;  %v5920_v24 = vld [vmem:[%s5634_s15 + $0x68] sm:$0xff]  ;;  %v5923_v25 = vld [vmem:[%s5634_s15 + $0xe0] sm:$0xff] }
  0x72   : > { %1721 = vmatpush.bf16.msrb.mxu3 %v5116_v56  ;;  %1810 = vmatpush.bf16.msrb.mxu0 %v5124_v11  ;;  %v5901_v56 = vpack.c.bf16 %v610_v39, %v608_v26  ;;  %v5135_v11 = vld [vmem:[#allocation7 + $0x158] sm:$0xff]  ;;  %v5926_v26 = vld [vmem:[%s5634_s15 + $0xe8] sm:$0xff]  ;;  %v574_v0 = vrot.slane %v5920_v24, 7 }
  0x73   : > { %1895 = vmatpush.bf16.msrb.mxu1 %v5136_v23  ;;  %v5155_v23 = vld [vmem:[#allocation7 + $0x1f8] sm:$0xff]  ;;  %7304 = vst [vmem:[#allocation30_spill] sm:$0xff] %v5926_v26  ;;  %v5133_v39 = vld [vmem:[#allocation7 + $0x148] sm:$0xff] }
  0x74   : > { %1465 = vmatmul.bf16.gmra.mxu0 %v5747_v5  ;;  %1505 = vmatmul.bf16.gmra.mxu2 %v5749_v6  ;;  %7302 = vst [vmem:[#allocation28_spill] sm:$0xff] %v5901_v56 }
  0x75   : > { %1594 = vmatmul.bf16.gmra.mxu3 %v5753_v7  ;;  %1981 = vmatpush.bf16.msra.mxu2 %v5147_v22 }
  0x76   : > { %2070 = vmatpush.bf16.msra.mxu3 %v5155_v23  ;;  %2159 = vmatpush.bf16.msra.mxu0 %v5163_v59  ;;  %v670_v59 = vrot.slane %v5688_v32, 1 }
  0x77   : > { %1554 = vmatmul.bf16.gmra.mxu1 %v5757_v8 }
  0x78   : > { %1896 = vmatpush.bf16.msrb.mxu1 %v5135_v11  ;;  %v572_v11 = vrot.slane %v5916_v21, 7 }
  0x7a   : > { %v575_v22 = vsel %vm535_vm0, %v572_v11, %v574_v0  ;;  %v5949_v0 = vpack.c.bf16 %v5920_v24, %v5916_v21 }
  0x7c   : > { %1897 = vmatpush.bf16.msrb.mxu1 %v5134_v20  ;;  %7309 = vst [vmem:[#allocation34_spill] sm:$0xff] %v5949_v0 }
  0x80   : > { %1898 = vmatpush.bf16.msrb.mxu1 %v5133_v39 }
  0x84   : > { %1470 = vmatmul.bf16.gmra.mxu0 %v5785_v29  ;;  %1510 = vmatmul.bf16.gmra.mxu2 %v5787_v30 }
  0x85   : > { %1599 = vmatmul.bf16.gmra.mxu3 %v5791_v31  ;;  %1899 = vmatpush.bf16.msrb.mxu1 %v5132_v4  ;;  %v671_v4 = vrot.slane %v5691_v33, 1 }
  0x87   : > { %1559 = vmatmul.bf16.gmra.mxu1 %v5795_v34 }
  0x94   : > { %1475 = vmatmul.bf16.gmra.mxu0 %v5823_v60  ;;  %1515 = vmatmul.bf16.gmra.mxu2 %v5825_v61  ;;  %v5945_v61 = vpack.c.bf16 %v5926_v26, %v5923_v25 }
  0x95   : > { %1604 = vmatmul.bf16.gmra.mxu3 %v5829_v62 }
  0x96   : > { %7308 = vst [vmem:[#allocation33_spill] sm:$0xff] %v5945_v61 }
  0x97   : > { %1564 = vmatmul.bf16.gmra.mxu1 %v5833_v63 }
  0xa4   : > { %1480 = vmatmul.bf16.gmra.mxu0 %v5861_v40  ;;  %1520 = vmatmul.bf16.gmra.mxu2 %v5863_v43  ;;  %v422_v43 = vld [vmem:[#allocation2 + $0x120] sm:$0x1] }
  0xa5   : > { %1609 = vmatmul.bf16.gmra.mxu3 %v5867_v44  ;;  %v573_v44 = vsel %vm535_vm0, %v5670_v16, %v572_v11  ;;  %2287 = vst [vmem:[#allocation2 + $0x120] sm:$0x1] %v7305_v12 }
  0xa6   : > { %v5939_v3 = vpack.c.bf16 %v575_v22, %v573_v44  ;;  %v668_v44 = vrot.slane %v418_v47, 1  ;;  %v672_v22 = vsel %vm664_vm1, %v670_v59, %v671_v4  ;;  %v5154_v59 = vld [vmem:[#allocation7 + $0x1f0] sm:$0xff] }
  0xa7   : > { %1569 = vmatmul.bf16.gmra.mxu1 %v5871_v45  ;;  %2071 = vmatpush.bf16.msra.mxu3 %v5154_v59 }
  0xa8   : > { %7306 = vst [vmem:[#allocation31_spill] sm:$0xff] %v5939_v3 }
  0xb4   : > { %1485 = vmatmul.bf16.gmra.mxu0 %v5899_v55  ;;  %1525 = vmatmul.bf16.gmra.mxu2 %v5901_v56  ;;  %v612_v56 = vrot.slane %v5923_v25, 7 }
  0xb5   : > { %1614 = vmatmul.bf16.gmra.mxu3 %v5906_v18  ;;  %v614_v18 = vrot.slane %v5926_v26, 7  ;;  %v5162_v26 = vld [vmem:[#allocation7 + $0x230] sm:$0xff] }
  0xb6   : > { %v613_v20 = vsel %vm535_vm0, %v5670_v16, %v612_v56  ;;  %v665_v16 = vrot.slane %v7305_v12, 1  ;;  %2160 = vmatpush.bf16.msra.mxu0 %v5162_v26 }
  0xb7   : > { %1574 = vmatmul.bf16.gmra.mxu1 %v5910_v19  ;;  %v615_v23 = vsel %vm535_vm0, %v612_v56, %v614_v18  ;;  %v673_v56 = vrot.slane %v422_v43, 1  ;;  %v426_v18 = vld [vmem:[#allocation2 + $0x158] sm:$0x1] }
  0xb8   : > { %v5941_v39 = vpack.c.bf16 %v615_v23, %v613_v20  ;;  %2291 = vst [vmem:[#allocation2 + $0x158] sm:$0x1] %v7305_v12  ;;  %v669_v11 = vsel %vm664_vm1, %v665_v16, %v668_v44  ;;  %v5965_v23 = vld [vmem:[%s7205_s2] ss:$0 sm:$0xff]  ;;  %v5146_v44 = vld [vmem:[#allocation7 + $0x1b0] sm:$0xff] }
  0xb9   : > { %v674_v20 = vsel %vm664_vm1, %v671_v4, %v673_v56  ;;  %v815_v47 = vpack.c.bf16 %v669_v11, %v665_v16  ;;  %1982 = vmatpush.bf16.msra.mxu2 %v5146_v44 }
  0xba   : > { %7307 = vst [vmem:[#allocation32_spill] sm:$0xff] %v5941_v39  ;;  %v818_v33 = vpack.c.bf16 %v674_v20, %v672_v22 }
  0xc4   : > { %1490 = vmatmul.bf16.gmra.mxu0 %v5939_v3  ;;  %1530 = vmatmul.bf16.gmra.mxu2 %v5941_v39 }
  0xc5   : > { %1619 = vmatmul.bf16.gmra.mxu3 %v5945_v61 }
  0xc7   : > { %1579 = vmatmul.bf16.gmra.mxu1 %v5949_v0 }
  0xd1   : > { %v1456_v39 = vpop.f32.mrf.mxu0 }
  0xd2   : > { %v1457_v32 = vadd.f32 %v5965_v23, %v1456_v39 }
  0xd4   : > { %v1545_v43 = vpop.f32.mrf.mxu1  ;;  %1633 = vmatmul.bf16.vlgmr.msrb.gmra.mxu2 %v815_v47  ;;  %1811 = vmatmul.bf16.vlgmr.msrb.gmra.mxu0 %v5719_v52  ;;  %v675_v52 = vrot.slane %v5724_v53, 1  ;;  %v676_v47 = vrot.slane %v5728_v54, 1 }
  0xd5   : > { %v5969_v61 = vadd.f32 %v1545_v43, %v1457_v32  ;;  %1722 = vmatmul.bf16.vlgmr.msrb.gmra.mxu3 %v5709_v49  ;;  %v678_v49 = vrot.slane %v426_v18, 1  ;;  %v430_v32 = vld [vmem:[#allocation2 + $0xb8] sm:$0x1] }
  0xd6   : > { %2295 = vst [vmem:[#allocation2 + $0xb8] sm:$0x1] %v7305_v12  ;;  %v677_v59 = vsel %vm664_vm1, %v675_v52, %v676_v47 }
  0xd7   : > { %1900 = vmatmul.bf16.vlgmr.msrb.gmra.mxu1 %v818_v33  ;;  %v1496_v4 = vpop.f32.mrf.mxu2 }
  0xd8   : > { %v1497_v16 = vadd.f32 %v5965_v23, %v1496_v4  ;;  %v1585_v56 = vpop.f32.mrf.mxu3  ;;  %v679_v4 = vsel %vm664_vm1, %v676_v47, %v678_v49 }
  0xd9   : > { %v1458_v11 = vpop.f32.mrf.mxu0  ;;  %v5987_v18 = vpack.c.bf16 %v679_v4, %v677_v59 }
  0xda   : > { %v5973_v39 = vadd.f32 %v1585_v56, %v1497_v16  ;;  %v1459_v22 = vadd.f32 %v5965_v23, %v1458_v11 }
  0xdc   : > { %v1547_v20 = vpop.f32.mrf.mxu1 }
  0xdd   : > { %v5978_v43 = vadd.f32 %v1547_v20, %v1459_v22 }
  0xdf   : > { %v1498_v44 = vpop.f32.mrf.mxu2 }
  0xe0   : > { %v1499_v16 = vadd.f32 %v5965_v23, %v1498_v44  ;;  %v1587_v56 = vpop.f32.mrf.mxu3 }
  0xe1   : > { %v1461_v11 = vpop.f32.mrf.mxu0 }
  0xe2   : > { %v5984_v53 = vadd.f32 %v1587_v56, %v1499_v16  ;;  %v1462_v54 = vadd.f32 %v5965_v23, %v1461_v11  ;;  %v681_v16 = vrot.slane %v5766_v10, 1  ;;  %v683_v56 = vrot.slane %v430_v32, 1  ;;  %v434_v11 = vld [vmem:[#allocation2 + $0x1c0] sm:$0x1] }
  0xe3   : > { %2299 = vst [vmem:[#allocation2 + $0x1c0] sm:$0x1] %v7305_v12 }
  0xe4   : > { %7310 = vst [vmem:[#allocation35_spill] sm:$0xff] %v5984_v53  ;;  %v1550_v22 = vpop.f32.mrf.mxu1  ;;  %1638 = vmatmul.bf16.gmra.mxu2 %v818_v33  ;;  %1816 = vmatmul.bf16.gmra.mxu0 %v5757_v8  ;;  %v680_v33 = vrot.slane %v5762_v9, 1  ;;  %v684_v53 = vsel %vm664_vm1, %v681_v16, %v683_v56 }
  0xe5   : > { %v5990_v26 = vadd.f32 %v1550_v22, %v1462_v54  ;;  %1727 = vmatmul.bf16.gmra.mxu3 %v5747_v5 }
  0xe7   : > { %1905 = vmatmul.bf16.gmra.mxu1 %v5987_v18  ;;  %v1501_v20 = vpop.f32.mrf.mxu2 }
  0xe8   : > { %v1502_v52 = vadd.f32 %v5965_v23, %v1501_v20  ;;  %v1590_v47 = vpop.f32.mrf.mxu3  ;;  %v682_v20 = vsel %vm664_vm1, %v680_v33, %v681_v16  ;;  %v5153_v33 = vld [vmem:[#allocation7 + $0x1e8] sm:$0xff] }
  0xe9   : > { %v1463_v49 = vpop.f32.mrf.mxu0  ;;  %v6009_v10 = vpack.c.bf16 %v684_v53, %v682_v20  ;;  %2072 = vmatpush.bf16.msra.mxu3 %v5153_v33 }
  0xea   : > { %v5995_v44 = vadd.f32 %v1590_v47, %v1502_v52  ;;  %v1464_v59 = vadd.f32 %v5965_v23, %v1463_v49 }
  0xec   : > { %7311 = vst [vmem:[#allocation36_spill] sm:$0xff] %v5995_v44  ;;  %v1552_v4 = vpop.f32.mrf.mxu1 }
  0xed   : > { %v6000_v54 = vadd.f32 %v1552_v4, %v1464_v59  ;;  %v5145_v4 = vld [vmem:[#allocation7 + $0x1a8] sm:$0xff] }
  0xee   : > { %1983 = vmatpush.bf16.msra.mxu2 %v5145_v4 }
  0xef   : > { %v1503_v22 = vpop.f32.mrf.mxu2 }
  0xf0   : > { %v1504_v52 = vadd.f32 %v5965_v23, %v1503_v22  ;;  %v1592_v47 = vpop.f32.mrf.mxu3 }
  0xf1   : > { %v1466_v49 = vpop.f32.mrf.mxu0 }
  0xf2   : > { %v6006_v44 = vadd.f32 %v1592_v47, %v1504_v52  ;;  %v1467_v9 = vadd.f32 %v5965_v23, %v1466_v49  ;;  %v685_v49 = vrot.slane %v5800_v35, 1 }
  0xf4   : > { %7312 = vst [vmem:[#allocation37_spill] sm:$0xff] %v6006_v44  ;;  %v1555_v32 = vpop.f32.mrf.mxu1  ;;  %1643 = vmatmul.bf16.gmra.mxu2 %v5987_v18  ;;  %1821 = vmatmul.bf16.gmra.mxu0 %v5795_v34  ;;  %v438_v44 = vld [vmem:[#allocation2 + $0x1b8] sm:$0x1] }
  0xf5   : > { %v6013_v59 = vadd.f32 %v1555_v32, %v1467_v9  ;;  %1732 = vmatmul.bf16.gmra.mxu3 %v5785_v29  ;;  %v686_v9 = vrot.slane %v5804_v38, 1  ;;  %v688_v32 = vrot.slane %v434_v11, 1  ;;  %v5161_v29 = vld [vmem:[#allocation7 + $0x228] sm:$0xff]  ;;  %2303 = vst [vmem:[#allocation2 + $0x1b8] sm:$0x1] %v7305_v12 }
  0xf6   : > { %2161 = vmatpush.bf16.msra.mxu0 %v5161_v29 }
  0xf7   : > { %1910 = vmatmul.bf16.gmra.mxu1 %v6009_v10  ;;  %v1506_v16 = vpop.f32.mrf.mxu2  ;;  %v687_v33 = vsel %vm664_vm1, %v685_v49, %v686_v9 }
  0xf8   : > { %v1507_v56 = vadd.f32 %v5965_v23, %v1506_v16  ;;  %v1595_v53 = vpop.f32.mrf.mxu3  ;;  %v689_v16 = vsel %vm664_vm1, %v686_v9, %v688_v32 }
  0xf9   : > { %v1468_v22 = vpop.f32.mrf.mxu0  ;;  %v6032_v11 = vpack.c.bf16 %v689_v16, %v687_v33 }
  0xfa   : > { %v6018_v20 = vadd.f32 %v1595_v53, %v1507_v56  ;;  %v1469_v52 = vadd.f32 %v5965_v23, %v1468_v22 }
  0xfc   : > { %7313 = vst [vmem:[#allocation38_spill] sm:$0xff] %v6018_v20  ;;  %v1557_v47 = vpop.f32.mrf.mxu1 }
  0xfd   : > { %v6023_v34 = vadd.f32 %v1557_v47, %v1469_v52 }
  0xff   : > { %v1508_v4 = vpop.f32.mrf.mxu2 }
 0x100   : > { %v1509_v56 = vadd.f32 %v5965_v23, %v1508_v4  ;;  %v1597_v53 = vpop.f32.mrf.mxu3 }
 0x101   : > { %v1471_v22 = vpop.f32.mrf.mxu0 }
 0x102   : > { %v6029_v35 = vadd.f32 %v1597_v53, %v1509_v56  ;;  %v1472_v38 = vadd.f32 %v5965_v23, %v1471_v22  ;;  %v690_v56 = vrot.slane %v5838_v1, 1  ;;  %v691_v53 = vrot.slane %v5841_v2, 1 }
 0x103   : > { %v693_v22 = vrot.slane %v438_v44, 1 }
 0x104   : > { %7314 = vst [vmem:[#allocation39_spill] sm:$0xff] %v6029_v35  ;;  %v1560_v52 = vpop.f32.mrf.mxu1  ;;  %1648 = vmatmul.bf16.gmra.mxu2 %v6009_v10  ;;  %1826 = vmatmul.bf16.gmra.mxu0 %v5833_v63 }
 0x105   : > { %v6036_v29 = vadd.f32 %v1560_v52, %v1472_v38  ;;  %1737 = vmatmul.bf16.gmra.mxu3 %v5823_v60  ;;  %v442_v38 = vld [vmem:[#allocation2 + $0x38] sm:$0x1]  ;;  %v694_v20 = vsel %vm664_vm1, %v691_v53, %v693_v22 }
 0x106   : > { %2307 = vst [vmem:[#allocation2 + $0x38] sm:$0x1] %v7305_v12 }
 0x107   : > { %1915 = vmatmul.bf16.gmra.mxu1 %v6032_v11  ;;  %v1511_v47 = vpop.f32.mrf.mxu2 }
 0x108   : > { %v1512_v49 = vadd.f32 %v5965_v23, %v1511_v47  ;;  %v1600_v9 = vpop.f32.mrf.mxu3  ;;  %v692_v47 = vsel %vm664_vm1, %v690_v56, %v691_v53  ;;  %v5152_v56 = vld [vmem:[#allocation7 + $0x1e0] sm:$0xff] }
 0x109   : > { %v1473_v32 = vpop.f32.mrf.mxu0  ;;  %v6055_v2 = vpack.c.bf16 %v694_v20, %v692_v47  ;;  %2073 = vmatpush.bf16.msra.mxu3 %v5152_v56 }
 0x10a   : > { %v6041_v4 = vadd.f32 %v1600_v9, %v1512_v49  ;;  %v1474_v33 = vadd.f32 %v5965_v23, %v1473_v32 }
 0x10c   : > { %7315 = vst [vmem:[#allocation40_spill] sm:$0xff] %v6041_v4  ;;  %v1562_v16 = vpop.f32.mrf.mxu1 }
 0x10d   : > { %v6046_v52 = vadd.f32 %v1562_v16, %v1474_v33  ;;  %v5144_v16 = vld [vmem:[#allocation7 + $0x1a0] sm:$0xff] }
 0x10e   : > { %1984 = vmatpush.bf16.msra.mxu2 %v5144_v16 }
 0x10f   : > { %v1513_v35 = vpop.f32.mrf.mxu2 }
 0x110   : > { %v1514_v49 = vadd.f32 %v5965_v23, %v1513_v35  ;;  %v1602_v9 = vpop.f32.mrf.mxu3 }
 0x111   : > { %v1476_v32 = vpop.f32.mrf.mxu0 }
 0x112   : > { %v6052_v4 = vadd.f32 %v1602_v9, %v1514_v49  ;;  %v1477_v1 = vadd.f32 %v5965_v23, %v1476_v32  ;;  %v695_v32 = vrot.slane %v5876_v46, 1 }
 0x114   : > { %7316 = vst [vmem:[#allocation41_spill] sm:$0xff] %v6052_v4  ;;  %v1565_v44 = vpop.f32.mrf.mxu1  ;;  %1653 = vmatmul.bf16.gmra.mxu2 %v6032_v11  ;;  %1831 = vmatmul.bf16.gmra.mxu0 %v5871_v45  ;;  %v446_v4 = vld [vmem:[#allocation2 + $0x1c8] sm:$0x1] }
 0x115   : > { %v6059_v33 = vadd.f32 %v1565_v44, %v1477_v1  ;;  %1742 = vmatmul.bf16.gmra.mxu3 %v5861_v40  ;;  %v696_v1 = vrot.slane %v5880_v48, 1  ;;  %v698_v44 = vrot.slane %v442_v38, 1  ;;  %v5160_v40 = vld [vmem:[#allocation7 + $0x220] sm:$0xff]  ;;  %2311 = vst [vmem:[#allocation2 + $0x1c8] sm:$0x1] %v7305_v12 }
 0x116   : > { %2162 = vmatpush.bf16.msra.mxu0 %v5160_v40 }
 0x117   : > { %1920 = vmatmul.bf16.gmra.mxu1 %v6055_v2  ;;  %v1516_v35 = vpop.f32.mrf.mxu2  ;;  %v697_v56 = vsel %vm664_vm1, %v695_v32, %v696_v1 }
 0x118   : > { %v1517_v53 = vadd.f32 %v5965_v23, %v1516_v35  ;;  %v1605_v20 = vpop.f32.mrf.mxu3  ;;  %v699_v35 = vsel %vm664_vm1, %v696_v1, %v698_v44 }
 0x119   : > { %v1478_v22 = vpop.f32.mrf.mxu0  ;;  %v6078_v38 = vpack.c.bf16 %v699_v35, %v697_v56  ;;  %v700_v35 = vrot.slane %v5916_v21, 1 }
 0x11a   : > { %v6064_v47 = vadd.f32 %v1605_v20, %v1517_v53  ;;  %v1479_v49 = vadd.f32 %v5965_v23, %v1478_v22 }
 0x11c   : > { %v1567_v9 = vpop.f32.mrf.mxu1 }
 0x11d   : > { %v6069_v45 = vadd.f32 %v1567_v9, %v1479_v49 }
 0x11f   : > { %v1518_v16 = vpop.f32.mrf.mxu2 }
 0x120   : > { %v1519_v53 = vadd.f32 %v5965_v23, %v1518_v16  ;;  %v1607_v20 = vpop.f32.mrf.mxu3 }
 0x121   : > { %v1481_v22 = vpop.f32.mrf.mxu0 }
 0x122   : > { %v6075_v46 = vadd.f32 %v1607_v20, %v1519_v53  ;;  %v1482_v48 = vadd.f32 %v5965_v23, %v1481_v22  ;;  %v701_v53 = vrot.slane %v5920_v24, 1  ;;  %v703_v20 = vrot.slane %v446_v4, 1  ;;  %v450_v22 = vld [vmem:[#allocation2 + $0x170] sm:$0x1] }
 0x124   : > { %7317 = vst [vmem:[#allocation42_spill] sm:$0xff] %v6075_v46  ;;  %v1570_v49 = vpop.f32.mrf.mxu1  ;;  %1658 = vmatmul.bf16.gmra.mxu2 %v6055_v2  ;;  %1836 = vmatmul.bf16.gmra.mxu0 %v5910_v19  ;;  %v702_v46 = vsel %vm664_vm1, %v700_v35, %v701_v53  ;;  %v5143_v35 = vld [vmem:[#allocation7 + $0x198] sm:$0xff] }
 0x125   : > { %v6082_v12 = vadd.f32 %v1570_v49, %v1482_v48  ;;  %1747 = vmatmul.bf16.gmra.mxu3 %v5899_v55  ;;  %v6094_v49 = vld [vmem:[#allocation2 + $0xc8] sm:$0xff]  ;;  %1985 = vmatpush.bf16.msra.mxu2 %v5143_v35  ;;  %v5159_v35 = vld [vmem:[#allocation7 + $0x218] sm:$0xff] }
 0x126   : > { %2315 = vst [vmem:[#allocation2 + $0x170] sm:$0x1] %v6094_v49  ;;  %2163 = vmatpush.bf16.msra.mxu0 %v5159_v35 }
 0x127   : > { %1925 = vmatmul.bf16.gmra.mxu1 %v6078_v38  ;;  %v1521_v40 = vpop.f32.mrf.mxu2 }
 0x128   : > { %v1522_v9 = vadd.f32 %v5965_v23, %v1521_v40  ;;  %v1610_v32 = vpop.f32.mrf.mxu3 }
 0x129   : > { %v1483_v1 = vpop.f32.mrf.mxu0 }
 0x12a   : > { %v6087_v44 = vadd.f32 %v1610_v32, %v1522_v9  ;;  %v1484_v16 = vadd.f32 %v5965_v23, %v1483_v1  ;;  %v704_v9 = vsel %vm664_vm1, %v701_v53, %v703_v20  ;;  %v5151_v53 = vld [vmem:[#allocation7 + $0x1d8] sm:$0xff] }
 0x12b   : > { %v6103_v4 = vpack.c.bf16 %v704_v9, %v702_v46  ;;  %2074 = vmatpush.bf16.msra.mxu3 %v5151_v53 }
 0x12c   : > { %7318 = vst [vmem:[#allocation43_spill] sm:$0xff] %v6087_v44  ;;  %v1572_v56 = vpop.f32.mrf.mxu1 }
 0x12d   : > { %v6092_v48 = vadd.f32 %v1572_v56, %v1484_v16 }
 0x12f   : > { %v1523_v40 = vpop.f32.mrf.mxu2 }
 0x130   : > { %v1524_v32 = vadd.f32 %v5965_v23, %v1523_v40  ;;  %v1612_v1 = vpop.f32.mrf.mxu3 }
 0x131   : > { %v1486_v44 = vpop.f32.mrf.mxu0 }
 0x132   : > { %v6100_v21 = vadd.f32 %v1612_v1, %v1524_v32  ;;  %v1487_v24 = vadd.f32 %v5965_v23, %v1486_v44 }
 0x134   : > { %7319 = vst [vmem:[#allocation44_spill] sm:$0xff] %v6100_v21  ;;  %v1575_v16 = vpop.f32.mrf.mxu1  ;;  %1663 = vmatmul.bf16.gmra.mxu2 %v6078_v38  ;;  %1841 = vmatmul.bf16.gmra.mxu0 %v5949_v0  ;;  %v708_v21 = vrot.slane %v450_v22, 1  ;;  %v454_v0 = vld [vmem:[#allocation2 + $0x1f0] sm:$0x1] }
 0x135   : > { %v6107_v56 = vadd.f32 %v1575_v16, %v1487_v24  ;;  %1752 = vmatmul.bf16.gmra.mxu3 %v5939_v3  ;;  %v705_v24 = vrot.slane %v5664_v13, 1  ;;  %v706_v16 = vrot.slane %v5667_v14, 1  ;;  %2319 = vst [vmem:[#allocation2 + $0x1f0] sm:$0x1] %v6094_v49 }
 0x137   : > { %1930 = vmatmul.bf16.gmra.mxu1 %v6103_v4  ;;  %v1526_v20 = vpop.f32.mrf.mxu2 }
 0x138   : > { %v1527_v44 = vadd.f32 %v5965_v23, %v1526_v20  ;;  %v1615_v46 = vpop.f32.mrf.mxu3  ;;  %v707_v20 = vsel %vm664_vm1, %v705_v24, %v706_v16 }
 0x139   : > { %v1488_v40 = vpop.f32.mrf.mxu0 }
 0x13a   : > { %v6112_v9 = vadd.f32 %v1615_v46, %v1527_v44  ;;  %v1489_v32 = vadd.f32 %v5965_v23, %v1488_v40  ;;  %v709_v44 = vsel %vm664_vm1, %v706_v16, %v708_v21  ;;  %v5171_v21 = vld [vmem:[#allocation9 + $0x38] sm:$0xff] }
 0x13b   : > { %v6126_v22 = vpack.c.bf16 %v709_v44, %v707_v20  ;;  %3414 = vmatpush.bf16.msra.mxu1 %v5171_v21 }
 0x13c   : > { %7320 = vst [vmem:[#allocation45_spill] sm:$0xff] %v6112_v9  ;;  %v1577_v1 = vpop.f32.mrf.mxu1 }
 0x13d   : > { %v6117_v3 = vadd.f32 %v1577_v1, %v1489_v32 }
 0x13f   : > { %v1528_v53 = vpop.f32.mrf.mxu2 }
 0x140   : > { %v1529_v46 = vadd.f32 %v5965_v23, %v1528_v53  ;;  %v1617_v40 = vpop.f32.mrf.mxu3 }
 0x141   : > { %v1491_v9 = vpop.f32.mrf.mxu0 }
 0x142   : > { %v6123_v13 = vadd.f32 %v1617_v40, %v1529_v46  ;;  %v1492_v14 = vadd.f32 %v5965_v23, %v1491_v9  ;;  %v710_v46 = vrot.slane %v5694_v36, 1  ;;  %v711_v40 = vrot.slane %v5697_v37, 1 }
 0x144   : > { %7321 = vst [vmem:[#allocation46_spill] sm:$0xff] %v6123_v13  ;;  %v1580_v32 = vpop.f32.mrf.mxu1  ;;  %1668 = vmatmul.bf16.gmra.mxu2 %v6103_v4  ;;  %1846 = vmatmul.bf16.gmra.mxu0 %v5683_v28 }
 0x145   : > { %v6130_v1 = vadd.f32 %v1580_v32, %v1492_v14  ;;  %1757 = vmatmul.bf16.gmra.mxu3 %v5679_v27  ;;  %v713_v14 = vrot.slane %v454_v0, 1  ;;  %v458_v32 = vld [vmem:[#allocation2 + $0x160] sm:$0x1]  ;;  %v5142_v0 = vld [vmem:[#allocation7 + $0x190] sm:$0xff] }
 0x146   : > { %2323 = vst [vmem:[#allocation2 + $0x160] sm:$0x1] %v6094_v49  ;;  %1986 = vmatpush.bf16.msra.mxu2 %v5142_v0 }
 0x147   : > { %1935 = vmatmul.bf16.gmra.mxu1 %v6126_v22  ;;  %v1531_v24 = vpop.f32.mrf.mxu2  ;;  %v714_v21 = vsel %vm664_vm1, %v711_v40, %v713_v14 }
 0x148   : > { %v1532_v16 = vadd.f32 %v5965_v23, %v1531_v24  ;;  %v1620_v35 = vpop.f32.mrf.mxu3  ;;  %v712_v24 = vsel %vm664_vm1, %v710_v46, %v711_v40 }
 0x149   : > { %v1493_v9 = vpop.f32.mrf.mxu0  ;;  %v6148_v36 = vpack.c.bf16 %v714_v21, %v712_v24  ;;  %v715_v24 = vrot.slane %v5732_v57, 1  ;;  %v716_v21 = vrot.slane %v5735_v58, 1 }
 0x14a   : > { %v6135_v53 = vadd.f32 %v1620_v35, %v1532_v16  ;;  %v1494_v20 = vadd.f32 %v5965_v23, %v1493_v9 }
 0x14c   : > { %7322 = vst [vmem:[#allocation47_spill] sm:$0xff] %v6135_v53  ;;  %v1582_v44 = vpop.f32.mrf.mxu1 }
 0x14d   : > { %v6140_v13 = vadd.f32 %v1582_v44, %v1494_v20  ;;  %v5150_v20 = vld [vmem:[#allocation7 + $0x1d0] sm:$0xff] }
 0x14e   : > { %2075 = vmatpush.bf16.msra.mxu3 %v5150_v20 }
 0x14f   : > { %v1533_v28 = vpop.f32.mrf.mxu2 }
 0x150   : > { %v1534_v16 = vadd.f32 %v5965_v23, %v1533_v28  ;;  %v1622_v35 = vpop.f32.mrf.mxu3 }
 0x151   : > { %v1812_v9 = vpop.f32.mrf.mxu0 }
 0x152   : > { %v6146_v53 = vadd.f32 %v1622_v35, %v1534_v16  ;;  %v718_v16 = vrot.slane %v458_v32, 1  ;;  %v462_v35 = vld [vmem:[#allocation2 + $0x1b0] sm:$0x1] }
 0x153   : > { %2327 = vst [vmem:[#allocation2 + $0x1b0] sm:$0x1] %v6094_v49 }
 0x154   : > { %7323 = vst [vmem:[#allocation48_spill] sm:$0xff] %v6146_v53  ;;  %v1901_v37 = vpop.f32.mrf.mxu1  ;;  %1673 = vmatmul.bf16.gmra.mxu2 %v6126_v22  ;;  %1851 = vmatmul.bf16.gmra.mxu0 %v5715_v51  ;;  %v719_v20 = vsel %vm664_vm1, %v716_v21, %v718_v16 }
 0x155   : > { %1762 = vmatmul.bf16.gmra.mxu3 %v5711_v50  ;;  %v5158_v50 = vld [vmem:[#allocation7 + $0x210] sm:$0xff] }
 0x156   : > { %2164 = vmatpush.bf16.msra.mxu0 %v5158_v50 }
 0x157   : > { %1940 = vmatmul.bf16.gmra.mxu1 %v6148_v36  ;;  %v1634_v44 = vpop.f32.mrf.mxu2 }
 0x158   : > { %v1635_v28 = vadd.f32 %v1634_v44, %v5969_v61  ;;  %v1723_v23 = vpop.f32.mrf.mxu3  ;;  %v717_v61 = vsel %vm664_vm1, %v715_v24, %v716_v21 }
 0x159   : > { %v1814_v46 = vpop.f32.mrf.mxu0  ;;  %v6163_v58 = vpack.c.bf16 %v719_v20, %v717_v61  ;;  %v721_v61 = vrot.slane %v5773_v17, 1  ;;  %v466_v20 = vld [vmem:[#allocation2 + $0x230] sm:$0x1] }
 0x15a   : > { %v1724_v40 = vadd.f32 %v1723_v23, %v1635_v28  ;;  %2331 = vst [vmem:[#allocation2 + $0x230] sm:$0x1] %v6094_v49 }
 0x15c   : > { %v1903_v14 = vpop.f32.mrf.mxu1  ;;  %v1813_v53 = vadd.f32 %v1812_v9, %v1724_v40 }
 0x15e   : > { %v6158_v51 = vadd.f32 %v1901_v37, %v1813_v53  ;;  %v5170_v37 = vld [vmem:[#allocation9 + $0x30] sm:$0xff] }
 0x15f   : > { %v1636_v0 = vpop.f32.mrf.mxu2  ;;  %3415 = vmatpush.bf16.msra.mxu1 %v5170_v37 }
 0x160   : > { %v1637_v44 = vadd.f32 %v1636_v0, %v5978_v43  ;;  %v1725_v28 = vpop.f32.mrf.mxu3  ;;  %v720_v0 = vrot.slane %v5770_v15, 1 }
 0x161   : > { %v1817_v57 = vpop.f32.mrf.mxu0 }
 0x162   : > { %v1726_v23 = vadd.f32 %v1725_v28, %v1637_v44 }
 0x164   : > { %v1906_v32 = vpop.f32.mrf.mxu1  ;;  %1678 = vmatmul.bf16.gmra.mxu2 %v6148_v36  ;;  %1856 = vmatmul.bf16.gmra.mxu0 %v5753_v7  ;;  %v1815_v53 = vadd.f32 %v1814_v46, %v1726_v23  ;;  %v723_v46 = vrot.slane %v462_v35, 1  ;;  %v722_v23 = vsel %vm664_vm1, %v720_v0, %v721_v61 }
 0x165   : > { %1767 = vmatmul.bf16.gmra.mxu3 %v5749_v6 }
 0x166   : > { %v6168_v9 = vadd.f32 %v1903_v14, %v1815_v53 }
 0x167   : > { %1945 = vmatmul.bf16.gmra.mxu1 %v6163_v58  ;;  %v1639_v43 = vpop.f32.mrf.mxu2 }
 0x168   : > { %v1640_v50 = vadd.f32 %v1639_v43, %v5990_v26  ;;  %v1728_v40 = vpop.f32.mrf.mxu3  ;;  %v724_v26 = vsel %vm664_vm1, %v721_v61, %v723_v46 }
 0x169   : > { %v1819_v24 = vpop.f32.mrf.mxu0  ;;  %v6180_v15 = vpack.c.bf16 %v724_v26, %v722_v23  ;;  %v728_v23 = vrot.slane %v466_v20, 1  ;;  %v470_v26 = vld [vmem:[#allocation2 + $0x200] sm:$0x1] }
 0x16a   : > { %v1729_v21 = vadd.f32 %v1728_v40, %v1640_v50  ;;  %v5149_v40 = vld [vmem:[#allocation7 + $0x1c8] sm:$0xff]  ;;  %2335 = vst [vmem:[#allocation2 + $0x200] sm:$0x1] %v6094_v49 }
 0x16b   : > { %2076 = vmatpush.bf16.msra.mxu3 %v5149_v40 }
 0x16c   : > { %v1908_v16 = vpop.f32.mrf.mxu1  ;;  %v1818_v44 = vadd.f32 %v1817_v57, %v1729_v21  ;;  %v5141_v57 = vld [vmem:[#allocation7 + $0x188] sm:$0xff] }
 0x16d   : > { %1987 = vmatpush.bf16.msra.mxu2 %v5141_v57 }
 0x16e   : > { %v6175_v14 = vadd.f32 %v1906_v32, %v1818_v44 }
 0x16f   : > { %v1641_v28 = vpop.f32.mrf.mxu2 }
 0x170   : > { %v1642_v53 = vadd.f32 %v1641_v28, %v6000_v54  ;;  %v1730_v37 = vpop.f32.mrf.mxu3  ;;  %v725_v28 = vrot.slane %v5808_v41, 1 }
 0x171   : > { %v1822_v43 = vpop.f32.mrf.mxu0 }
 0x172   : > { %v1731_v50 = vadd.f32 %v1730_v37, %v1642_v53  ;;  %v5157_v37 = vld [vmem:[#allocation7 + $0x208] sm:$0xff] }
 0x173   : > { %2165 = vmatpush.bf16.msra.mxu0 %v5157_v37  ;;  %v7325_v37 = vld [vmem:[#allocation20_spill] sm:$0xff] }
 0x174   : > { %v1911_v17 = vpop.f32.mrf.mxu1  ;;  %1683 = vmatmul.bf16.gmra.mxu2 %v6163_v58  ;;  %1861 = vmatmul.bf16.gmra.mxu0 %v5791_v31  ;;  %v1820_v35 = vadd.f32 %v1819_v24, %v1731_v50  ;;  %v726_v24 = vrot.slane %v5811_v42, 1 }
 0x175   : > { %1772 = vmatmul.bf16.gmra.mxu3 %v5787_v30 }
 0x176   : > { %v6185_v32 = vadd.f32 %v1908_v16, %v1820_v35  ;;  %v729_v35 = vsel %vm664_vm1, %v726_v24, %v728_v23 }
 0x177   : > { %1950 = vmatmul.bf16.gmra.mxu1 %v6180_v15  ;;  %v1644_v54 = vpop.f32.mrf.mxu2 }
 0x178   : > { %v1645_v21 = vadd.f32 %v1644_v54, %v6013_v59  ;;  %v1733_v0 = vpop.f32.mrf.mxu3  ;;  %v727_v59 = vsel %vm664_vm1, %v725_v28, %v726_v24 }
 0x179   : > { %v1824_v61 = vpop.f32.mrf.mxu0  ;;  %v6197_v42 = vpack.c.bf16 %v729_v35, %v727_v59  ;;  %v7326_v59 = vld [vmem:[#allocation21_spill] sm:$0xff] }
 0x17a   : > { %v1734_v46 = vadd.f32 %v1733_v0, %v1645_v21  ;;  %v5169_v0 = vld [vmem:[#allocation9 + $0x28] sm:$0xff]  ;;  %v731_v35 = vrot.slane %v7326_v59, 1 }
 0x17b   : > { %3416 = vmatpush.bf16.msra.mxu1 %v5169_v0 }
 0x17c   : > { %v1913_v44 = vpop.f32.mrf.mxu1  ;;  %v1823_v16 = vadd.f32 %v1822_v43, %v1734_v46 }
 0x17e   : > { %v6192_v53 = vadd.f32 %v1911_v17, %v1823_v16  ;;  %v7324_v17 = vld [vmem:[#allocation19_spill] sm:$0xff] }
 0x17f   : > { %v1646_v50 = vpop.f32.mrf.mxu2 }
 0x180   : > { %v1647_v57 = vadd.f32 %v1646_v50, %v6023_v34  ;;  %v1735_v40 = vpop.f32.mrf.mxu3  ;;  %v730_v50 = vrot.slane %v7325_v37, 1 }
 0x181   : > { %v1827_v41 = vpop.f32.mrf.mxu0 }
 0x182   : > { %v1736_v54 = vadd.f32 %v1735_v40, %v1647_v57  ;;  %v474_v57 = vld [vmem:[#allocation2 + $0x208] sm:$0x1] }
 0x183   : > { %2339 = vst [vmem:[#allocation2 + $0x208] sm:$0x1] %v6094_v49 }
 0x184   : > { %v1916_v20 = vpop.f32.mrf.mxu1  ;;  %1688 = vmatmul.bf16.gmra.mxu2 %v6180_v15  ;;  %1866 = vmatmul.bf16.gmra.mxu0 %v5829_v62  ;;  %v1825_v43 = vadd.f32 %v1824_v61, %v1736_v54  ;;  %v733_v61 = vrot.slane %v470_v26, 1  ;;  %v7328_v26 = vld [vmem:[#allocation24_spill] sm:$0xff] }
 0x185   : > { %1777 = vmatmul.bf16.gmra.mxu3 %v7324_v17 }
 0x186   : > { %v6202_v21 = vadd.f32 %v1913_v44, %v1825_v43  ;;  %v732_v43 = vsel %vm664_vm1, %v730_v50, %v731_v35  ;;  %v5148_v50 = vld [vmem:[#allocation7 + $0x1c0] sm:$0xff] }
 0x187   : > { %1955 = vmatmul.bf16.gmra.mxu1 %v6197_v42  ;;  %v1649_v34 = vpop.f32.mrf.mxu2  ;;  %2077 = vmatpush.bf16.msra.mxu3 %v5148_v50 }
 0x188   : > { %v1650_v46 = vadd.f32 %v1649_v34, %v6036_v29  ;;  %v1738_v28 = vpop.f32.mrf.mxu3  ;;  %v734_v29 = vsel %vm664_vm1, %v731_v35, %v733_v61 }
 0x189   : > { %v1829_v24 = vpop.f32.mrf.mxu0  ;;  %v6214_v37 = vpack.c.bf16 %v734_v29, %v732_v43 }
 0x18a   : > { %v1739_v23 = vadd.f32 %v1738_v28, %v1650_v46 }
 0x18c   : > { %v1918_v16 = vpop.f32.mrf.mxu1  ;;  %v1828_v40 = vadd.f32 %v1827_v41, %v1739_v23  ;;  %v5140_v23 = vld [vmem:[#allocation7 + $0x180] sm:$0xff] }
 0x18d   : > { %1988 = vmatpush.bf16.msra.mxu2 %v5140_v23  ;;  %v5156_v23 = vld [vmem:[#allocation7 + $0x200] sm:$0xff] }
 0x18e   : > { %v6209_v44 = vadd.f32 %v1916_v20, %v1828_v40  ;;  %v7329_v20 = vld [vmem:[#allocation23_spill] sm:$0xff]  ;;  %2166 = vmatpush.bf16.msra.mxu0 %v5156_v23 }
 0x18f   : > { %v1651_v54 = vpop.f32.mrf.mxu2 }
 0x190   : > { %7327 = vst [vmem:[#allocation19_spill] sm:$0xff] %v6209_v44  ;;  %v1652_v0 = vadd.f32 %v1651_v54, %v6046_v52  ;;  %v1740_v34 = vpop.f32.mrf.mxu3  ;;  %v738_v44 = vrot.slane %v474_v57, 1 }
 0x191   : > { %v1832_v46 = vpop.f32.mrf.mxu0 }
 0x192   : > { %v1741_v28 = vadd.f32 %v1740_v34, %v1652_v0  ;;  %v7332_v0 = vld [vmem:[#allocation26_spill] sm:$0xff]  ;;  %v7333_v34 = vld [vmem:[#allocation27_spill] sm:$0xff] }
 0x194   : > { %v1921_v59 = vpop.f32.mrf.mxu1  ;;  %1693 = vmatmul.bf16.gmra.mxu2 %v6197_v42  ;;  %1871 = vmatmul.bf16.gmra.mxu0 %v7328_v26  ;;  %v1830_v41 = vadd.f32 %v1829_v24, %v1741_v28  ;;  %v735_v24 = vrot.slane %v7332_v0, 1  ;;  %v736_v28 = vrot.slane %v7333_v34, 1 }
 0x195   : > { %1782 = vmatmul.bf16.gmra.mxu3 %v7329_v20 }
 0x196   : > { %v6219_v40 = vadd.f32 %v1918_v16, %v1830_v41  ;;  %v478_v16 = vld [vmem:[#allocation2 + $0xc0] sm:$0x1]  ;;  %v739_v50 = vsel %vm664_vm1, %v736_v28, %v738_v44 }
 0x197   : > { %1960 = vmatmul.bf16.gmra.mxu1 %v6214_v37  ;;  %v1654_v52 = vpop.f32.mrf.mxu2  ;;  %2343 = vst [vmem:[#allocation2 + $0xc0] sm:$0x1] %v6094_v49  ;;  %v5168_v44 = vld [vmem:[#allocation9 + $0x20] sm:$0xff] }
 0x198   : > { %7330 = vst [vmem:[#allocation20_spill] sm:$0xff] %v6219_v40  ;;  %v1655_v35 = vadd.f32 %v1654_v52, %v6059_v33  ;;  %v1743_v61 = vpop.f32.mrf.mxu3  ;;  %v737_v33 = vsel %vm664_vm1, %v735_v24, %v736_v28  ;;  %3417 = vmatpush.bf16.msra.mxu1 %v5168_v44 }
 0x199   : > { %v1834_v54 = vpop.f32.mrf.mxu0  ;;  %v6233_v34 = vpack.c.bf16 %v739_v50, %v737_v33  ;;  %v740_v33 = vrot.slane %v5923_v25, 1  ;;  %v7339_v50 = vld [vmem:[#allocation30_spill] sm:$0xff] }
 0x19a   : > { %v1744_v43 = vadd.f32 %v1743_v61, %v1655_v35 }
 0x19c   : > { %v6223_v29 = vpop.f32.mrf.mxu1  ;;  %v1833_v41 = vadd.f32 %v1832_v46, %v1744_v43  ;;  %v7335_v46 = vld [vmem:[#allocation29_spill] sm:$0xff]  ;;  %v7337_v43 = vld [vmem:[#allocation28_spill] sm:$0xff] }
 0x19d   : > { %7331 = vst [vmem:[#allocation21_spill] sm:$0xff] %v6223_v29 }
 0x19e   : > { %v6228_v40 = vadd.f32 %v1921_v59, %v1833_v41 }
 0x19f   : > { %v1656_v26 = vpop.f32.mrf.mxu2 }
 0x1a0   : > { %7334 = vst [vmem:[#allocation23_spill] sm:$0xff] %v6228_v40  ;;  %v1657_v52 = vadd.f32 %v1656_v26, %v6069_v45  ;;  %v1745_v35 = vpop.f32.mrf.mxu3 }
 0x1a1   : > { %v1837_v61 = vpop.f32.mrf.mxu0 }
 0x1a2   : > { %v1746_v0 = vadd.f32 %v1745_v35, %v1657_v52  ;;  %v741_v52 = vrot.slane %v7339_v50, 1  ;;  %v482_v35 = vld [vmem:[#allocation2 + $0x20] sm:$0x1] }
 0x1a3   : > { %2347 = vst [vmem:[#allocation2 + $0x20] sm:$0x1] %v6094_v49 }
 0x1a4   : > { %v1926_v57 = vpop.f32.mrf.mxu1  ;;  %1698 = vmatmul.bf16.gmra.mxu2 %v6214_v37  ;;  %1876 = vmatmul.bf16.gmra.mxu0 %v7335_v46  ;;  %v6237_v59 = vadd.f32 %v1834_v54, %v1746_v0  ;;  %v743_v54 = vrot.slane %v478_v16, 1 }
 0x1a5   : > { %1787 = vmatmul.bf16.gmra.mxu3 %v7337_v43 }
 0x1a6   : > { %7336 = vst [vmem:[#allocation26_spill] sm:$0xff] %v6237_v59  ;;  %v744_v44 = vsel %vm664_vm1, %v741_v52, %v743_v54  ;;  %v309_v54 = vld [vmem:[%s5634_s15 + $0xf8] sm:$0xff] }
 0x1a7   : > { %1965 = vmatmul.bf16.gmra.mxu1 %v6233_v34  ;;  %v1659_v24 = vpop.f32.mrf.mxu2 }
 0x1a8   : > { %v1660_v45 = vadd.f32 %v1659_v24, %v6082_v12  ;;  %v1748_v26 = vpop.f32.mrf.mxu3  ;;  %v742_v12 = vsel %vm664_vm1, %v740_v33, %v741_v52  ;;  %v308_v52 = vld [vmem:[%s5634_s15 + $0xf0] sm:$0xff] }
 0x1a9   : > { %v1839_v28 = vpop.f32.mrf.mxu0  ;;  %v6252_v50 = vpack.c.bf16 %v744_v44, %v742_v12  ;;  %v6264_v44 = vrot.slane %v6094_v49, 7 }
 0x1aa   : > { %v1749_v41 = vadd.f32 %v1748_v26, %v1660_v45 }
 0x1ac   : > { %v6242_v23 = vpop.f32.mrf.mxu1  ;;  %v1838_v0 = vadd.f32 %v1837_v61, %v1749_v41  ;;  %v7341_v61 = vld [vmem:[#allocation33_spill] sm:$0xff]  ;;  %v7343_v41 = vld [vmem:[#allocation32_spill] sm:$0xff] }
 0x1ad   : > { %7338 = vst [vmem:[#allocation27_spill] sm:$0xff] %v6242_v23 }
 0x1ae   : > { %v6247_v29 = vadd.f32 %v1926_v57, %v1838_v0 }
 0x1af   : > { %v1661_v59 = vpop.f32.mrf.mxu2 }
 0x1b0   : > { %7340 = vst [vmem:[#allocation28_spill] sm:$0xff] %v6247_v29  ;;  %v1662_v24 = vadd.f32 %v1661_v59, %v6092_v48  ;;  %v1750_v45 = vpop.f32.mrf.mxu3 }
 0x1b1   : > { %v1842_v25 = vpop.f32.mrf.mxu0 }
 0x1b2   : > { %v1751_v26 = vadd.f32 %v1750_v45, %v1662_v24  ;;  %v781_v24 = vrot.slane %v308_v52, 7  ;;  %v783_v45 = vrot.slane %v309_v54, 7 }
 0x1b4   : > { %v1931_v16 = vpop.f32.mrf.mxu1  ;;  %1703 = vmatmul.bf16.gmra.mxu2 %v6233_v34  ;;  %1881 = vmatmul.bf16.gmra.mxu0 %v7341_v61  ;;  %v6256_v57 = vadd.f32 %v1839_v28, %v1751_v26  ;;  %v788_v28 = vrot.slane %v308_v52, 1  ;;  %v789_v26 = vrot.slane %v309_v54, 1 }
 0x1b5   : > { %1792 = vmatmul.bf16.gmra.mxu3 %v7343_v41  ;;  %v782_v41 = vsel %vm535_vm0, %v6264_v44, %v781_v24 }
 0x1b6   : > { %7342 = vst [vmem:[#allocation30_spill] sm:$0xff] %v6256_v57  ;;  %v791_v57 = vrot.slane %v482_v35, 1 }
 0x1b7   : > { %1970 = vmatmul.bf16.gmra.mxu1 %v6252_v50  ;;  %v1664_v33 = vpop.f32.mrf.mxu2 }
 0x1b8   : > { %v1665_v48 = vadd.f32 %v1664_v33, %v6107_v56  ;;  %v1753_v59 = vpop.f32.mrf.mxu3  ;;  %v784_v56 = vsel %vm535_vm0, %v781_v24, %v783_v45  ;;  %v792_v49 = vsel %vm664_vm1, %v789_v26, %v791_v57 }
 0x1b9   : > { %v1844_v0 = vpop.f32.mrf.mxu0  ;;  %v6278_v35 = vpack.c.bf16 %v784_v56, %v782_v41 }
 0x1ba   : > { %v1754_v12 = vadd.f32 %v1753_v59, %v1665_v48  ;;  %v790_v48 = vsel %vm664_vm1, %v788_v28, %v789_v26 }
 0x1bc   : > { %v6266_v23 = vpop.f32.mrf.mxu1  ;;  %v1843_v29 = vadd.f32 %v1842_v25, %v1754_v12  ;;  %v6280_v25 = vpack.c.bf16 %v792_v49, %v790_v48 }
 0x1bd   : > { %7344 = vst [vmem:[#allocation49_spill] sm:$0xff] %v6266_v23  ;;  %v6276_v23 = vpack.c.bf16 %v309_v54, %v308_v52 }
 0x1be   : > { %v6268_v61 = vadd.f32 %v1931_v16, %v1843_v29 }
 0x1bf   : > { %v1666_v33 = vpop.f32.mrf.mxu2 }
 0x1c0   : > { %v1667_v59 = vadd.f32 %v1666_v33, %v6117_v3  ;;  %v1755_v40 = vpop.f32.mrf.mxu3  ;;  %v5167_v3 = vld [vmem:[#allocation9 + $0x18] sm:$0xff] }
 0x1c1   : > { %v1847_v46 = vpop.f32.mrf.mxu0  ;;  %3418 = vmatpush.bf16.msra.mxu1 %v5167_v3 }
 0x1c2   : > { %v1756_v29 = vadd.f32 %v1755_v40, %v1667_v59 }
 0x1c4   : > { %v1936_v16 = vpop.f32.mrf.mxu1  ;;  %1708 = vmatmul.bf16.gmra.mxu2 %v6252_v50  ;;  %1886 = vmatmul.bf16.gmra.mxu0 %v6276_v23  ;;  %v6284_v12 = vadd.f32 %v1844_v0, %v1756_v29 }
 0x1c5   : > { %1797 = vmatmul.bf16.gmra.mxu3 %v6278_v35 }
 0x1c7   : > { %1975 = vmatmul.bf16.gmra.mxu1 %v6280_v25  ;;  %v1669_v57 = vpop.f32.mrf.mxu2 }
 0x1c8   : > { %v1670_v52 = vadd.f32 %v1669_v57, %v6130_v1  ;;  %v1758_v41 = vpop.f32.mrf.mxu3 }
 0x1c9   : > { %v1849_v40 = vpop.f32.mrf.mxu0 }
 0x1ca   : > { %v1759_v54 = vadd.f32 %v1758_v41, %v1670_v52 }
 0x1cc   : > { %v6289_v24 = vpop.f32.mrf.mxu1  ;;  %v1848_v45 = vadd.f32 %v1847_v46, %v1759_v54  ;;  %v7345_v54 = vld [vmem:[#allocation35_spill] sm:$0xff] }
 0x1ce   : > { %v6291_v28 = vadd.f32 %v1936_v16, %v1848_v45 }
 0x1cf   : > { %v1671_v26 = vpop.f32.mrf.mxu2 }
 0x1d0   : > { %v1672_v0 = vadd.f32 %v1671_v26, %v6140_v13  ;;  %v1760_v56 = vpop.f32.mrf.mxu3 }
 0x1d1   : > { %v1852_v33 = vpop.f32.mrf.mxu0 }
 0x1d2   : > { %v1761_v48 = vadd.f32 %v1760_v56, %v1672_v0  ;;  %v7346_v0 = vld [vmem:[#allocation17_spill] sm:$0xff]  ;;  %v5166_v56 = vld [vmem:[#allocation9 + $0x10] sm:$0xff] }
 0x1d3   : > { %3419 = vmatpush.bf16.msra.mxu1 %v5166_v56 }
 0x1d4   : > { %v1941_v49 = vpop.f32.mrf.mxu1  ;;  %1989 = vmatmul.bf16.vlgmr.msra.gmra.mxu2 %v5747_v5  ;;  %2167 = vmatmul.bf16.vlgmr.msra.gmra.mxu0 %v5987_v18  ;;  %v6296_v1 = vadd.f32 %v1849_v40, %v1761_v48 }
 0x1d5   : > { %2078 = vmatmul.bf16.vlgmr.msra.gmra.mxu3 %v5757_v8 }
 0x1d7   : > { %v1674_v59 = vpop.f32.mrf.mxu2 }
 0x1d8   : > { %v1675_v46 = vadd.f32 %v1674_v59, %v5973_v39  ;;  %v1763_v29 = vpop.f32.mrf.mxu3  ;;  %v7347_v39 = vld [vmem:[#allocation18_spill] sm:$0xff] }
 0x1d9   : > { %v1854_v16 = vpop.f32.mrf.mxu0 }
 0x1da   : > { %v1764_v3 = vadd.f32 %v1763_v29, %v1675_v46 }
 0x1dc   : > { %v6300_v57 = vpop.f32.mrf.mxu1  ;;  %v1853_v13 = vadd.f32 %v1852_v33, %v1764_v3  ;;  %v7348_v33 = vld [vmem:[#allocation36_spill] sm:$0xff] }
 0x1de   : > { %v6302_v52 = vadd.f32 %v1941_v49, %v1853_v13 }
 0x1df   : > { %v1676_v41 = vpop.f32.mrf.mxu2 }
 0x1e0   : > { %v1677_v5 = vadd.f32 %v1676_v41, %v7345_v54  ;;  %v1765_v45 = vpop.f32.mrf.mxu3 }
 0x1e1   : > { %v1857_v18 = vpop.f32.mrf.mxu0 }
 0x1e2   : > { %v1766_v40 = vadd.f32 %v1765_v45, %v1677_v5  ;;  %v7349_v5 = vld [vmem:[#allocation37_spill] sm:$0xff] }
 0x1e4   : > { %v1946_v26 = vpop.f32.mrf.mxu1  ;;  %1994 = vmatmul.bf16.gmra.mxu2 %v7346_v0  ;;  %2172 = vmatmul.bf16.gmra.mxu0 %v6009_v10  ;;  %v6307_v8 = vadd.f32 %v1854_v16, %v1766_v40 }
 0x1e5   : > { %2083 = vmatmul.bf16.gmra.mxu3 %v7347_v39 }
 0x1e7   : > { %v1679_v48 = vpop.f32.mrf.mxu2 }
 0x1e8   : > { %v1680_v49 = vadd.f32 %v1679_v48, %v7348_v33  ;;  %v1768_v59 = vpop.f32.mrf.mxu3  ;;  %v7350_v48 = vld [vmem:[#allocation38_spill] sm:$0xff] }
 0x1e9   : > { %v1859_v46 = vpop.f32.mrf.mxu0 }
 0x1ea   : > { %v1769_v29 = vadd.f32 %v1768_v59, %v1680_v49 }
 0x1ec   : > { %v6311_v3 = vpop.f32.mrf.mxu1  ;;  %v1858_v13 = vadd.f32 %v1857_v18, %v1769_v29 }
 0x1ee   : > { %v6313_v41 = vadd.f32 %v1946_v26, %v1858_v13 }
 0x1ef   : > { %v1681_v54 = vpop.f32.mrf.mxu2 }
 0x1f0   : > { %v1682_v10 = vadd.f32 %v1681_v54, %v7349_v5  ;;  %v1770_v16 = vpop.f32.mrf.mxu3  ;;  %v7352_v5 = vld [vmem:[#allocation39_spill] sm:$0xff] }
 0x1f1   : > { %v1862_v45 = vpop.f32.mrf.mxu0 }
 0x1f2   : > { %v1771_v40 = vadd.f32 %v1770_v16, %v1682_v10 }
 0x1f4   : > { %v1951_v0 = vpop.f32.mrf.mxu1  ;;  %1999 = vmatmul.bf16.gmra.mxu2 %v5823_v60  ;;  %2177 = vmatmul.bf16.gmra.mxu0 %v6032_v11  ;;  %v6318_v39 = vadd.f32 %v1859_v46, %v1771_v40  ;;  %v7353_v40 = vld [vmem:[#allocation22_spill] sm:$0xff] }
 0x1f5   : > { %2088 = vmatmul.bf16.gmra.mxu3 %v5833_v63 }
 0x1f7   : > { %v1684_v56 = vpop.f32.mrf.mxu2 }
 0x1f8   : > { %v1685_v18 = vadd.f32 %v1684_v56, %v7350_v48  ;;  %v1773_v26 = vpop.f32.mrf.mxu3  ;;  %v7354_v56 = vld [vmem:[#allocation25_spill] sm:$0xff]  ;;  %v5165_v48 = vld [vmem:[#allocation9 + $0x8] sm:$0xff] }
 0x1f9   : > { %v1864_v33 = vpop.f32.mrf.mxu0  ;;  %3420 = vmatpush.bf16.msra.mxu1 %v5165_v48 }
 0x1fa   : > { %v1774_v49 = vadd.f32 %v1773_v26, %v1685_v18 }
 0x1fc   : > { %v6322_v59 = vpop.f32.mrf.mxu1  ;;  %v1863_v29 = vadd.f32 %v1862_v45, %v1774_v49  ;;  %v7355_v45 = vld [vmem:[#allocation40_spill] sm:$0xff] }
 0x1fd   : > { %7351 = vst [vmem:[#allocation35_spill] sm:$0xff] %v6322_v59 }
 0x1fe   : > { %v6324_v13 = vadd.f32 %v1951_v0, %v1863_v29 }
 0x1ff   : > { %v1686_v54 = vpop.f32.mrf.mxu2 }
 0x200   : > { %v1687_v60 = vadd.f32 %v1686_v54, %v7352_v5  ;;  %v1775_v10 = vpop.f32.mrf.mxu3 }
 0x201   : > { %v1867_v11 = vpop.f32.mrf.mxu0 }
 0x202   : > { %v1776_v46 = vadd.f32 %v1775_v10, %v1687_v60 }
 0x204   : > { %v1956_v16 = vpop.f32.mrf.mxu1  ;;  %2004 = vmatmul.bf16.gmra.mxu2 %v7353_v40  ;;  %2182 = vmatmul.bf16.gmra.mxu0 %v6055_v2  ;;  %v6329_v63 = vadd.f32 %v1864_v33, %v1776_v46  ;;  %v7356_v40 = vld [vmem:[#allocation41_spill] sm:$0xff] }
 0x205   : > { %2093 = vmatmul.bf16.gmra.mxu3 %v7354_v56 }
 0x207   : > { %v1689_v18 = vpop.f32.mrf.mxu2 }
 0x208   : > { %v1690_v0 = vadd.f32 %v1689_v18, %v7355_v45  ;;  %v1778_v26 = vpop.f32.mrf.mxu3 }
 0x209   : > { %v1869_v49 = vpop.f32.mrf.mxu0 }
 0x20a   : > { %v1779_v29 = vadd.f32 %v1778_v26, %v1690_v0 }
 0x20c   : > { %v6333_v54 = vpop.f32.mrf.mxu1  ;;  %v1868_v5 = vadd.f32 %v1867_v11, %v1779_v29 }
 0x20e   : > { %v6335_v60 = vadd.f32 %v1956_v16, %v1868_v5 }
 0x20f   : > { %v1691_v10 = vpop.f32.mrf.mxu2 }
 0x210   : > { %v1692_v2 = vadd.f32 %v1691_v10, %v7356_v40  ;;  %v1780_v33 = vpop.f32.mrf.mxu3  ;;  %v7358_v40 = vld [vmem:[#allocation42_spill] sm:$0xff] }
 0x211   : > { %v1872_v46 = vpop.f32.mrf.mxu0 }
 0x212   : > { %v1781_v59 = vadd.f32 %v1780_v33, %v1692_v2  ;;  %v7359_v33 = vld [vmem:[#allocation31_spill] sm:$0xff] }
 0x214   : > { %v1961_v56 = vpop.f32.mrf.mxu1  ;;  %2009 = vmatmul.bf16.gmra.mxu2 %v5899_v55  ;;  %2187 = vmatmul.bf16.gmra.mxu0 %v6078_v38  ;;  %v6340_v18 = vadd.f32 %v1869_v49, %v1781_v59 }
 0x215   : > { %2098 = vmatmul.bf16.gmra.mxu3 %v5910_v19 }
 0x217   : > { %v1694_v48 = vpop.f32.mrf.mxu2 }
 0x218   : > { %v1695_v11 = vadd.f32 %v1694_v48, %v6064_v47  ;;  %v1783_v16 = vpop.f32.mrf.mxu3  ;;  %v7360_v47 = vld [vmem:[#allocation34_spill] sm:$0xff] }
 0x219   : > { %v1874_v45 = vpop.f32.mrf.mxu0  ;;  %v5164_v48 = vld [vmem:[#allocation9] sm:$0xff] }
 0x21a   : > { %v1784_v0 = vadd.f32 %v1783_v16, %v1695_v11  ;;  %3421 = vmatpush.bf16.msra.mxu1 %v5164_v48  ;;  %v6366_v48 = vpack.c.bf16 %v6264_v44, %v6264_v44 }
 0x21c   : > { %v6344_v26 = vpop.f32.mrf.mxu1  ;;  %v1873_v29 = vadd.f32 %v1872_v46, %v1784_v0  ;;  %v7361_v46 = vld [vmem:[#allocation43_spill] sm:$0xff] }
 0x21d   : > { %7357 = vst [vmem:[#allocation17_spill] sm:$0xff] %v6344_v26  ;;  %3422 = vmatmul.bf16.vlgmr.msra.gmra.mxu1 %v6366_v48 }
 0x21e   : > { %v6346_v5 = vadd.f32 %v1961_v56, %v1873_v29 }
 0x21f   : > { %v1696_v10 = vpop.f32.mrf.mxu2 }
 0x220   : > { %v1697_v55 = vadd.f32 %v1696_v10, %v7358_v40  ;;  %v1785_v2 = vpop.f32.mrf.mxu3 }
 0x221   : > { %v1877_v38 = vpop.f32.mrf.mxu0 }
 0x222   : > { %v1786_v59 = vadd.f32 %v1785_v2, %v1697_v55 }
 0x224   : > { %v1966_v49 = vpop.f32.mrf.mxu1  ;;  %2014 = vmatmul.bf16.gmra.mxu2 %v7359_v33  ;;  %2192 = vmatmul.bf16.gmra.mxu0 %v6103_v4  ;;  %v6351_v19 = vadd.f32 %v1874_v45, %v1786_v59  ;;  %v7364_v33 = vld [vmem:[#allocation44_spill] sm:$0xff] }
 0x225   : > { %2103 = vmatmul.bf16.gmra.mxu3 %v7360_v47 }
 0x227   : > { %v1699_v11 = vpop.f32.mrf.mxu2 }
 0x228   : > { %v1700_v56 = vadd.f32 %v1699_v11, %v7361_v46  ;;  %v1788_v16 = vpop.f32.mrf.mxu3  ;;  %v7367_v46 = vld [vmem:[#allocation45_spill] sm:$0xff] }
 0x229   : > { %v1879_v0 = vpop.f32.mrf.mxu0 }
 0x22a   : > { %v1789_v29 = vadd.f32 %v1788_v16, %v1700_v56 }
 0x22c   : > { %v1878_v10 = vadd.f32 %v1877_v38, %v1789_v29  ;;  %v6355_v40 = vpop.f32.mrf.mxu1  ;;  %v7366_v38 = vld [vmem:[#allocation14_spill] sm:$0xff] }
 0x22d   : > { %7362 = vst [vmem:[#allocation18_spill] sm:$0xff] %v6355_v40 }
 0x22e   : > { %v6357_v55 = vadd.f32 %v1966_v49, %v1878_v10 }
 0x22f   : > { %v1701_v2 = vpop.f32.mrf.mxu2 }
 0x230   : > { %7363 = vst [vmem:[#allocation36_spill] sm:$0xff] %v6357_v55  ;;  %v1702_v4 = vadd.f32 %v1701_v2, %v7364_v33  ;;  %v1790_v45 = vpop.f32.mrf.mxu3  ;;  %v7370_v55 = vld [vmem:[#allocation15_spill] sm:$0xff] }
 0x231   : > { %v1882_v59 = vpop.f32.mrf.mxu0 }
 0x232   : > { %v1791_v26 = vadd.f32 %v1790_v45, %v1702_v4  ;;  %v5179_v4 = vld [vmem:[#allocation9 + $0x78] sm:$0xff] }
 0x233   : > { %v5187_v45 = vld [vmem:[#allocation9 + $0xb8] sm:$0xff]  ;;  %3503 = vmatpush.bf16.msrb.mxu2 %v5179_v4 }
 0x234   : > { %2019 = vmatmul.bf16.gmra.mxu2 %v5679_v27  ;;  %2197 = vmatmul.bf16.gmra.mxu0 %v6126_v22  ;;  %v6362_v47 = vadd.f32 %v1879_v0, %v1791_v26  ;;  %v1971_v11 = vpop.f32.mrf.mxu1  ;;  %v7368_v26 = vld [vmem:[#allocation46_spill] sm:$0xff] }
 0x235   : > { %2108 = vmatmul.bf16.gmra.mxu3 %v7366_v38 }
 0x236   : > { %7365 = vst [vmem:[#allocation37_spill] sm:$0xff] %v6362_v47  ;;  %3592 = vmatpush.bf16.msrb.mxu3 %v5187_v45 }
 0x237   : > { %v1704_v49 = vpop.f32.mrf.mxu2 }
 0x238   : > { %v1705_v56 = vadd.f32 %v1704_v49, %v7367_v46  ;;  %v1793_v16 = vpop.f32.mrf.mxu3  ;;  %v7372_v46 = vld [vmem:[#allocation47_spill] sm:$0xff] }
 0x239   : > { %v1884_v29 = vpop.f32.mrf.mxu0 }
 0x23a   : > { %v1794_v10 = vadd.f32 %v1793_v16, %v1705_v56 }
 0x23c   : > { %v1883_v27 = vadd.f32 %v1882_v59, %v1794_v10  ;;  %v6374_v38 = vpop.f32.mrf.mxu1  ;;  %v7371_v59 = vld [vmem:[#allocation16_spill] sm:$0xff]  ;;  %v5195_v10 = vld [vmem:[#allocation9 + $0xf8] sm:$0xff] }
 0x23d   : > { %7369 = vst [vmem:[#allocation38_spill] sm:$0xff] %v6374_v38  ;;  %3681 = vmatpush.bf16.msrb.mxu0 %v5195_v10 }
 0x23e   : > { %v6371_v2 = vadd.f32 %v1971_v11, %v1883_v27  ;;  %v5203_v27 = vld [vmem:[#allocation9 + $0x138] sm:$0xff] }
 0x23f   : > { %v1706_v22 = vpop.f32.mrf.mxu2  ;;  %3770 = vmatpush.bf16.msrb.mxu1 %v5203_v27 }
 0x240   : > { %v1707_v0 = vadd.f32 %v1706_v22, %v7368_v26  ;;  %v1795_v33 = vpop.f32.mrf.mxu3 }
 0x241   : > { %v1887_v40 = vpop.f32.mrf.mxu0 }
 0x242   : > { %v1796_v47 = vadd.f32 %v1795_v33, %v1707_v0 }
 0x244   : > { %2024 = vmatmul.bf16.gmra.mxu2 %v7370_v55  ;;  %2202 = vmatmul.bf16.gmra.mxu0 %v6148_v36  ;;  %v6378_v49 = vadd.f32 %v1884_v29, %v1796_v47  ;;  %v1976_v0 = vpop.f32.mrf.mxu1  ;;  %v7374_v36 = vld [vmem:[#allocation48_spill] sm:$0xff] }
 0x245   : > { %2113 = vmatmul.bf16.gmra.mxu3 %v7371_v59 }
 0x247   : > { %v1709_v11 = vpop.f32.mrf.mxu2 }
 0x248   : > { %v1710_v56 = vadd.f32 %v1709_v11, %v7372_v46  ;;  %v1798_v16 = vpop.f32.mrf.mxu3 }
 0x249   : > { %v1889_v22 = vpop.f32.mrf.mxu0 }
 0x24a   : > { %v1799_v26 = vadd.f32 %v1798_v16, %v1710_v56 }
 0x24c   : > { %v1888_v33 = vadd.f32 %v1887_v40, %v1799_v26 }
 0x24e   : > { %v6382_v4 = vadd.f32 %v1976_v0, %v1888_v33 }
 0x24f   : > { %v1711_v55 = vpop.f32.mrf.mxu2 }
 0x250   : > { %7373 = vst [vmem:[#allocation39_spill] sm:$0xff] %v6382_v4  ;;  %v1712_v47 = vadd.f32 %v1711_v55, %v7374_v36  ;;  %v1800_v29 = vpop.f32.mrf.mxu3  ;;  %v5178_v36 = vld [vmem:[#allocation9 + $0x70] sm:$0xff]  ;;  %v5189_v4 = vld [vmem:[#allocation9 + $0xc8] sm:$0xff] }
 0x251   : > { %v2168_v45 = vpop.f32.mrf.mxu0  ;;  %3504 = vmatpush.bf16.msrb.mxu2 %v5178_v36 }
 0x252   : > { %v1801_v59 = vadd.f32 %v1800_v29, %v1712_v47 }
 0x254   : > { %2029 = vmatmul.bf16.gmra.mxu2 %v5749_v6  ;;  %2207 = vmatmul.bf16.gmra.mxu0 %v6163_v58  ;;  %v6387_v11 = vadd.f32 %v1889_v22, %v1801_v59  ;;  %v5186_v6 = vld [vmem:[#allocation9 + $0xb0] sm:$0xff] }
 0x255   : > { %2118 = vmatmul.bf16.gmra.mxu3 %v5753_v7 }
 0x256   : > { %7375 = vst [vmem:[#allocation22_spill] sm:$0xff] %v6387_v11  ;;  %3593 = vmatpush.bf16.msrb.mxu3 %v5186_v6 }
 0x257   : > { %v1990_v46 = vpop.f32.mrf.mxu2 }
 0x258   : > { %v1991_v56 = vadd.f32 %v1990_v46, %v6158_v51  ;;  %v2079_v40 = vpop.f32.mrf.mxu3  ;;  %v2391_v51 = vld [vmem:[#allocation2 + $0x120] sm:$0x1] }
 0x259   : > { %v2170_v16 = vpop.f32.mrf.mxu0 }
 0x25a   : > { %v2080_v10 = vadd.f32 %v2079_v40, %v1991_v56 }
 0x25c   : > { %v2169_v27 = vadd.f32 %v2168_v45, %v2080_v10  ;;  %v5194_v10 = vld [vmem:[#allocation9 + $0xf0] sm:$0xff] }
 0x25d   : > { %3682 = vmatpush.bf16.msrb.mxu0 %v5194_v10 }
 0x25e   : > { %v2248_v26 = vmax.f32 %v2169_v27, 0.0  ;;  %v5202_v27 = vld [vmem:[#allocation9 + $0x130] sm:$0xff] }
 0x25f   : > { %v1992_v0 = vpop.f32.mrf.mxu2  ;;  %3771 = vmatpush.bf16.msrb.mxu1 %v5202_v27 }
 0x260   : > { %v1993_v33 = vadd.f32 %v1992_v0, %v6168_v9  ;;  %v2081_v55 = vpop.f32.mrf.mxu3  ;;  %v2510_v7 = vrot.slane %v2248_v26, 7  ;;  %v2637_v59 = vrot.slane %v2248_v26, 1  ;;  %v2640_v9 = vrot.slane %v2391_v51, 1 }
 0x261   : > { %v2173_v47 = vpop.f32.mrf.mxu0 }
 0x262   : > { %v2082_v58 = vadd.f32 %v2081_v55, %v1993_v33 }
 0x264   : > { %v2171_v22 = vadd.f32 %v2170_v16, %v2082_v58  ;;  %2034 = vmatmul.bf16.gmra.mxu2 %v5787_v30  ;;  %2212 = vmatmul.bf16.gmra.mxu0 %v6180_v15  ;;  %v2511_v15 = vsel %vm535_vm0, %v6264_v44, %v2510_v7 }
 0x265   : > { %2123 = vmatmul.bf16.gmra.mxu3 %v5791_v31 }
 0x266   : > { %v2249_v29 = vmax.f32 %v2171_v22, 0.0 }
 0x267   : > { %v1995_v45 = vpop.f32.mrf.mxu2 }
 0x268   : > { %v1996_v46 = vadd.f32 %v1995_v45, %v6175_v14  ;;  %v2084_v56 = vpop.f32.mrf.mxu3  ;;  %v2512_v40 = vrot.slane %v2249_v29, 7  ;;  %v6396_v0 = vpack.c.bf16 %v2249_v29, %v2248_v26  ;;  %v2638_v16 = vrot.slane %v2249_v29, 1 }
 0x269   : > { %v2175_v30 = vpop.f32.mrf.mxu0 }
 0x26a   : > { %v2085_v33 = vadd.f32 %v2084_v56, %v1996_v46  ;;  %v2513_v31 = vsel %vm535_vm0, %v2510_v7, %v2512_v40  ;;  %v2639_v55 = vsel %vm664_vm1, %v2637_v59, %v2638_v16  ;;  %v2641_v14 = vsel %vm664_vm1, %v2638_v16, %v2640_v9  ;;  %v2395_v46 = vld [vmem:[#allocation2 + $0x158] sm:$0x1] }
 0x26b   : > { %v6402_v36 = vpack.c.bf16 %v2513_v31, %v2511_v15  ;;  %v6405_v58 = vpack.c.bf16 %v2641_v14, %v2639_v55  ;;  %v2645_v9 = vrot.slane %v2395_v46, 1  ;;  %v5185_v46 = vld [vmem:[#allocation9 + $0xa8] sm:$0xff] }
 0x26c   : > { %v2174_v6 = vadd.f32 %v2173_v47, %v2085_v33  ;;  %3594 = vmatpush.bf16.msrb.mxu3 %v5185_v46 }
 0x26d   : > { %7376 = vst [vmem:[#allocation25_spill] sm:$0xff] %v6405_v58  ;;  %3427 = vmatmul.bf16.gmra.mxu1 %v6402_v36 }
 0x26e   : > { %v2250_v26 = vmax.f32 %v2174_v6, 0.0 }
 0x26f   : > { %v1997_v22 = vpop.f32.mrf.mxu2 }
 0x270   : > { %v1998_v51 = vadd.f32 %v1997_v22, %v6185_v32  ;;  %v2086_v29 = vpop.f32.mrf.mxu3  ;;  %v2515_v47 = vrot.slane %v2250_v26, 7  ;;  %v2642_v10 = vrot.slane %v2250_v26, 1 }
 0x271   : > { %v2178_v45 = vpop.f32.mrf.mxu0 }
 0x272   : > { %v2087_v7 = vadd.f32 %v2086_v29, %v1998_v51 }
 0x274   : > { %v2176_v56 = vadd.f32 %v2175_v30, %v2087_v7  ;;  %2039 = vmatmul.bf16.gmra.mxu2 %v7324_v17  ;;  %2217 = vmatmul.bf16.gmra.mxu0 %v6197_v42  ;;  %v2516_v17 = vsel %vm535_vm0, %v6264_v44, %v2515_v47  ;;  %v5177_v7 = vld [vmem:[#allocation9 + $0x68] sm:$0xff] }
 0x275   : > { %2128 = vmatmul.bf16.gmra.mxu3 %v5829_v62  ;;  %3505 = vmatpush.bf16.msrb.mxu2 %v5177_v7 }
 0x276   : > { %v2251_v59 = vmax.f32 %v2176_v56, 0.0 }
 0x277   : > { %v2000_v40 = vpop.f32.mrf.mxu2 }
 0x278   : > { %v2001_v27 = vadd.f32 %v2000_v40, %v6192_v53  ;;  %v2089_v16 = vpop.f32.mrf.mxu3  ;;  %v2517_v32 = vrot.slane %v2251_v59, 7  ;;  %v6413_v15 = vpack.c.bf16 %v2251_v59, %v2250_v26  ;;  %v2643_v33 = vrot.slane %v2251_v59, 1 }
 0x279   : > { %v2180_v31 = vpop.f32.mrf.mxu0 }
 0x27a   : > { %v2090_v30 = vadd.f32 %v2089_v16, %v2001_v27  ;;  %v2518_v42 = vsel %vm535_vm0, %v2515_v47, %v2517_v32  ;;  %v2644_v62 = vsel %vm664_vm1, %v2642_v10, %v2643_v33  ;;  %v2646_v55 = vsel %vm664_vm1, %v2643_v33, %v2645_v9  ;;  %v2399_v9 = vld [vmem:[#allocation2 + $0xb8] sm:$0x1]  ;;  %v7380_v32 = vld [vmem:[#allocation19_spill] sm:$0xff] }
 0x27b   : > { %v6420_v14 = vpack.c.bf16 %v2518_v42, %v2516_v17  ;;  %v6422_v6 = vpack.c.bf16 %v2646_v55, %v2644_v62  ;;  %v5193_v42 = vld [vmem:[#allocation9 + $0xe8] sm:$0xff] }
 0x27c   : > { %v2179_v53 = vadd.f32 %v2178_v45, %v2090_v30  ;;  %v7379_v45 = vld [vmem:[#allocation24_spill] sm:$0xff]  ;;  %v5201_v62 = vld [vmem:[#allocation9 + $0x128] sm:$0xff]  ;;  %3683 = vmatpush.bf16.msrb.mxu0 %v5193_v42 }
 0x27d   : > { %7377 = vst [vmem:[#allocation40_spill] sm:$0xff] %v6420_v14  ;;  %3432 = vmatmul.bf16.gmra.mxu1 %v6420_v14 }
 0x27e   : > { %7378 = vst [vmem:[#allocation41_spill] sm:$0xff] %v6422_v6  ;;  %v2252_v26 = vmax.f32 %v2179_v53, 0.0  ;;  %3772 = vmatpush.bf16.msrb.mxu1 %v5201_v62  ;;  %v7385_v62 = vld [vmem:[#allocation23_spill] sm:$0xff] }
 0x27f   : > { %v2002_v22 = vpop.f32.mrf.mxu2 }
 0x280   : > { %v2003_v51 = vadd.f32 %v2002_v22, %v6202_v21  ;;  %v2091_v29 = vpop.f32.mrf.mxu3  ;;  %v2520_v40 = vrot.slane %v2252_v26, 7  ;;  %v2647_v16 = vrot.slane %v2252_v26, 1  ;;  %v2650_v21 = vrot.slane %v2399_v9, 1  ;;  %v7383_v9 = vld [vmem:[#allocation20_spill] sm:$0xff] }
 0x281   : > { %v2183_v56 = vpop.f32.mrf.mxu0 }
 0x282   : > { %v2092_v47 = vadd.f32 %v2091_v29, %v2003_v51 }
 0x284   : > { %v2181_v59 = vadd.f32 %v2180_v31, %v2092_v47  ;;  %2044 = vmatmul.bf16.gmra.mxu2 %v7329_v20  ;;  %2222 = vmatmul.bf16.gmra.mxu0 %v6214_v37  ;;  %v2521_v37 = vsel %vm535_vm0, %v6264_v44, %v2520_v40 }
 0x285   : > { %2133 = vmatmul.bf16.gmra.mxu3 %v7379_v45 }
 0x286   : > { %v2253_v10 = vmax.f32 %v2181_v59, 0.0 }
 0x287   : > { %v2005_v27 = vpop.f32.mrf.mxu2 }
 0x288   : > { %v2006_v33 = vadd.f32 %v2005_v27, %v7380_v32  ;;  %v2094_v17 = vpop.f32.mrf.mxu3  ;;  %v2522_v30 = vrot.slane %v2253_v10, 7  ;;  %v6430_v55 = vpack.c.bf16 %v2253_v10, %v2252_v26  ;;  %v2648_v31 = vrot.slane %v2253_v10, 1  ;;  %v2403_v32 = vld [vmem:[#allocation2 + $0x1c0] sm:$0x1] }
 0x289   : > { %v2185_v20 = vpop.f32.mrf.mxu0 }
 0x28a   : > { %v2095_v53 = vadd.f32 %v2094_v17, %v2006_v33  ;;  %v2523_v22 = vsel %vm535_vm0, %v2520_v40, %v2522_v30  ;;  %v2649_v51 = vsel %vm664_vm1, %v2647_v16, %v2648_v31  ;;  %v2651_v7 = vsel %vm664_vm1, %v2648_v31, %v2650_v21  ;;  %v7384_v16 = vld [vmem:[#allocation29_spill] sm:$0xff] }
 0x28b   : > { %v6436_v29 = vpack.c.bf16 %v2523_v22, %v2521_v37  ;;  %v6439_v47 = vpack.c.bf16 %v2651_v7, %v2649_v51  ;;  %v2655_v17 = vrot.slane %v2403_v32, 1 }
 0x28c   : > { %v2184_v46 = vadd.f32 %v2183_v56, %v2095_v53 }
 0x28d   : > { %7381 = vst [vmem:[#allocation42_spill] sm:$0xff] %v6436_v29  ;;  %3437 = vmatmul.bf16.gmra.mxu1 %v6436_v29 }
 0x28e   : > { %7382 = vst [vmem:[#allocation31_spill] sm:$0xff] %v6439_v47  ;;  %v2254_v26 = vmax.f32 %v2184_v46, 0.0 }
 0x28f   : > { %v2007_v59 = vpop.f32.mrf.mxu2 }
 0x290   : > { %v2008_v45 = vadd.f32 %v2007_v59, %v7383_v9  ;;  %v2096_v10 = vpop.f32.mrf.mxu3  ;;  %v2525_v56 = vrot.slane %v2254_v26, 7  ;;  %v2652_v42 = vrot.slane %v2254_v26, 1 }
 0x291   : > { %v2188_v27 = vpop.f32.mrf.mxu0 }
 0x292   : > { %v2097_v40 = vadd.f32 %v2096_v10, %v2008_v45 }
 0x294   : > { %v2186_v33 = vadd.f32 %v2185_v20, %v2097_v40  ;;  %2049 = vmatmul.bf16.gmra.mxu2 %v7337_v43  ;;  %2227 = vmatmul.bf16.gmra.mxu0 %v6233_v34  ;;  %v2526_v43 = vsel %vm535_vm0, %v6264_v44, %v2525_v56  ;;  %v7389_v40 = vld [vmem:[#allocation21_spill] sm:$0xff] }
 0x295   : > { %2138 = vmatmul.bf16.gmra.mxu3 %v7384_v16 }
 0x296   : > { %v2255_v21 = vmax.f32 %v2186_v33, 0.0 }
 0x297   : > { %v2010_v30 = vpop.f32.mrf.mxu2 }
 0x298   : > { %v2011_v31 = vadd.f32 %v2010_v30, %v7385_v62  ;;  %v2099_v37 = vpop.f32.mrf.mxu3  ;;  %v2527_v53 = vrot.slane %v2255_v21, 7  ;;  %v6447_v22 = vpack.c.bf16 %v2255_v21, %v2254_v26  ;;  %v2653_v51 = vrot.slane %v2255_v21, 1  ;;  %v7388_v26 = vld [vmem:[#allocation26_spill] sm:$0xff] }
 0x299   : > { %v2190_v7 = vpop.f32.mrf.mxu0  ;;  %v1924_v32 = vadd.f32 %v7389_v40, %v7388_v26  ;;  %v6461_v21 = vld [vmem:[#allocation2 + $0xa0] sm:$0x1] }
 0x29a   : > { %v2100_v20 = vadd.f32 %v2099_v37, %v2011_v31  ;;  %v2528_v34 = vsel %vm535_vm0, %v2525_v56, %v2527_v53  ;;  %v2654_v46 = vsel %vm664_vm1, %v2652_v42, %v2653_v51  ;;  %v2656_v59 = vsel %vm664_vm1, %v2653_v51, %v2655_v17  ;;  %v5176_v62 = vld [vmem:[#allocation9 + $0x60] sm:$0xff]  ;;  %v6463_v37 = vld [vmem:[#allocation2 + $0xc8] sm:$0xff]  ;;  %v2407_v53 = vld [vmem:[#allocation2 + $0x1b8] sm:$0x1] }
 0x29b   : > { %v6454_v9 = vpack.c.bf16 %v2528_v34, %v2526_v43  ;;  %v6456_v45 = vpack.c.bf16 %v2656_v59, %v2654_v46  ;;  %v5184_v42 = vld [vmem:[#allocation9 + $0xa0] sm:$0xff]  ;;  %2351 = vst [vmem:[#allocation2 + $0xa0] sm:$0x1] %v6463_v37  ;;  %3506 = vmatpush.bf16.msrb.mxu2 %v5176_v62  ;;  %v7390_v43 = vld [vmem:[#allocation32_spill] sm:$0xff]  ;;  %v5183_v34 = vld [vmem:[#allocation9 + $0x98] sm:$0xff] }
 0x29c   : > { %v2189_v10 = vadd.f32 %v2188_v27, %v2100_v20  ;;  %v5192_v31 = vld [vmem:[#allocation9 + $0xe0] sm:$0xff]  ;;  %3595 = vmatpush.bf16.msrb.mxu3 %v5184_v42  ;;  %v5175_v20 = vld [vmem:[#allocation9 + $0x58] sm:$0xff] }
 0x29d   : > { %7386 = vst [vmem:[#allocation34_spill] sm:$0xff] %v6454_v9  ;;  %3442 = vmatmul.bf16.gmra.mxu1 %v6454_v9  ;;  %3684 = vmatpush.bf16.msrb.mxu0 %v5192_v31  ;;  %v5191_v46 = vld [vmem:[#allocation9 + $0xd8] sm:$0xff]  ;;  %v5200_v42 = vld [vmem:[#allocation9 + $0x120] sm:$0xff]  ;;  %v5174_v31 = vld [vmem:[#allocation9 + $0x50] sm:$0xff] }
 0x29e   : > { %7387 = vst [vmem:[#allocation43_spill] sm:$0xff] %v6456_v45  ;;  %v2256_v33 = vmax.f32 %v2189_v10, 0.0  ;;  %v7391_v59 = vld [vmem:[#allocation33_spill] sm:$0xff]  ;;  %3773 = vmatpush.bf16.msrb.mxu1 %v5200_v42 }
 0x29f   : > { %v2012_v16 = vpop.f32.mrf.mxu2  ;;  %3507 = vmatpush.bf16.msrb.mxu2 %v5175_v20  ;;  %v5190_v20 = vld [vmem:[#allocation9 + $0xd0] sm:$0xff] }
 0x2a0   : > { %v2013_v30 = vadd.f32 %v2012_v16, %v1924_v32  ;;  %v2101_v56 = vpop.f32.mrf.mxu3  ;;  %v2530_v10 = vrot.slane %v2256_v33, 7  ;;  %3596 = vmatpush.bf16.msrb.mxu3 %v5183_v34  ;;  %v2657_v32 = vrot.slane %v2256_v33, 1  ;;  %v2660_v16 = vrot.slane %v2407_v53, 1 }
 0x2a1   : > { %v2193_v17 = vpop.f32.mrf.mxu0  ;;  %3685 = vmatpush.bf16.msrb.mxu0 %v5191_v46 }
 0x2a2   : > { %v2102_v27 = vadd.f32 %v2101_v56, %v2013_v30  ;;  %v7392_v30 = vld [vmem:[#allocation28_spill] sm:$0xff] }
 0x2a3   : > { %3508 = vmatpush.bf16.msrb.mxu2 %v5174_v31 }
 0x2a4   : > { %v2191_v51 = vadd.f32 %v2190_v7, %v2102_v27  ;;  %2054 = vmatmul.bf16.gmra.mxu2 %v7390_v43  ;;  %2232 = vmatmul.bf16.gmra.mxu0 %v6252_v50  ;;  %v5182_v50 = vld [vmem:[#allocation9 + $0x90] sm:$0xff] }
 0x2a5   : > { %2143 = vmatmul.bf16.gmra.mxu3 %v7391_v59  ;;  %3686 = vmatpush.bf16.msrb.mxu0 %v5190_v20  ;;  %v2411_v20 = vld [vmem:[#allocation2 + $0x38] sm:$0x1] }
 0x2a6   : > { %v2257_v26 = vmax.f32 %v2191_v51, 0.0  ;;  %v2531_v51 = vsel %vm535_vm0, %v6264_v44, %v2530_v10  ;;  %3597 = vmatpush.bf16.msrb.mxu3 %v5182_v50  ;;  %v5172_v50 = vld [vmem:[#allocation9 + $0x40] sm:$0xff] }
 0x2a7   : > { %v2015_v40 = vpop.f32.mrf.mxu2 }
 0x2a8   : > { %v2016_v56 = vadd.f32 %v2015_v40, %v7392_v30  ;;  %v2104_v7 = vpop.f32.mrf.mxu3  ;;  %v2532_v62 = vrot.slane %v2257_v26, 7  ;;  %v6470_v27 = vpack.c.bf16 %v2257_v26, %v2256_v33  ;;  %v2658_v43 = vrot.slane %v2257_v26, 1  ;;  %v5173_v26 = vld [vmem:[#allocation9 + $0x48] sm:$0xff] }
 0x2a9   : > { %v2195_v11 = vpop.f32.mrf.mxu0  ;;  %v5181_v30 = vld [vmem:[#allocation9 + $0x88] sm:$0xff]  ;;  %3509 = vmatpush.bf16.msrb.mxu2 %v5173_v26  ;;  %3687 = vmatpush.bf16.msrb.mxu0 %v5189_v4 }
 0x2aa   : > { %v2105_v34 = vadd.f32 %v2104_v7, %v2016_v56  ;;  %v2533_v46 = vsel %vm535_vm0, %v2530_v10, %v2532_v62  ;;  %v2659_v53 = vsel %vm664_vm1, %v2657_v32, %v2658_v43  ;;  %v2661_v33 = vsel %vm664_vm1, %v2658_v43, %v2660_v16  ;;  %v7395_v56 = vld [vmem:[#allocation30_spill] sm:$0xff]  ;;  %v7396_v10 = vld [vmem:[#allocation27_spill] sm:$0xff]  ;;  %3598 = vmatpush.bf16.msrb.mxu3 %v5181_v30 }
 0x2ab   : > { %v6476_v59 = vpack.c.bf16 %v2533_v46, %v2531_v51  ;;  %v6479_v38 = vpack.c.bf16 %v2661_v33, %v2659_v53  ;;  %v1929_v7 = vadd.f32 %v7396_v10, %v7395_v56  ;;  %v5180_v16 = vld [vmem:[#allocation9 + $0x80] sm:$0xff]  ;;  %v2665_v53 = vrot.slane %v2411_v20, 1 }
 0x2ac   : > { %v2194_v40 = vadd.f32 %v2193_v17, %v2105_v34  ;;  %v5188_v17 = vld [vmem:[#allocation9 + $0xc0] sm:$0xff] }
 0x2ad   : > { %7393 = vst [vmem:[#allocation44_spill] sm:$0xff] %v6476_v59  ;;  %3447 = vmatmul.bf16.gmra.mxu1 %v6476_v59  ;;  %3510 = vmatpush.bf16.msrb.mxu2 %v5172_v50 }
 0x2ae   : > { %7394 = vst [vmem:[#allocation14_spill] sm:$0xff] %v6479_v38  ;;  %v2258_v62 = vmax.f32 %v2194_v40, 0.0  ;;  %3599 = vmatpush.bf16.msrb.mxu3 %v5180_v16  ;;  %3688 = vmatpush.bf16.msrb.mxu0 %v5188_v17 }
 0x2af   : > { %v2017_v32 = vpop.f32.mrf.mxu2 }
 0x2b0   : > { %v2018_v42 = vadd.f32 %v2017_v32, %v1929_v7  ;;  %v2106_v31 = vpop.f32.mrf.mxu3  ;;  %v2535_v46 = vrot.slane %v2258_v62, 7  ;;  %v2662_v40 = vrot.slane %v2258_v62, 1 }
 0x2b1   : > { %v2198_v43 = vpop.f32.mrf.mxu0 }
 0x2b2   : > { %v2107_v51 = vadd.f32 %v2106_v31, %v2018_v42 }
 0x2b4   : > { %v2196_v34 = vadd.f32 %v2195_v11, %v2107_v51  ;;  %2059 = vmatmul.bf16.gmra.mxu2 %v6278_v35  ;;  %2237 = vmatmul.bf16.gmra.mxu0 %v6280_v25  ;;  %v6491_v11 = vrot.slane %v6463_v37, 1  ;;  %v809_v35 = vrot.slane %v6461_v21, 1  ;;  %v7399_v21 = vld [vmem:[#allocation49_spill] sm:$0xff] }
 0x2b5   : > { %2148 = vmatmul.bf16.gmra.mxu3 %v6276_v23  ;;  %v2536_v23 = vsel %vm535_vm0, %v6264_v44, %v2535_v46  ;;  %v1934_v44 = vadd.f32 %v7399_v21, %v6284_v12 }
 0x2b6   : > { %v2259_v4 = vmax.f32 %v2196_v34, 0.0  ;;  %v810_v17 = vsel %vm664_vm1, %v6491_v11, %v809_v35 }
 0x2b7   : > { %v2020_v33 = vpop.f32.mrf.mxu2 }
 0x2b8   : > { %v2021_v26 = vadd.f32 %v2020_v33, %v6268_v61  ;;  %v2109_v30 = vpop.f32.mrf.mxu3  ;;  %v2537_v56 = vrot.slane %v2259_v4, 7  ;;  %v6488_v10 = vpack.c.bf16 %v2259_v4, %v2258_v62  ;;  %v2663_v7 = vrot.slane %v2259_v4, 1 }
 0x2b9   : > { %v2200_v32 = vpop.f32.mrf.mxu0  ;;  %v866_v4 = vpack.c.bf16 %v810_v17, %v6491_v11  ;;  %v865_v33 = vpack.c.bf16 %v6463_v37, %v6463_v37 }
 0x2ba   : > { %v2110_v25 = vadd.f32 %v2109_v30, %v2021_v26  ;;  %v2538_v42 = vsel %vm535_vm0, %v2535_v46, %v2537_v56  ;;  %v2664_v31 = vsel %vm664_vm1, %v2662_v40, %v2663_v7  ;;  %v2666_v61 = vsel %vm664_vm1, %v2663_v7, %v2665_v53  ;;  %v2387_v7 = vld [vmem:[#allocation2 + $0x28] sm:$0x1] }
 0x2bb   : > { %v6499_v50 = vpack.c.bf16 %v2538_v42, %v2536_v23  ;;  %v6501_v62 = vpack.c.bf16 %v2666_v61, %v2664_v31  ;;  %v6513_v30 = vrot.slane %v6463_v37, 7  ;;  %v2635_v21 = vrot.slane %v2387_v7, 1 }
 0x2bc   : > { %v2199_v16 = vadd.f32 %v2198_v43, %v2110_v25  ;;  %v2415_v43 = vld [vmem:[#allocation2 + $0x1c8] sm:$0x1] }
 0x2bd   : > { %7397 = vst [vmem:[#allocation45_spill] sm:$0xff] %v6499_v50  ;;  %3452 = vmatmul.bf16.gmra.mxu1 %v6499_v50  ;;  %v2670_v35 = vrot.slane %v2415_v43, 1 }
 0x2be   : > { %7398 = vst [vmem:[#allocation46_spill] sm:$0xff] %v6501_v62  ;;  %v2260_v51 = vmax.f32 %v2199_v16, 0.0  ;;  %v5199_v16 = vld [vmem:[#allocation9 + $0x118] sm:$0xff] }
 0x2bf   : > { %v2022_v20 = vpop.f32.mrf.mxu2  ;;  %7400 = vst [vmem:[#allocation15_spill] sm:$0xff] %v6513_v30  ;;  %3774 = vmatpush.bf16.msrb.mxu1 %v5199_v16 }
 0x2c0   : > { %v2023_v34 = vadd.f32 %v2022_v20, %v1934_v44  ;;  %v2111_v46 = vpop.f32.mrf.mxu3  ;;  %v2540_v12 = vrot.slane %v2260_v51, 7  ;;  %v2667_v25 = vrot.slane %v2260_v51, 1 }
 0x2c1   : > { %v2203_v53 = vpop.f32.mrf.mxu0 }
 0x2c2   : > { %v2112_v40 = vadd.f32 %v2111_v46, %v2023_v34  ;;  %v2541_v37 = vsel %vm535_vm0, %v6513_v30, %v2540_v12 }
 0x2c4   : > { %v2201_v26 = vadd.f32 %v2200_v32, %v2112_v40  ;;  %2064 = vmatmul.bf16.gmra.mxu2 %v6366_v48  ;;  %2242 = vmatmul.bf16.gmra.mxu0 %v866_v4  ;;  %v1939_v40 = vadd.f32 %v6289_v24, %v6296_v1 }
 0x2c5   : > { %2153 = vmatmul.bf16.gmra.mxu3 %v865_v33 }
 0x2c6   : > { %v2261_v56 = vmax.f32 %v2201_v26, 0.0  ;;  %v2636_v26 = vsel %vm664_vm1, %v6491_v11, %v2635_v21 }
 0x2c7   : > { %v2025_v23 = vpop.f32.mrf.mxu2 }
 0x2c8   : > { %v2026_v42 = vadd.f32 %v2025_v23, %v6291_v28  ;;  %v2114_v31 = vpop.f32.mrf.mxu3  ;;  %v2542_v61 = vrot.slane %v2261_v56, 7  ;;  %v6516_v17 = vpack.c.bf16 %v2261_v56, %v2260_v51  ;;  %v2668_v32 = vrot.slane %v2261_v56, 1  ;;  %v6532_v56 = vpop.f32.mrf.mxu1 }
 0x2c9   : > { %v2205_v48 = vpop.f32.mrf.mxu0 }
 0x2ca   : > { %v2115_v44 = vadd.f32 %v2114_v31, %v2026_v42  ;;  %v2543_v20 = vsel %vm535_vm0, %v2540_v12, %v2542_v61  ;;  %v2669_v34 = vsel %vm664_vm1, %v2667_v25, %v2668_v32  ;;  %v2671_v46 = vsel %vm664_vm1, %v2668_v32, %v2670_v35  ;;  %v2419_v31 = vld [vmem:[#allocation2 + $0x170] sm:$0x1] }
 0x2cb   : > { %v6523_v28 = vpack.c.bf16 %v2543_v20, %v2541_v37  ;;  %v6525_v4 = vpack.c.bf16 %v2671_v46, %v2669_v34  ;;  %v2782_v25 = vpack.c.bf16 %v2636_v26, %v6491_v11  ;;  %v2675_v61 = vrot.slane %v2419_v31, 1 }
 0x2cc   : > { %v2204_v51 = vadd.f32 %v2203_v53, %v2115_v44 }
 0x2cd   : > { %7401 = vst [vmem:[#allocation16_spill] sm:$0xff] %v6523_v28  ;;  %3457 = vmatmul.bf16.gmra.mxu1 %v6523_v28 }
 0x2ce   : > { %7402 = vst [vmem:[#allocation47_spill] sm:$0xff] %v6525_v4  ;;  %v2262_v43 = vmax.f32 %v2204_v51, 0.0 }
 0x2cf   : > { %v2027_v12 = vpop.f32.mrf.mxu2 }
 0x2d0   : > { %v2028_v7 = vadd.f32 %v2027_v12, %v1939_v40  ;;  %v2116_v23 = vpop.f32.mrf.mxu3  ;;  %v2545_v24 = vrot.slane %v2262_v43, 7  ;;  %v2672_v32 = vrot.slane %v2262_v43, 1  ;;  %v6537_v44 = vpop.f32.mrf.mxu1 }
 0x2d1   : > { %v2208_v35 = vpop.f32.mrf.mxu0 }
 0x2d2   : > { %v2117_v42 = vadd.f32 %v2116_v23, %v2028_v7 }
 0x2d4   : > { %v2206_v53 = vadd.f32 %v2205_v48, %v2117_v42  ;;  %3511 = vmatmul.bf16.vlgmr.msrb.gmra.mxu2 %v865_v33  ;;  %3689 = vmatmul.bf16.vlgmr.msrb.gmra.mxu0 %v6402_v36  ;;  %v2546_v33 = vsel %vm535_vm0, %v6513_v30, %v2545_v24 }
 0x2d5   : > { %3600 = vmatmul.bf16.vlgmr.msrb.gmra.mxu3 %v2782_v25 }
 0x2d6   : > { %v2263_v1 = vmax.f32 %v2206_v53, 0.0 }
 0x2d7   : > { %v2030_v16 = vpop.f32.mrf.mxu2 }
 0x2d8   : > { %v2031_v21 = vadd.f32 %v2030_v16, %v6302_v52  ;;  %v2119_v37 = vpop.f32.mrf.mxu3  ;;  %v2547_v20 = vrot.slane %v2263_v1, 7  ;;  %v6539_v34 = vpack.c.bf16 %v2263_v1, %v2262_v43  ;;  %v2673_v11 = vrot.slane %v2263_v1, 1  ;;  %v2423_v1 = vld [vmem:[#allocation2 + $0x1f0] sm:$0x1] }
 0x2d9   : > { %v2210_v46 = vpop.f32.mrf.mxu0  ;;  %v1944_v43 = vadd.f32 %v6300_v57, %v6307_v8 }
 0x2da   : > { %v2120_v36 = vadd.f32 %v2119_v37, %v2031_v21  ;;  %v2548_v48 = vsel %vm535_vm0, %v2545_v24, %v2547_v20  ;;  %v2674_v51 = vsel %vm664_vm1, %v2672_v32, %v2673_v11  ;;  %v2676_v40 = vsel %vm664_vm1, %v2673_v11, %v2675_v61  ;;  %v6553_v24 = vpop.f32.mrf.mxu1  ;;  %v5198_v11 = vld [vmem:[#allocation9 + $0x110] sm:$0xff] }
 0x2db   : > { %v6546_v26 = vpack.c.bf16 %v2548_v48, %v2546_v33  ;;  %v6548_v52 = vpack.c.bf16 %v2676_v40, %v2674_v51  ;;  %v2680_v32 = vrot.slane %v2423_v1, 1  ;;  %3775 = vmatpush.bf16.msrb.mxu1 %v5198_v11 }
 0x2dc   : > { %v2209_v12 = vadd.f32 %v2208_v35, %v2120_v36 }
 0x2dd   : > { %7403 = vst [vmem:[#allocation48_spill] sm:$0xff] %v6546_v26  ;;  %3462 = vmatmul.bf16.gmra.mxu1 %v6546_v26 }
 0x2de   : > { %7404 = vst [vmem:[#allocation24_spill] sm:$0xff] %v6548_v52  ;;  %v2264_v7 = vmax.f32 %v2209_v12, 0.0 }
 0x2df   : > { %v2032_v23 = vpop.f32.mrf.mxu2 }
 0x2e0   : > { %v2033_v25 = vadd.f32 %v2032_v23, %v1944_v43  ;;  %v2121_v42 = vpop.f32.mrf.mxu3  ;;  %v2550_v35 = vrot.slane %v2264_v7, 7  ;;  %v2677_v8 = vrot.slane %v2264_v7, 1 }
 0x2e1   : > { %v2213_v31 = vpop.f32.mrf.mxu0 }
 0x2e2   : > { %v2122_v53 = vadd.f32 %v2121_v42, %v2033_v25  ;;  %v2551_v48 = vsel %vm535_vm0, %v6513_v30, %v2550_v35  ;;  %v1949_v42 = vadd.f32 %v6311_v3, %v6318_v39 }
 0x2e4   : > { %v2211_v61 = vadd.f32 %v2210_v46, %v2122_v53  ;;  %3516 = vmatmul.bf16.gmra.mxu2 %v6396_v0  ;;  %3694 = vmatmul.bf16.gmra.mxu0 %v6420_v14 }
 0x2e5   : > { %3605 = vmatmul.bf16.gmra.mxu3 %v6405_v58 }
 0x2e6   : > { %v2265_v16 = vmax.f32 %v2211_v61, 0.0 }
 0x2e7   : > { %v2035_v57 = vpop.f32.mrf.mxu2 }
 0x2e8   : > { %v2036_v21 = vadd.f32 %v2035_v57, %v6313_v41  ;;  %v2124_v37 = vpop.f32.mrf.mxu3  ;;  %v2552_v20 = vrot.slane %v2265_v16, 7  ;;  %v6559_v33 = vpack.c.bf16 %v2265_v16, %v2264_v7  ;;  %v2678_v36 = vrot.slane %v2265_v16, 1 }
 0x2e9   : > { %v2215_v46 = vpop.f32.mrf.mxu0 }
 0x2ea   : > { %v2125_v51 = vadd.f32 %v2124_v37, %v2036_v21  ;;  %v6563_v40 = vpop.f32.mrf.mxu1  ;;  %v2553_v12 = vsel %vm535_vm0, %v2550_v35, %v2552_v20  ;;  %v2679_v43 = vsel %vm664_vm1, %v2677_v8, %v2678_v36  ;;  %v2681_v41 = vsel %vm664_vm1, %v2678_v36, %v2680_v32  ;;  %v2427_v8 = vld [vmem:[#allocation2 + $0x160] sm:$0x1] }
 0x2eb   : > { %v6568_v23 = vpack.c.bf16 %v2553_v12, %v2551_v48  ;;  %v6570_v25 = vpack.c.bf16 %v2681_v41, %v2679_v43  ;;  %v2685_v20 = vrot.slane %v2427_v8, 1 }
 0x2ec   : > { %v2214_v7 = vadd.f32 %v2213_v31, %v2125_v51 }
 0x2ed   : > { %7405 = vst [vmem:[#allocation19_spill] sm:$0xff] %v6568_v23  ;;  %3467 = vmatmul.bf16.gmra.mxu1 %v6568_v23 }
 0x2ee   : > { %v2266_v53 = vmax.f32 %v2214_v7, 0.0 }
 0x2ef   : > { %v2037_v1 = vpop.f32.mrf.mxu2 }
 0x2f0   : > { %v2038_v61 = vadd.f32 %v2037_v1, %v1949_v42  ;;  %v2126_v16 = vpop.f32.mrf.mxu3  ;;  %v2555_v31 = vrot.slane %v2266_v53, 7  ;;  %v2682_v39 = vrot.slane %v2266_v53, 1 }
 0x2f1   : > { %v2218_v35 = vpop.f32.mrf.mxu0 }
 0x2f2   : > { %v2127_v57 = vadd.f32 %v2126_v16, %v2038_v61  ;;  %v6575_v21 = vpop.f32.mrf.mxu1 }
 0x2f4   : > { %v2216_v32 = vadd.f32 %v2215_v46, %v2127_v57  ;;  %3521 = vmatmul.bf16.gmra.mxu2 %v6413_v15  ;;  %3699 = vmatmul.bf16.gmra.mxu0 %v6436_v29  ;;  %v2556_v46 = vsel %vm535_vm0, %v6513_v30, %v2555_v31  ;;  %v7407_v57 = vld [vmem:[#allocation35_spill] sm:$0xff] }
 0x2f5   : > { %3610 = vmatmul.bf16.gmra.mxu3 %v6422_v6  ;;  %v1954_v8 = vadd.f32 %v7407_v57, %v6329_v63 }
 0x2f6   : > { %v2267_v37 = vmax.f32 %v2216_v32, 0.0 }
 0x2f7   : > { %v2040_v3 = vpop.f32.mrf.mxu2 }
 0x2f8   : > { %v2041_v11 = vadd.f32 %v2040_v3, %v6324_v13  ;;  %v2129_v36 = vpop.f32.mrf.mxu3  ;;  %v2557_v48 = vrot.slane %v2267_v37, 7  ;;  %v6581_v51 = vpack.c.bf16 %v2267_v37, %v2266_v53  ;;  %v2683_v12 = vrot.slane %v2267_v37, 1 }
 0x2f9   : > { %v2220_v43 = vpop.f32.mrf.mxu0 }
 0x2fa   : > { %v2130_v41 = vadd.f32 %v2129_v36, %v2041_v11  ;;  %v6585_v7 = vpop.f32.mrf.mxu1  ;;  %v2558_v42 = vsel %vm535_vm0, %v2555_v31, %v2557_v48  ;;  %v2684_v1 = vsel %vm664_vm1, %v2682_v39, %v2683_v12  ;;  %v2686_v61 = vsel %vm664_vm1, %v2683_v12, %v2685_v20  ;;  %v2431_v39 = vld [vmem:[#allocation2 + $0x1b0] sm:$0x1] }
 0x2fb   : > { %v6590_v16 = vpack.c.bf16 %v2558_v42, %v2556_v46  ;;  %v6592_v13 = vpack.c.bf16 %v2686_v61, %v2684_v1  ;;  %v2690_v46 = vrot.slane %v2431_v39, 1 }
 0x2fc   : > { %v2219_v53 = vadd.f32 %v2218_v35, %v2130_v41 }
 0x2fd   : > { %7406 = vst [vmem:[#allocation20_spill] sm:$0xff] %v6592_v13  ;;  %3472 = vmatmul.bf16.gmra.mxu1 %v6590_v16 }
 0x2fe   : > { %v2268_v32 = vmax.f32 %v2219_v53, 0.0  ;;  %v5197_v53 = vld [vmem:[#allocation9 + $0x108] sm:$0xff] }
 0x2ff   : > { %v2042_v37 = vpop.f32.mrf.mxu2  ;;  %3776 = vmatpush.bf16.msrb.mxu1 %v5197_v53 }
 0x300   : > { %v2043_v3 = vadd.f32 %v2042_v37, %v1954_v8  ;;  %v2131_v11 = vpop.f32.mrf.mxu3  ;;  %v2560_v35 = vrot.slane %v2268_v32, 7  ;;  %v2687_v41 = vrot.slane %v2268_v32, 1 }
 0x301   : > { %v2223_v36 = vpop.f32.mrf.mxu0 }
 0x302   : > { %v2132_v31 = vadd.f32 %v2131_v11, %v2043_v3  ;;  %v6597_v48 = vpop.f32.mrf.mxu1  ;;  %v2561_v37 = vsel %vm535_vm0, %v6513_v30, %v2560_v35 }
 0x304   : > { %v2221_v20 = vadd.f32 %v2220_v43, %v2132_v31  ;;  %3526 = vmatmul.bf16.gmra.mxu2 %v6430_v55  ;;  %3704 = vmatmul.bf16.gmra.mxu0 %v6454_v9 }
 0x305   : > { %3615 = vmatmul.bf16.gmra.mxu3 %v6439_v47 }
 0x306   : > { %v2269_v12 = vmax.f32 %v2221_v20, 0.0 }
 0x307   : > { %v2045_v63 = vpop.f32.mrf.mxu2 }
 0x308   : > { %v2046_v42 = vadd.f32 %v2045_v63, %v6335_v60  ;;  %v2134_v1 = vpop.f32.mrf.mxu3  ;;  %v2562_v61 = vrot.slane %v2269_v12, 7  ;;  %v6603_v57 = vpack.c.bf16 %v2269_v12, %v2268_v32  ;;  %v2688_v8 = vrot.slane %v2269_v12, 1 }
 0x309   : > { %v2225_v43 = vpop.f32.mrf.mxu0  ;;  %v1959_v12 = vadd.f32 %v6333_v54, %v6340_v18 }
 0x30a   : > { %v2135_v3 = vadd.f32 %v2134_v1, %v2046_v42  ;;  %v6607_v11 = vpop.f32.mrf.mxu1  ;;  %v2563_v31 = vsel %vm535_vm0, %v2560_v35, %v2562_v61  ;;  %v2689_v39 = vsel %vm664_vm1, %v2687_v41, %v2688_v8  ;;  %v2691_v60 = vsel %vm664_vm1, %v2688_v8, %v2690_v46  ;;  %v2435_v41 = vld [vmem:[#allocation2 + $0x230] sm:$0x1] }
 0x30b   : > { %v6612_v20 = vpack.c.bf16 %v2563_v31, %v2561_v37  ;;  %v6614_v63 = vpack.c.bf16 %v2691_v60, %v2689_v39  ;;  %v2695_v37 = vrot.slane %v2435_v41, 1 }
 0x30c   : > { %v2224_v32 = vadd.f32 %v2223_v36, %v2135_v3 }
 0x30d   : > { %7408 = vst [vmem:[#allocation29_spill] sm:$0xff] %v6612_v20  ;;  %3477 = vmatmul.bf16.gmra.mxu1 %v6612_v20 }
 0x30e   : > { %7409 = vst [vmem:[#allocation23_spill] sm:$0xff] %v6614_v63  ;;  %v2270_v42 = vmax.f32 %v2224_v32, 0.0 }
 0x30f   : > { %v2047_v1 = vpop.f32.mrf.mxu2 }
 0x310   : > { %v2048_v9 = vadd.f32 %v2047_v1, %v1959_v12  ;;  %v2136_v47 = vpop.f32.mrf.mxu3  ;;  %v2565_v36 = vrot.slane %v2270_v42, 7  ;;  %v2692_v18 = vrot.slane %v2270_v42, 1 }
 0x311   : > { %v2228_v35 = vpop.f32.mrf.mxu0 }
 0x312   : > { %v2137_v61 = vadd.f32 %v2136_v47, %v2048_v9  ;;  %v6619_v53 = vpop.f32.mrf.mxu1 }
 0x314   : > { %v2226_v46 = vadd.f32 %v2225_v43, %v2137_v61  ;;  %3531 = vmatmul.bf16.gmra.mxu2 %v6447_v22  ;;  %3709 = vmatmul.bf16.gmra.mxu0 %v6476_v59  ;;  %v2566_v43 = vsel %vm535_vm0, %v6513_v30, %v2565_v36 }
 0x315   : > { %3620 = vmatmul.bf16.gmra.mxu3 %v6456_v45 }
 0x316   : > { %v2271_v8 = vmax.f32 %v2226_v46, 0.0 }
 0x317   : > { %v2050_v54 = vpop.f32.mrf.mxu2 }
 0x318   : > { %v2051_v3 = vadd.f32 %v2050_v54, %v6346_v5  ;;  %v2139_v31 = vpop.f32.mrf.mxu3  ;;  %v2567_v39 = vrot.slane %v2271_v8, 7  ;;  %v6625_v47 = vpack.c.bf16 %v2271_v8, %v2270_v42  ;;  %v2693_v9 = vrot.slane %v2271_v8, 1  ;;  %v7412_v8 = vld [vmem:[#allocation17_spill] sm:$0xff] }
 0x319   : > { %v2230_v60 = vpop.f32.mrf.mxu0  ;;  %v1964_v54 = vadd.f32 %v7412_v8, %v6351_v19 }
 0x31a   : > { %v2140_v32 = vadd.f32 %v2139_v31, %v2051_v3  ;;  %v6629_v12 = vpop.f32.mrf.mxu1  ;;  %v2568_v1 = vsel %vm535_vm0, %v2565_v36, %v2567_v39  ;;  %v2694_v61 = vsel %vm664_vm1, %v2692_v18, %v2693_v9  ;;  %v2696_v41 = vsel %vm664_vm1, %v2693_v9, %v2695_v37  ;;  %v2439_v18 = vld [vmem:[#allocation2 + $0x200] sm:$0x1] }
 0x31b   : > { %v6634_v46 = vpack.c.bf16 %v2568_v1, %v2566_v43  ;;  %v6636_v5 = vpack.c.bf16 %v2696_v41, %v2694_v61  ;;  %v2700_v43 = vrot.slane %v2439_v18, 1  ;;  %v7413_v1 = vld [vmem:[#allocation36_spill] sm:$0xff] }
 0x31c   : > { %v2229_v42 = vadd.f32 %v2228_v35, %v2140_v32 }
 0x31d   : > { %7410 = vst [vmem:[#allocation26_spill] sm:$0xff] %v6634_v46  ;;  %3482 = vmatmul.bf16.gmra.mxu1 %v6634_v46 }
 0x31e   : > { %7411 = vst [vmem:[#allocation21_spill] sm:$0xff] %v6636_v5  ;;  %v2272_v59 = vmax.f32 %v2229_v42, 0.0 }
 0x31f   : > { %v2052_v3 = vpop.f32.mrf.mxu2 }
 0x320   : > { %v2053_v31 = vadd.f32 %v2052_v3, %v1964_v54  ;;  %v2141_v45 = vpop.f32.mrf.mxu3  ;;  %v2570_v35 = vrot.slane %v2272_v59, 7  ;;  %v2697_v32 = vrot.slane %v2272_v59, 1 }
 0x321   : > { %v2233_v29 = vpop.f32.mrf.mxu0 }
 0x322   : > { %v2142_v36 = vadd.f32 %v2141_v45, %v2053_v31  ;;  %v6641_v39 = vpop.f32.mrf.mxu1  ;;  %v5196_v45 = vld [vmem:[#allocation9 + $0x100] sm:$0xff]  ;;  %v2571_v3 = vsel %vm535_vm0, %v6513_v30, %v2570_v35 }
 0x323   : > { %3777 = vmatpush.bf16.msrb.mxu1 %v5196_v45 }
 0x324   : > { %v2231_v37 = vadd.f32 %v2230_v60, %v2142_v36  ;;  %3536 = vmatmul.bf16.gmra.mxu2 %v6470_v27  ;;  %3714 = vmatmul.bf16.gmra.mxu0 %v6499_v50 }
 0x325   : > { %3625 = vmatmul.bf16.gmra.mxu3 %v6479_v38  ;;  %v7417_v38 = vld [vmem:[#allocation18_spill] sm:$0xff] }
 0x326   : > { %v2273_v9 = vmax.f32 %v2231_v37, 0.0 }
 0x327   : > { %v2055_v19 = vpop.f32.mrf.mxu2 }
 0x328   : > { %v2056_v61 = vadd.f32 %v2055_v19, %v7413_v1  ;;  %v2144_v41 = vpop.f32.mrf.mxu3  ;;  %v2572_v42 = vrot.slane %v2273_v9, 7  ;;  %v6647_v8 = vpack.c.bf16 %v2273_v9, %v2272_v59  ;;  %v2698_v54 = vrot.slane %v2273_v9, 1  ;;  %v7416_v9 = vld [vmem:[#allocation37_spill] sm:$0xff] }
 0x329   : > { %v2235_v60 = vpop.f32.mrf.mxu0  ;;  %v1969_v6 = vadd.f32 %v7417_v38, %v7416_v9 }
 0x32a   : > { %v2145_v31 = vadd.f32 %v2144_v41, %v2056_v61  ;;  %v6651_v36 = vpop.f32.mrf.mxu1  ;;  %v2573_v37 = vsel %vm535_vm0, %v2570_v35, %v2572_v42  ;;  %v2699_v18 = vsel %vm664_vm1, %v2697_v32, %v2698_v54  ;;  %v2701_v19 = vsel %vm664_vm1, %v2698_v54, %v2700_v43  ;;  %v2443_v32 = vld [vmem:[#allocation2 + $0x208] sm:$0x1] }
 0x32b   : > { %v6656_v1 = vpack.c.bf16 %v2573_v37, %v2571_v3  ;;  %v6658_v50 = vpack.c.bf16 %v2701_v19, %v2699_v18  ;;  %v2705_v3 = vrot.slane %v2443_v32, 1  ;;  %v5219_v32 = vld [vmem:[#allocation9 + $0x1b8] sm:$0xff] }
 0x32c   : > { %v2234_v59 = vadd.f32 %v2233_v29, %v2145_v31  ;;  %3948 = vmatpush.bf16.msra.mxu3 %v5219_v32 }
 0x32d   : > { %7414 = vst [vmem:[#allocation32_spill] sm:$0xff] %v6656_v1  ;;  %3487 = vmatmul.bf16.gmra.mxu1 %v6656_v1 }
 0x32e   : > { %7415 = vst [vmem:[#allocation33_spill] sm:$0xff] %v6658_v50  ;;  %v2274_v61 = vmax.f32 %v2234_v59, 0.0 }
 0x32f   : > { %v2057_v41 = vpop.f32.mrf.mxu2 }
 0x330   : > { %v2058_v14 = vadd.f32 %v2057_v41, %v1969_v6  ;;  %v2146_v58 = vpop.f32.mrf.mxu3  ;;  %v2575_v29 = vrot.slane %v2274_v61, 7  ;;  %v2702_v31 = vrot.slane %v2274_v61, 1 }
 0x331   : > { %v2238_v35 = vpop.f32.mrf.mxu0 }
 0x332   : > { %v2147_v42 = vadd.f32 %v2146_v58, %v2058_v14  ;;  %v6663_v45 = vpop.f32.mrf.mxu1 }
 0x334   : > { %v2236_v43 = vadd.f32 %v2235_v60, %v2147_v42  ;;  %3541 = vmatmul.bf16.gmra.mxu2 %v6488_v10  ;;  %3719 = vmatmul.bf16.gmra.mxu0 %v6523_v28  ;;  %v2576_v60 = vsel %vm535_vm0, %v6513_v30, %v2575_v29  ;;  %v5211_v42 = vld [vmem:[#allocation9 + $0x178] sm:$0xff] }
 0x335   : > { %3630 = vmatmul.bf16.gmra.mxu3 %v6501_v62  ;;  %3859 = vmatpush.bf16.msra.mxu2 %v5211_v42 }
 0x336   : > { %v2275_v54 = vmax.f32 %v2236_v43, 0.0 }
 0x337   : > { %v2060_v38 = vpop.f32.mrf.mxu2 }
 0x338   : > { %v2061_v6 = vadd.f32 %v2060_v38, %v6371_v2  ;;  %v2149_v37 = vpop.f32.mrf.mxu3  ;;  %v2577_v18 = vrot.slane %v2275_v54, 7  ;;  %v6669_v58 = vpack.c.bf16 %v2275_v54, %v2274_v61  ;;  %v2703_v14 = vrot.slane %v2275_v54, 1 }
 0x339   : > { %v2240_v19 = vpop.f32.mrf.mxu0 }
 0x33a   : > { %7418 = vst [vmem:[#allocation28_spill] sm:$0xff] %v6669_v58  ;;  %v2150_v59 = vadd.f32 %v2149_v37, %v2061_v6  ;;  %v6673_v9 = vpop.f32.mrf.mxu1  ;;  %v2578_v41 = vsel %vm535_vm0, %v2575_v29, %v2577_v18  ;;  %v2704_v43 = vsel %vm664_vm1, %v2702_v31, %v2703_v14  ;;  %v2706_v2 = vsel %vm664_vm1, %v2703_v14, %v2705_v3  ;;  %v7422_v6 = vld [vmem:[#allocation38_spill] sm:$0xff]  ;;  %v5227_v3 = vld [vmem:[#allocation9 + $0x1f8] sm:$0xff] }
 0x33b   : > { %7419 = vst [vmem:[#allocation30_spill] sm:$0xff] %v6673_v9  ;;  %v6678_v38 = vpack.c.bf16 %v2578_v41, %v2576_v60  ;;  %v6680_v61 = vpack.c.bf16 %v2706_v2, %v2704_v43  ;;  %v1974_v37 = vadd.f32 %v7422_v6, %v6378_v49  ;;  %v2447_v14 = vld [vmem:[#allocation2 + $0xc0] sm:$0x1]  ;;  %4037 = vmatpush.bf16.msra.mxu0 %v5227_v3  ;;  %v5235_v49 = vld [vmem:[#allocation9 + $0x238] sm:$0xff] }
 0x33c   : > { %v2239_v54 = vadd.f32 %v2238_v35, %v2150_v59  ;;  %v2710_v41 = vrot.slane %v2447_v14, 1  ;;  %4126 = vmatpush.bf16.msra.mxu1 %v5235_v49 }
 0x33d   : > { %7420 = vst [vmem:[#allocation27_spill] sm:$0xff] %v6678_v38  ;;  %3492 = vmatmul.bf16.gmra.mxu1 %v6678_v38 }
 0x33e   : > { %7421 = vst [vmem:[#allocation49_spill] sm:$0xff] %v6680_v61  ;;  %v2276_v28 = vmax.f32 %v2239_v54, 0.0 }
 0x33f   : > { %v2062_v29 = vpop.f32.mrf.mxu2 }
 0x340   : > { %v2063_v18 = vadd.f32 %v2062_v29, %v1974_v37  ;;  %v2151_v62 = vpop.f32.mrf.mxu3  ;;  %v2580_v35 = vrot.slane %v2276_v28, 7  ;;  %v2707_v32 = vrot.slane %v2276_v28, 1 }
 0x341   : > { %v2243_v9 = vpop.f32.mrf.mxu0 }
 0x342   : > { %v2152_v31 = vadd.f32 %v2151_v62, %v2063_v18  ;;  %v6685_v58 = vpop.f32.mrf.mxu1  ;;  %v7423_v62 = vld [vmem:[#allocation39_spill] sm:$0xff]  ;;  %v2581_v29 = vsel %vm535_vm0, %v6513_v30, %v2580_v35 }
 0x344   : > { %v2241_v60 = vadd.f32 %v2240_v19, %v2152_v31  ;;  %3546 = vmatmul.bf16.gmra.mxu2 %v6516_v17  ;;  %3724 = vmatmul.bf16.gmra.mxu0 %v6546_v26 }
 0x345   : > { %3635 = vmatmul.bf16.gmra.mxu3 %v6525_v4 }
 0x346   : > { %v2277_v59 = vmax.f32 %v2241_v60, 0.0 }
 0x347   : > { %v2065_v42 = vpop.f32.mrf.mxu2 }
 0x348   : > { %v2066_v43 = vadd.f32 %v2065_v42, %v7423_v62  ;;  %v2154_v2 = vpop.f32.mrf.mxu3  ;;  %v2582_v54 = vrot.slane %v2277_v59, 7  ;;  %v6691_v6 = vpack.c.bf16 %v2277_v59, %v2276_v28  ;;  %v2708_v19 = vrot.slane %v2277_v59, 1  ;;  %v7427_v59 = vld [vmem:[#allocation22_spill] sm:$0xff] }
 0x349   : > { %v2245_v37 = vpop.f32.mrf.mxu0  ;;  %v1979_v62 = vadd.f32 %v6532_v56, %v7427_v59 }
 0x34a   : > { %v2155_v18 = vadd.f32 %v2154_v2, %v2066_v43  ;;  %v6695_v31 = vpop.f32.mrf.mxu1  ;;  %v2583_v3 = vsel %vm535_vm0, %v2580_v35, %v2582_v54  ;;  %v2709_v14 = vsel %vm664_vm1, %v2707_v32, %v2708_v19  ;;  %v2711_v60 = vsel %vm664_vm1, %v2708_v19, %v2710_v41  ;;  %v6710_v35 = vld [vmem:[%s7207_s4] ss:$0 sm:$0xff] }
 0x34b   : > { %7424 = vst [vmem:[#allocation35_spill] sm:$0xff] %v6695_v31  ;;  %v6700_v49 = vpack.c.bf16 %v2583_v3, %v2581_v29  ;;  %v6702_v42 = vpack.c.bf16 %v2711_v60, %v2709_v14  ;;  %v2451_v54 = vld [vmem:[#allocation2 + $0x20] sm:$0x1]  ;;  %v3424_v19 = vadd.f32 %v6710_v35, %v6537_v44 }
 0x34c   : > { %v2244_v28 = vadd.f32 %v2243_v9, %v2155_v18  ;;  %v2758_v18 = vrot.slane %v2451_v54, 1 }
 0x34d   : > { %7425 = vst [vmem:[#allocation17_spill] sm:$0xff] %v6700_v49  ;;  %3497 = vmatmul.bf16.gmra.mxu1 %v6700_v49 }
 0x34e   : > { %7426 = vst [vmem:[#allocation36_spill] sm:$0xff] %v6702_v42  ;;  %v2278_v26 = vmax.f32 %v2244_v28, 0.0 }
 0x34f   : > { %v2067_v43 = vpop.f32.mrf.mxu2 }
 0x350   : > { %v2068_v2 = vadd.f32 %v2067_v43, %v1979_v62  ;;  %v2156_v4 = vpop.f32.mrf.mxu3  ;;  %v2748_v56 = vrot.slane %v2278_v26, 7  ;;  %v2755_v14 = vrot.slane %v2278_v26, 1 }
 0x351   : > { %v3690_v31 = vpop.f32.mrf.mxu0 }
 0x352   : > { %v2157_v41 = vadd.f32 %v2156_v4, %v2068_v2  ;;  %v6712_v32 = vpop.f32.mrf.mxu1  ;;  %v2749_v43 = vsel %vm535_vm0, %v6513_v30, %v2748_v56 }
 0x354   : > { %v2246_v9 = vadd.f32 %v2245_v37, %v2157_v41  ;;  %3551 = vmatmul.bf16.gmra.mxu2 %v6539_v34  ;;  %3729 = vmatmul.bf16.gmra.mxu0 %v6568_v23  ;;  %v5210_v23 = vld [vmem:[#allocation9 + $0x170] sm:$0xff] }
 0x355   : > { %3640 = vmatmul.bf16.gmra.mxu3 %v6548_v52  ;;  %v5218_v52 = vld [vmem:[#allocation9 + $0x1b0] sm:$0xff]  ;;  %3860 = vmatpush.bf16.msra.mxu2 %v5210_v23 }
 0x356   : > { %v2279_v29 = vmax.f32 %v2246_v9, 0.0  ;;  %3949 = vmatpush.bf16.msra.mxu3 %v5218_v52 }
 0x357   : > { %v3512_v3 = vpop.f32.mrf.mxu2 }
 0x358   : > { %v3513_v60 = vadd.f32 %v3512_v3, %v3424_v19  ;;  %v3601_v4 = vpop.f32.mrf.mxu3  ;;  %v2750_v28 = vrot.slane %v2279_v29, 7  ;;  %v6719_v59 = vpack.c.bf16 %v2279_v29, %v2278_v26  ;;  %v2756_v37 = vrot.slane %v2279_v29, 1 }
 0x359   : > { %v3692_v62 = vpop.f32.mrf.mxu0  ;;  %v3426_v3 = vadd.f32 %v6710_v35, %v6553_v24  ;;  %v3429_v24 = vadd.f32 %v6710_v35, %v6563_v40 }
 0x35a   : > { %v3602_v2 = vadd.f32 %v3601_v4, %v3513_v60  ;;  %v6723_v41 = vpop.f32.mrf.mxu1  ;;  %v2751_v44 = vsel %vm535_vm0, %v2748_v56, %v2750_v28  ;;  %v2757_v54 = vsel %vm664_vm1, %v2755_v14, %v2756_v37  ;;  %v2759_v9 = vsel %vm664_vm1, %v2756_v37, %v2758_v18  ;;  %v5226_v18 = vld [vmem:[#allocation9 + $0x1f0] sm:$0xff] }
 0x35b   : > { %v6728_v19 = vpack.c.bf16 %v2751_v44, %v2749_v43  ;;  %v6730_v26 = vpack.c.bf16 %v2759_v9, %v2757_v54  ;;  %4038 = vmatpush.bf16.msra.mxu0 %v5226_v18 }
 0x35c   : > { %v6732_v29 = vadd.f32 %v3690_v31, %v3602_v2 }
 0x35d   : > { %7428 = vst [vmem:[#allocation37_spill] sm:$0xff] %v6728_v19  ;;  %3778 = vmatmul.bf16.vlgmr.msrb.gmra.mxu1 %v6396_v0  ;;  %v5234_v0 = vld [vmem:[#allocation9 + $0x230] sm:$0xff] }
 0x35e   : > { %7429 = vst [vmem:[#allocation18_spill] sm:$0xff] %v6730_v26  ;;  %4127 = vmatpush.bf16.msra.mxu1 %v5234_v0 }
 0x35f   : > { %v3514_v60 = vpop.f32.mrf.mxu2 }
 0x360   : > { %v3515_v4 = vadd.f32 %v3514_v60, %v3426_v3  ;;  %v3603_v56 = vpop.f32.mrf.mxu3 }
 0x361   : > { %v3695_v28 = vpop.f32.mrf.mxu0 }
 0x362   : > { %v3604_v14 = vadd.f32 %v3603_v56, %v3515_v4  ;;  %v6737_v30 = vpop.f32.mrf.mxu1 }
 0x364   : > { %3556 = vmatmul.bf16.gmra.mxu2 %v6559_v33  ;;  %3734 = vmatmul.bf16.gmra.mxu0 %v6590_v16  ;;  %v6741_v52 = vadd.f32 %v3692_v62, %v3604_v14  ;;  %v3431_v62 = vadd.f32 %v6710_v35, %v6575_v21 }
 0x365   : > { %3645 = vmatmul.bf16.gmra.mxu3 %v6570_v25 }
 0x367   : > { %v3517_v23 = vpop.f32.mrf.mxu2 }
 0x368   : > { %v3518_v31 = vadd.f32 %v3517_v23, %v3429_v24  ;;  %v3606_v37 = vpop.f32.mrf.mxu3 }
 0x369   : > { %v3697_v43 = vpop.f32.mrf.mxu0 }
 0x36a   : > { %v3607_v2 = vadd.f32 %v3606_v37, %v3518_v31  ;;  %v6746_v44 = vpop.f32.mrf.mxu1  ;;  %v5209_v37 = vld [vmem:[#allocation9 + $0x168] sm:$0xff] }
 0x36b   : > { %3861 = vmatpush.bf16.msra.mxu2 %v5209_v37 }
 0x36c   : > { %v6748_v54 = vadd.f32 %v3695_v28, %v3607_v2  ;;  %v3434_v28 = vadd.f32 %v6710_v35, %v6585_v7  ;;  %v5217_v2 = vld [vmem:[#allocation9 + $0x1a8] sm:$0xff] }
 0x36d   : > { %3783 = vmatmul.bf16.gmra.mxu1 %v6413_v15  ;;  %3950 = vmatpush.bf16.msra.mxu3 %v5217_v2 }
 0x36f   : > { %v3519_v9 = vpop.f32.mrf.mxu2 }
 0x370   : > { %v3520_v3 = vadd.f32 %v3519_v9, %v3431_v62  ;;  %v3608_v60 = vpop.f32.mrf.mxu3 }
 0x371   : > { %v3700_v4 = vpop.f32.mrf.mxu0 }
 0x372   : > { %v3609_v40 = vadd.f32 %v3608_v60, %v3520_v3  ;;  %v6753_v56 = vpop.f32.mrf.mxu1 }
 0x374   : > { %3561 = vmatmul.bf16.gmra.mxu2 %v6581_v51  ;;  %3739 = vmatmul.bf16.gmra.mxu0 %v6612_v20  ;;  %v6757_v14 = vadd.f32 %v3697_v43, %v3609_v40  ;;  %v3436_v43 = vadd.f32 %v6710_v35, %v6597_v48  ;;  %v3439_v48 = vadd.f32 %v6710_v35, %v6607_v11 }
 0x375   : > { %3650 = vmatmul.bf16.gmra.mxu3 %v6592_v13 }
 0x377   : > { %v3522_v18 = vpop.f32.mrf.mxu2 }
 0x378   : > { %v3523_v21 = vadd.f32 %v3522_v18, %v3434_v28  ;;  %v3611_v0 = vpop.f32.mrf.mxu3  ;;  %v5225_v18 = vld [vmem:[#allocation9 + $0x1e8] sm:$0xff] }
 0x379   : > { %v3702_v24 = vpop.f32.mrf.mxu0  ;;  %4039 = vmatpush.bf16.msra.mxu0 %v5225_v18 }
 0x37a   : > { %v3612_v23 = vadd.f32 %v3611_v0, %v3523_v21  ;;  %v6762_v31 = vpop.f32.mrf.mxu1 }
 0x37c   : > { %v6764_v62 = vadd.f32 %v3700_v4, %v3612_v23  ;;  %v5233_v4 = vld [vmem:[#allocation9 + $0x228] sm:$0xff] }
 0x37d   : > { %3788 = vmatmul.bf16.gmra.mxu1 %v6430_v55 }
 0x37e   : > { %4128 = vmatpush.bf16.msra.mxu1 %v5233_v4 }
 0x37f   : > { %v3524_v9 = vpop.f32.mrf.mxu2 }
 0x380   : > { %v3525_v7 = vadd.f32 %v3524_v9, %v3436_v43  ;;  %v3613_v3 = vpop.f32.mrf.mxu3 }
 0x381   : > { %v3705_v60 = vpop.f32.mrf.mxu0 }
 0x382   : > { %v3614_v40 = vadd.f32 %v3613_v3, %v3525_v7  ;;  %v6769_v28 = vpop.f32.mrf.mxu1 }
 0x384   : > { %3566 = vmatmul.bf16.gmra.mxu2 %v6603_v57  ;;  %3744 = vmatmul.bf16.gmra.mxu0 %v6634_v46  ;;  %v6773_v21 = vadd.f32 %v3702_v24, %v3614_v40  ;;  %v3441_v24 = vadd.f32 %v6710_v35, %v6619_v53 }
 0x385   : > { %3655 = vmatmul.bf16.gmra.mxu3 %v6614_v63 }
 0x387   : > { %v3527_v0 = vpop.f32.mrf.mxu2 }
 0x388   : > { %v3528_v23 = vadd.f32 %v3527_v0, %v3439_v48  ;;  %v3616_v37 = vpop.f32.mrf.mxu3 }
 0x389   : > { %v3707_v2 = vpop.f32.mrf.mxu0 }
 0x38a   : > { %v3617_v43 = vadd.f32 %v3616_v37, %v3528_v23  ;;  %v6778_v9 = vpop.f32.mrf.mxu1 }
 0x38c   : > { %v6780_v7 = vadd.f32 %v3705_v60, %v3617_v43  ;;  %v3444_v60 = vadd.f32 %v6710_v35, %v6629_v12 }
 0x38d   : > { %3793 = vmatmul.bf16.gmra.mxu1 %v6447_v22 }
 0x38f   : > { %v3529_v3 = vpop.f32.mrf.mxu2 }
 0x390   : > { %v3530_v40 = vadd.f32 %v3529_v3, %v3441_v24  ;;  %v3618_v18 = vpop.f32.mrf.mxu3  ;;  %v5208_v24 = vld [vmem:[#allocation9 + $0x160] sm:$0xff] }
 0x391   : > { %v3710_v26 = vpop.f32.mrf.mxu0  ;;  %v5216_v3 = vld [vmem:[#allocation9 + $0x1a0] sm:$0xff]  ;;  %3862 = vmatpush.bf16.msra.mxu2 %v5208_v24 }
 0x392   : > { %v3619_v11 = vadd.f32 %v3618_v18, %v3530_v40  ;;  %v6785_v46 = vpop.f32.mrf.mxu1  ;;  %3951 = vmatpush.bf16.msra.mxu3 %v5216_v3  ;;  %v3449_v3 = vadd.f32 %v6710_v35, %v6651_v36  ;;  %v5221_v36 = vld [vmem:[#allocation9 + $0x1c8] sm:$0xff] }
 0x394   : > { %3571 = vmatmul.bf16.gmra.mxu2 %v6625_v47  ;;  %3749 = vmatmul.bf16.gmra.mxu0 %v6656_v1  ;;  %v6789_v4 = vadd.f32 %v3707_v2, %v3619_v11  ;;  %v3446_v2 = vadd.f32 %v6710_v35, %v6641_v39  ;;  %v5232_v39 = vld [vmem:[#allocation9 + $0x220] sm:$0xff] }
 0x395   : > { %3660 = vmatmul.bf16.gmra.mxu3 %v6636_v5  ;;  %4129 = vmatpush.bf16.msra.mxu1 %v5232_v39 }
 0x397   : > { %v3532_v48 = vpop.f32.mrf.mxu2 }
 0x398   : > { %v3533_v53 = vadd.f32 %v3532_v48, %v3444_v60  ;;  %v3621_v0 = vpop.f32.mrf.mxu3  ;;  %v5224_v60 = vld [vmem:[#allocation9 + $0x1e0] sm:$0xff] }
 0x399   : > { %v3712_v23 = vpop.f32.mrf.mxu0  ;;  %4040 = vmatpush.bf16.msra.mxu0 %v5224_v60  ;;  %v5214_v60 = vld [vmem:[#allocation9 + $0x190] sm:$0xff] }
 0x39a   : > { %v3622_v37 = vadd.f32 %v3621_v0, %v3533_v53  ;;  %v6794_v43 = vpop.f32.mrf.mxu1  ;;  %v5215_v0 = vld [vmem:[#allocation9 + $0x198] sm:$0xff] }
 0x39b   : > { %3952 = vmatpush.bf16.msra.mxu3 %v5215_v0  ;;  %v3451_v0 = vadd.f32 %v6710_v35, %v6663_v45 }
 0x39c   : > { %v6796_v40 = vadd.f32 %v3710_v26, %v3622_v37  ;;  %v5207_v26 = vld [vmem:[#allocation9 + $0x158] sm:$0xff] }
 0x39d   : > { %3798 = vmatmul.bf16.gmra.mxu1 %v6470_v27  ;;  %v5223_v37 = vld [vmem:[#allocation9 + $0x1d8] sm:$0xff]  ;;  %3863 = vmatpush.bf16.msra.mxu2 %v5207_v26 }
 0x39e   : > { %4041 = vmatpush.bf16.msra.mxu0 %v5223_v37 }
 0x39f   : > { %v3534_v18 = vpop.f32.mrf.mxu2  ;;  %3953 = vmatpush.bf16.msra.mxu3 %v5214_v60 }
 0x3a0   : > { %v3535_v12 = vadd.f32 %v3534_v18, %v3446_v2  ;;  %v3623_v11 = vpop.f32.mrf.mxu3 }
 0x3a1   : > { %v3715_v48 = vpop.f32.mrf.mxu0 }
 0x3a2   : > { %v3624_v1 = vadd.f32 %v3623_v11, %v3535_v12  ;;  %v6801_v53 = vpop.f32.mrf.mxu1  ;;  %v5206_v11 = vld [vmem:[#allocation9 + $0x150] sm:$0xff] }
 0x3a3   : > { %3864 = vmatpush.bf16.msra.mxu2 %v5206_v11 }
 0x3a4   : > { %3576 = vmatmul.bf16.gmra.mxu2 %v6647_v8  ;;  %3754 = vmatmul.bf16.gmra.mxu0 %v6678_v38  ;;  %v6805_v24 = vadd.f32 %v3712_v23, %v3624_v1  ;;  %v5222_v38 = vld [vmem:[#allocation9 + $0x1d0] sm:$0xff]  ;;  %v5205_v23 = vld [vmem:[#allocation9 + $0x148] sm:$0xff] }
 0x3a5   : > { %3665 = vmatmul.bf16.gmra.mxu3 %v6658_v50  ;;  %v5213_v50 = vld [vmem:[#allocation9 + $0x188] sm:$0xff]  ;;  %4042 = vmatpush.bf16.msra.mxu0 %v5222_v38 }
 0x3a6   : > { %3954 = vmatpush.bf16.msra.mxu3 %v5213_v50  ;;  %v7431_v50 = vld [vmem:[#allocation30_spill] sm:$0xff] }
 0x3a7   : > { %v3537_v2 = vpop.f32.mrf.mxu2  ;;  %3865 = vmatpush.bf16.msra.mxu2 %v5205_v23 }
 0x3a8   : > { %v3538_v18 = vadd.f32 %v3537_v2, %v3449_v3  ;;  %v3626_v12 = vpop.f32.mrf.mxu3  ;;  %v5204_v2 = vld [vmem:[#allocation9 + $0x140] sm:$0xff] }
 0x3a9   : > { %v3717_v5 = vpop.f32.mrf.mxu0  ;;  %4043 = vmatpush.bf16.msra.mxu0 %v5221_v36 }
 0x3aa   : > { %v3627_v63 = vadd.f32 %v3626_v12, %v3538_v18  ;;  %v6810_v1 = vpop.f32.mrf.mxu1  ;;  %v5212_v18 = vld [vmem:[#allocation9 + $0x180] sm:$0xff] }
 0x3ab   : > { %v5220_v12 = vld [vmem:[#allocation9 + $0x1c0] sm:$0xff]  ;;  %3866 = vmatpush.bf16.msra.mxu2 %v5204_v2  ;;  %3955 = vmatpush.bf16.msra.mxu3 %v5212_v18 }
 0x3ac   : > { %v6812_v26 = vadd.f32 %v3715_v48, %v3627_v63  ;;  %v7430_v63 = vld [vmem:[#allocation28_spill] sm:$0xff]  ;;  %v3454_v48 = vadd.f32 %v6710_v35, %v7431_v50 }
 0x3ad   : > { %3803 = vmatmul.bf16.gmra.mxu1 %v6488_v10  ;;  %4044 = vmatpush.bf16.msra.mxu0 %v5220_v12 }
 0x3af   : > { %v3539_v37 = vpop.f32.mrf.mxu2 }
 0x3b0   : > { %v3540_v39 = vadd.f32 %v3539_v37, %v3451_v0  ;;  %v3628_v3 = vpop.f32.mrf.mxu3 }
 0x3b1   : > { %v3720_v11 = vpop.f32.mrf.mxu0 }
 0x3b2   : > { %v3629_v60 = vadd.f32 %v3628_v3, %v3540_v39  ;;  %v6817_v38 = vpop.f32.mrf.mxu1 }
 0x3b4   : > { %3581 = vmatmul.bf16.gmra.mxu2 %v7430_v63  ;;  %3759 = vmatmul.bf16.gmra.mxu0 %v6700_v49  ;;  %v6821_v45 = vadd.f32 %v3717_v5, %v3629_v60  ;;  %v3456_v5 = vadd.f32 %v6710_v35, %v6685_v58 }
 0x3b5   : > { %3670 = vmatmul.bf16.gmra.mxu3 %v6680_v61 }
 0x3b7   : > { %v3542_v23 = vpop.f32.mrf.mxu2 }
 0x3b8   : > { %v3543_v36 = vadd.f32 %v3542_v23, %v3454_v48  ;;  %v3631_v0 = vpop.f32.mrf.mxu3  ;;  %v7432_v23 = vld [vmem:[#allocation35_spill] sm:$0xff] }
 0x3b9   : > { %v3722_v37 = vpop.f32.mrf.mxu0 }
 0x3ba   : > { %v3632_v39 = vadd.f32 %v3631_v0, %v3543_v36  ;;  %v6826_v3 = vpop.f32.mrf.mxu1  ;;  %v3459_v36 = vadd.f32 %v6710_v35, %v7432_v23 }
 0x3bc   : > { %v6828_v2 = vadd.f32 %v3720_v11, %v3632_v39  ;;  %v5231_v11 = vld [vmem:[#allocation9 + $0x218] sm:$0xff] }
 0x3bd   : > { %3808 = vmatmul.bf16.gmra.mxu1 %v6516_v17 }
 0x3be   : > { %4130 = vmatpush.bf16.msra.mxu1 %v5231_v11  ;;  %v7433_v11 = vld [vmem:[#allocation25_spill] sm:$0xff] }
 0x3bf   : > { %v3544_v18 = vpop.f32.mrf.mxu2 }
 0x3c0   : > { %v3545_v12 = vadd.f32 %v3544_v18, %v3456_v5  ;;  %v3633_v60 = vpop.f32.mrf.mxu3 }
 0x3c1   : > { %v3725_v49 = vpop.f32.mrf.mxu0 }
 0x3c2   : > { %v3634_v61 = vadd.f32 %v3633_v60, %v3545_v12  ;;  %v6833_v50 = vpop.f32.mrf.mxu1 }
 0x3c4   : > { %3586 = vmatmul.bf16.gmra.mxu2 %v6691_v6  ;;  %3764 = vmatmul.bf16.gmra.mxu0 %v6728_v19  ;;  %v6837_v48 = vadd.f32 %v3722_v37, %v3634_v61  ;;  %v3461_v61 = vadd.f32 %v6710_v35, %v6712_v32 }
 0x3c5   : > { %3675 = vmatmul.bf16.gmra.mxu3 %v6702_v42 }
 0x3c7   : > { %v3547_v58 = vpop.f32.mrf.mxu2 }
 0x3c8   : > { %v3548_v0 = vadd.f32 %v3547_v58, %v3459_v36  ;;  %v3636_v39 = vpop.f32.mrf.mxu3  ;;  %v3464_v58 = vadd.f32 %v6710_v35, %v6723_v41 }
 0x3c9   : > { %v3727_v5 = vpop.f32.mrf.mxu0 }
 0x3ca   : > { %v3637_v18 = vadd.f32 %v3636_v39, %v3548_v0  ;;  %v6842_v12 = vpop.f32.mrf.mxu1 }
 0x3cc   : > { %v6844_v60 = vadd.f32 %v3725_v49, %v3637_v18  ;;  %v7434_v49 = vld [vmem:[#allocation40_spill] sm:$0xff] }
 0x3cd   : > { %3813 = vmatmul.bf16.gmra.mxu1 %v6539_v34 }
 0x3cf   : > { %v3549_v37 = vpop.f32.mrf.mxu2 }
 0x3d0   : > { %v3550_v19 = vadd.f32 %v3549_v37, %v3461_v61  ;;  %v3638_v42 = vpop.f32.mrf.mxu3 }
 0x3d1   : > { %v3730_v20 = vpop.f32.mrf.mxu0 }
 0x3d2   : > { %v3639_v23 = vadd.f32 %v3638_v42, %v3550_v19  ;;  %v6849_v13 = vpop.f32.mrf.mxu1 }
 0x3d4   : > { %3867 = vmatmul.bf16.vlgmr.msra.gmra.mxu2 %v7433_v11  ;;  %4045 = vmatmul.bf16.vlgmr.msra.gmra.mxu0 %v6413_v15  ;;  %v6853_v36 = vadd.f32 %v3727_v5, %v3639_v23  ;;  %v3466_v15 = vadd.f32 %v6710_v35, %v6737_v30  ;;  %v3469_v30 = vadd.f32 %v6710_v35, %v6746_v44 }
 0x3d5   : > { %3956 = vmatmul.bf16.vlgmr.msra.gmra.mxu3 %v7434_v49 }
 0x3d7   : > { %v3552_v0 = vpop.f32.mrf.mxu2 }
 0x3d8   : > { %v3553_v32 = vadd.f32 %v3552_v0, %v3464_v58  ;;  %v3641_v39 = vpop.f32.mrf.mxu3 }
 0x3d9   : > { %v3732_v18 = vpop.f32.mrf.mxu0 }
 0x3da   : > { %v3642_v61 = vadd.f32 %v3641_v39, %v3553_v32  ;;  %v3779_v37 = vpop.f32.mrf.mxu1  ;;  %v7435_v32 = vld [vmem:[#allocation41_spill] sm:$0xff]  ;;  %v5230_v39 = vld [vmem:[#allocation9 + $0x210] sm:$0xff] }
 0x3db   : > { %v6859_v42 = vadd.f32 %v3779_v37, %v6732_v29  ;;  %v7436_v29 = vld [vmem:[#allocation42_spill] sm:$0xff]  ;;  %4131 = vmatpush.bf16.msra.mxu1 %v5230_v39 }
 0x3dc   : > { %v6861_v19 = vadd.f32 %v3730_v20, %v3642_v61 }
 0x3dd   : > { %3818 = vmatmul.bf16.gmra.mxu1 %v6559_v33 }
 0x3df   : > { %v3554_v5 = vpop.f32.mrf.mxu2 }
 0x3e0   : > { %v3555_v23 = vadd.f32 %v3554_v5, %v3466_v15  ;;  %v3643_v11 = vpop.f32.mrf.mxu3 }
 0x3e1   : > { %v3735_v41 = vpop.f32.mrf.mxu0 }
 0x3e2   : > { %v3644_v49 = vadd.f32 %v3643_v11, %v3555_v23  ;;  %v3781_v58 = vpop.f32.mrf.mxu1 }
 0x3e3   : > { %v6867_v0 = vadd.f32 %v3781_v58, %v6741_v52 }
 0x3e4   : > { %3872 = vmatmul.bf16.gmra.mxu2 %v7435_v32  ;;  %4050 = vmatmul.bf16.gmra.mxu0 %v6430_v55  ;;  %v6871_v20 = vadd.f32 %v3732_v18, %v3644_v49  ;;  %v3471_v55 = vadd.f32 %v6710_v35, %v6753_v56  ;;  %v3474_v56 = vadd.f32 %v6710_v35, %v6762_v31 }
 0x3e5   : > { %3961 = vmatmul.bf16.gmra.mxu3 %v7436_v29 }
 0x3e7   : > { %v3557_v61 = vpop.f32.mrf.mxu2 }
 0x3e8   : > { %v3558_v37 = vadd.f32 %v3557_v61, %v3469_v30  ;;  %v3646_v15 = vpop.f32.mrf.mxu3 }
 0x3e9   : > { %v3737_v5 = vpop.f32.mrf.mxu0 }
 0x3ea   : > { %v3647_v23 = vadd.f32 %v3646_v15, %v3558_v37  ;;  %v3784_v52 = vpop.f32.mrf.mxu1  ;;  %v7437_v37 = vld [vmem:[#allocation31_spill] sm:$0xff] }
 0x3eb   : > { %v6877_v11 = vadd.f32 %v3784_v52, %v6748_v54 }
 0x3ec   : > { %v6879_v58 = vadd.f32 %v3735_v41, %v3647_v23  ;;  %v7438_v41 = vld [vmem:[#allocation34_spill] sm:$0xff] }
 0x3ed   : > { %3823 = vmatmul.bf16.gmra.mxu1 %v6581_v51 }
 0x3ef   : > { %v3559_v18 = vpop.f32.mrf.mxu2 }
 0x3f0   : > { %v3560_v49 = vadd.f32 %v3559_v18, %v3471_v55  ;;  %v3648_v44 = vpop.f32.mrf.mxu3 }
 0x3f1   : > { %v3740_v29 = vpop.f32.mrf.mxu0 }
 0x3f2   : > { %v3649_v39 = vadd.f32 %v3648_v44, %v3560_v49  ;;  %v3786_v30 = vpop.f32.mrf.mxu1 }
 0x3f3   : > { %v6885_v61 = vadd.f32 %v3786_v30, %v6757_v14 }
 0x3f4   : > { %3877 = vmatmul.bf16.gmra.mxu2 %v7437_v37  ;;  %4055 = vmatmul.bf16.gmra.mxu0 %v6447_v22  ;;  %v6889_v54 = vadd.f32 %v3737_v5, %v3649_v39  ;;  %v3476_v22 = vadd.f32 %v6710_v35, %v6769_v28  ;;  %v3479_v28 = vadd.f32 %v6710_v35, %v6778_v9 }
 0x3f5   : > { %3966 = vmatmul.bf16.gmra.mxu3 %v7438_v41 }
 0x3f7   : > { %v3562_v15 = vpop.f32.mrf.mxu2 }
 0x3f8   : > { %v3563_v23 = vadd.f32 %v3562_v15, %v3474_v56  ;;  %v3651_v52 = vpop.f32.mrf.mxu3 }
 0x3f9   : > { %v3742_v55 = vpop.f32.mrf.mxu0 }
 0x3fa   : > { %v3652_v18 = vadd.f32 %v3651_v52, %v3563_v23  ;;  %v3789_v49 = vpop.f32.mrf.mxu1  ;;  %v7439_v23 = vld [vmem:[#allocation43_spill] sm:$0xff] }
 0x3fb   : > { %v6895_v14 = vadd.f32 %v3789_v49, %v6764_v62  ;;  %v5229_v52 = vld [vmem:[#allocation9 + $0x208] sm:$0xff] }
 0x3fc   : > { %v6897_v44 = vadd.f32 %v3740_v29, %v3652_v18  ;;  %v7440_v29 = vld [vmem:[#allocation44_spill] sm:$0xff]  ;;  %4132 = vmatpush.bf16.msra.mxu1 %v5229_v52 }
 0x3fd   : > { %3828 = vmatmul.bf16.gmra.mxu1 %v6603_v57 }
 0x3ff   : > { %v3564_v5 = vpop.f32.mrf.mxu2 }
 0x400   : > { %v3565_v39 = vadd.f32 %v3564_v5, %v3476_v22  ;;  %v3653_v30 = vpop.f32.mrf.mxu3 }
 0x401   : > { %v3745_v31 = vpop.f32.mrf.mxu0 }
 0x402   : > { %v3654_v41 = vadd.f32 %v3653_v30, %v3565_v39  ;;  %v3791_v56 = vpop.f32.mrf.mxu1 }
 0x403   : > { %v6903_v15 = vadd.f32 %v3791_v56, %v6773_v21 }
 0x404   : > { %3882 = vmatmul.bf16.gmra.mxu2 %v7439_v23  ;;  %4060 = vmatmul.bf16.gmra.mxu0 %v6470_v27  ;;  %v6907_v62 = vadd.f32 %v3742_v55, %v3654_v41  ;;  %v3481_v27 = vadd.f32 %v6710_v35, %v6785_v46  ;;  %v3484_v46 = vadd.f32 %v6710_v35, %v6794_v43 }
 0x405   : > { %3971 = vmatmul.bf16.gmra.mxu3 %v7440_v29 }
 0x407   : > { %v3567_v18 = vpop.f32.mrf.mxu2 }
 0x408   : > { %v3568_v49 = vadd.f32 %v3567_v18, %v3479_v28  ;;  %v3656_v22 = vpop.f32.mrf.mxu3 }
 0x409   : > { %v3747_v5 = vpop.f32.mrf.mxu0 }
 0x40a   : > { %v3657_v39 = vadd.f32 %v3656_v22, %v3568_v49  ;;  %v3794_v21 = vpop.f32.mrf.mxu1  ;;  %v7441_v49 = vld [vmem:[#allocation14_spill] sm:$0xff] }
 0x40b   : > { %v6913_v30 = vadd.f32 %v3794_v21, %v6780_v7 }
 0x40c   : > { %v6915_v56 = vadd.f32 %v3745_v31, %v3657_v39  ;;  %v7442_v31 = vld [vmem:[#allocation45_spill] sm:$0xff] }
 0x40d   : > { %3833 = vmatmul.bf16.gmra.mxu1 %v6625_v47 }
 0x40f   : > { %v3569_v55 = vpop.f32.mrf.mxu2 }
 0x410   : > { %v3570_v41 = vadd.f32 %v3569_v55, %v3481_v27  ;;  %v3658_v9 = vpop.f32.mrf.mxu3 }
 0x411   : > { %v3750_v29 = vpop.f32.mrf.mxu0 }
 0x412   : > { %v3659_v52 = vadd.f32 %v3658_v9, %v3570_v41  ;;  %v3796_v28 = vpop.f32.mrf.mxu1 }
 0x413   : > { %v6921_v18 = vadd.f32 %v3796_v28, %v6789_v4 }
 0x414   : > { %3887 = vmatmul.bf16.gmra.mxu2 %v7441_v49  ;;  %4065 = vmatmul.bf16.gmra.mxu0 %v6488_v10  ;;  %v6925_v7 = vadd.f32 %v3747_v5, %v3659_v52  ;;  %v3486_v10 = vadd.f32 %v6710_v35, %v6801_v53  ;;  %v3489_v53 = vadd.f32 %v6710_v35, %v6810_v1 }
 0x415   : > { %3976 = vmatmul.bf16.gmra.mxu3 %v7442_v31 }
 0x417   : > { %v3572_v22 = vpop.f32.mrf.mxu2 }
 0x418   : > { %v3573_v39 = vadd.f32 %v3572_v22, %v3484_v46  ;;  %v3661_v21 = vpop.f32.mrf.mxu3 }
 0x419   : > { %v3752_v27 = vpop.f32.mrf.mxu0 }
 0x41a   : > { %v3662_v55 = vadd.f32 %v3661_v21, %v3573_v39  ;;  %v3799_v41 = vpop.f32.mrf.mxu1  ;;  %v7443_v39 = vld [vmem:[#allocation46_spill] sm:$0xff] }
 0x41b   : > { %v6931_v4 = vadd.f32 %v3799_v41, %v6796_v40  ;;  %v5228_v21 = vld [vmem:[#allocation9 + $0x200] sm:$0xff] }
 0x41c   : > { %v6933_v9 = vadd.f32 %v3750_v29, %v3662_v55  ;;  %v7444_v29 = vld [vmem:[#allocation16_spill] sm:$0xff]  ;;  %4133 = vmatpush.bf16.msra.mxu1 %v5228_v21 }
 0x41d   : > { %3838 = vmatmul.bf16.gmra.mxu1 %v6647_v8 }
 0x41f   : > { %v3574_v5 = vpop.f32.mrf.mxu2 }
 0x420   : > { %v3575_v52 = vadd.f32 %v3574_v5, %v3486_v10  ;;  %v3663_v28 = vpop.f32.mrf.mxu3 }
 0x421   : > { %v3755_v43 = vpop.f32.mrf.mxu0 }
 0x422   : > { %v3664_v31 = vadd.f32 %v3663_v28, %v3575_v52  ;;  %v3801_v46 = vpop.f32.mrf.mxu1 }
 0x423   : > { %v6939_v22 = vadd.f32 %v3801_v46, %v6805_v24 }
 0x424   : > { %3892 = vmatmul.bf16.gmra.mxu2 %v7443_v39  ;;  %4070 = vmatmul.bf16.gmra.mxu0 %v6516_v17  ;;  %v6943_v40 = vadd.f32 %v3752_v27, %v3664_v31  ;;  %v3491_v17 = vadd.f32 %v6710_v35, %v6817_v38  ;;  %v3494_v38 = vadd.f32 %v6710_v35, %v6826_v3 }
 0x425   : > { %3981 = vmatmul.bf16.gmra.mxu3 %v7444_v29 }
 0x427   : > { %v3577_v55 = vpop.f32.mrf.mxu2 }
 0x428   : > { %v3578_v41 = vadd.f32 %v3577_v55, %v3489_v53  ;;  %v3666_v10 = vpop.f32.mrf.mxu3 }
 0x429   : > { %v3757_v5 = vpop.f32.mrf.mxu0 }
 0x42a   : > { %v3667_v52 = vadd.f32 %v3666_v10, %v3578_v41  ;;  %v3804_v24 = vpop.f32.mrf.mxu1  ;;  %v7445_v41 = vld [vmem:[#allocation47_spill] sm:$0xff] }
 0x42b   : > { %v6949_v28 = vadd.f32 %v3804_v24, %v6812_v26 }
 0x42c   : > { %v6951_v46 = vadd.f32 %v3755_v43, %v3667_v52  ;;  %v7446_v43 = vld [vmem:[#allocation48_spill] sm:$0xff] }
 0x42d   : > { %3843 = vmatmul.bf16.gmra.mxu1 %v7430_v63 }
 0x42f   : > { %v3579_v27 = vpop.f32.mrf.mxu2 }
 0x430   : > { %v3580_v31 = vadd.f32 %v3579_v27, %v3491_v17  ;;  %v3668_v1 = vpop.f32.mrf.mxu3 }
 0x431   : > { %v3760_v29 = vpop.f32.mrf.mxu0 }
 0x432   : > { %v3669_v21 = vadd.f32 %v3668_v1, %v3580_v31  ;;  %v3806_v53 = vpop.f32.mrf.mxu1 }
 0x433   : > { %v6957_v55 = vadd.f32 %v3806_v53, %v6821_v45 }
 0x434   : > { %3897 = vmatmul.bf16.gmra.mxu2 %v7445_v41  ;;  %4075 = vmatmul.bf16.gmra.mxu0 %v6539_v34  ;;  %v6961_v26 = vadd.f32 %v3757_v5, %v3669_v21  ;;  %v3496_v34 = vadd.f32 %v6710_v35, %v6833_v50  ;;  %v3499_v50 = vadd.f32 %v6710_v35, %v6842_v12 }
 0x435   : > { %3986 = vmatmul.bf16.gmra.mxu3 %v7446_v43 }
 0x437   : > { %v3582_v10 = vpop.f32.mrf.mxu2 }
 0x438   : > { %v3583_v52 = vadd.f32 %v3582_v10, %v3494_v38  ;;  %v3671_v24 = vpop.f32.mrf.mxu3 }
 0x439   : > { %v3762_v17 = vpop.f32.mrf.mxu0 }
 0x43a   : > { %v3672_v27 = vadd.f32 %v3671_v24, %v3583_v52  ;;  %v3809_v31 = vpop.f32.mrf.mxu1  ;;  %v7447_v52 = vld [vmem:[#allocation24_spill] sm:$0xff] }
 0x43b   : > { %v6967_v45 = vadd.f32 %v3809_v31, %v6828_v2 }
 0x43c   : > { %v6969_v1 = vadd.f32 %v3760_v29, %v3672_v27  ;;  %v7448_v29 = vld [vmem:[#allocation19_spill] sm:$0xff] }
 0x43d   : > { %3848 = vmatmul.bf16.gmra.mxu1 %v6691_v6 }
 0x43f   : > { %v3584_v5 = vpop.f32.mrf.mxu2 }
 0x440   : > { %v3585_v21 = vadd.f32 %v3584_v5, %v3496_v34  ;;  %v3673_v53 = vpop.f32.mrf.mxu3 }
 0x441   : > { %v3765_v3 = vpop.f32.mrf.mxu0 }
 0x442   : > { %v3674_v43 = vadd.f32 %v3673_v53, %v3585_v21  ;;  %v3811_v38 = vpop.f32.mrf.mxu1 }
 0x443   : > { %v6975_v10 = vadd.f32 %v3811_v38, %v6837_v48 }
 0x444   : > { %3902 = vmatmul.bf16.gmra.mxu2 %v7447_v52  ;;  %4080 = vmatmul.bf16.gmra.mxu0 %v6559_v33  ;;  %v6979_v2 = vadd.f32 %v3762_v17, %v3674_v43  ;;  %v3501_v33 = vadd.f32 %v6710_v35, %v6849_v13 }
 0x445   : > { %3991 = vmatmul.bf16.gmra.mxu3 %v7448_v29 }
 0x447   : > { %v3587_v24 = vpop.f32.mrf.mxu2 }
 0x448   : > { %v3588_v27 = vadd.f32 %v3587_v24, %v3499_v50  ;;  %v3676_v31 = vpop.f32.mrf.mxu3 }
 0x449   : > { %v3767_v34 = vpop.f32.mrf.mxu0 }
 0x44a   : > { %v3677_v5 = vadd.f32 %v3676_v31, %v3588_v27  ;;  %v3814_v21 = vpop.f32.mrf.mxu1 }
 0x44b   : > { %v6985_v48 = vadd.f32 %v3814_v21, %v6844_v60 }
 0x44c   : > { %v6987_v53 = vadd.f32 %v3765_v3, %v3677_v5 }
 0x44d   : > { %3853 = vmatmul.bf16.gmra.mxu1 %v6719_v59 }
 0x44f   : > { %v3589_v17 = vpop.f32.mrf.mxu2 }
 0x450   : > { %v3590_v43 = vadd.f32 %v3589_v17, %v3501_v33  ;;  %v3678_v38 = vpop.f32.mrf.mxu3 }
 0x451   : > { %v4046_v12 = vpop.f32.mrf.mxu0 }
 0x452   : > { %v3679_v29 = vadd.f32 %v3678_v38, %v3590_v43  ;;  %v3816_v50 = vpop.f32.mrf.mxu1  ;;  %v7449_v38 = vld [vmem:[#allocation20_spill] sm:$0xff] }
 0x453   : > { %v6993_v24 = vadd.f32 %v3816_v50, %v6853_v36 }
 0x454   : > { %3907 = vmatmul.bf16.gmra.mxu2 %v6570_v25  ;;  %4085 = vmatmul.bf16.gmra.mxu0 %v6581_v51  ;;  %v6997_v60 = vadd.f32 %v3767_v34, %v3679_v29 }
 0x455   : > { %3996 = vmatmul.bf16.gmra.mxu3 %v6590_v16 }
 0x457   : > { %v3868_v3 = vpop.f32.mrf.mxu2 }
 0x458   : > { %v3869_v13 = vadd.f32 %v3868_v3, %v6859_v42  ;;  %v3957_v35 = vpop.f32.mrf.mxu3 }
 0x459   : > { %v4048_v27 = vpop.f32.mrf.mxu0 }
 0x45a   : > { %v3958_v31 = vadd.f32 %v3957_v35, %v3869_v13  ;;  %v3819_v5 = vpop.f32.mrf.mxu1 }
 0x45b   : > { %v7002_v21 = vadd.f32 %v3819_v5, %v6861_v19 }
 0x45c   : > { %v7004_v36 = vadd.f32 %v4046_v12, %v3958_v31  ;;  %v7450_v12 = vld [vmem:[#allocation29_spill] sm:$0xff] }
 0x45d   : > { %4134 = vmatmul.bf16.vlgmr.msra.gmra.mxu1 %v7435_v32 }
 0x45f   : > { %v3870_v33 = vpop.f32.mrf.mxu2 }
 0x460   : > { %v3871_v51 = vadd.f32 %v3870_v33, %v6867_v0  ;;  %v3959_v34 = vpop.f32.mrf.mxu3 }
 0x461   : > { %v4051_v17 = vpop.f32.mrf.mxu0 }
 0x462   : > { %v3960_v16 = vadd.f32 %v3959_v34, %v3871_v51  ;;  %v3821_v43 = vpop.f32.mrf.mxu1 }
 0x463   : > { %v7009_v42 = vadd.f32 %v3821_v43, %v6871_v20 }
 0x464   : > { %3912 = vmatmul.bf16.gmra.mxu2 %v7449_v38  ;;  %4090 = vmatmul.bf16.gmra.mxu0 %v6603_v57  ;;  %v7013_v19 = vadd.f32 %v4048_v27, %v3960_v16 }
 0x465   : > { %4001 = vmatmul.bf16.gmra.mxu3 %v7450_v12 }
 0x467   : > { %v3873_v29 = vpop.f32.mrf.mxu2 }
 0x468   : > { %v3874_v32 = vadd.f32 %v3873_v29, %v6877_v11  ;;  %v3962_v50 = vpop.f32.mrf.mxu3  ;;  %v7451_v11 = vld [vmem:[#allocation23_spill] sm:$0xff] }
 0x469   : > { %v4053_v13 = vpop.f32.mrf.mxu0 }
 0x46a   : > { %v3963_v0 = vadd.f32 %v3962_v50, %v3874_v32  ;;  %v3824_v3 = vpop.f32.mrf.mxu1 }
 0x46b   : > { %v7018_v35 = vadd.f32 %v3824_v3, %v6879_v58 }
 0x46c   : > { %v7020_v20 = vadd.f32 %v4051_v17, %v3963_v0  ;;  %v7452_v17 = vld [vmem:[#allocation26_spill] sm:$0xff] }
 0x46d   : > { %4139 = vmatmul.bf16.gmra.mxu1 %v7437_v37 }
 0x46f   : > { %v3875_v31 = vpop.f32.mrf.mxu2 }
 0x470   : > { %v3876_v57 = vadd.f32 %v3875_v31, %v6885_v61  ;;  %v3964_v27 = vpop.f32.mrf.mxu3 }
 0x471   : > { %v4056_v58 = vpop.f32.mrf.mxu0 }
 0x472   : > { %v3965_v5 = vadd.f32 %v3964_v27, %v3876_v57  ;;  %v3826_v33 = vpop.f32.mrf.mxu1  ;;  %v7454_v57 = vld [vmem:[#allocation32_spill] sm:$0xff] }
 0x473   : > { %v7025_v51 = vadd.f32 %v3826_v33, %v6889_v54 }
 0x474   : > { %3917 = vmatmul.bf16.gmra.mxu2 %v7451_v11  ;;  %4095 = vmatmul.bf16.gmra.mxu0 %v6625_v47  ;;  %v7029_v34 = vadd.f32 %v4053_v13, %v3965_v5 }
 0x475   : > { %4006 = vmatmul.bf16.gmra.mxu3 %v7452_v17 }
 0x477   : > { %v3878_v16 = vpop.f32.mrf.mxu2 }
 0x478   : > { %v3879_v37 = vadd.f32 %v3878_v16, %v6895_v14  ;;  %v3967_v43 = vpop.f32.mrf.mxu3  ;;  %v7453_v14 = vld [vmem:[#allocation21_spill] sm:$0xff] }
 0x479   : > { %v4058_v32 = vpop.f32.mrf.mxu0 }
 0x47a   : > { %v3968_v61 = vadd.f32 %v3967_v43, %v3879_v37  ;;  %v3829_v12 = vpop.f32.mrf.mxu1 }
 0x47b   : > { %v7034_v29 = vadd.f32 %v3829_v12, %v6897_v44 }
 0x47c   : > { %v7036_v54 = vadd.f32 %v4056_v58, %v3968_v61 }
 0x47d   : > { %4144 = vmatmul.bf16.gmra.mxu1 %v7439_v23 }
 0x47f   : > { %v3880_v47 = vpop.f32.mrf.mxu2 }
 0x480   : > { %v3881_v50 = vadd.f32 %v3880_v47, %v6903_v15  ;;  %v3969_v0 = vpop.f32.mrf.mxu3  ;;  %v7456_v47 = vld [vmem:[#allocation27_spill] sm:$0xff] }
 0x481   : > { %v4061_v33 = vpop.f32.mrf.mxu0 }
 0x482   : > { %v3970_v3 = vadd.f32 %v3969_v0, %v3881_v50  ;;  %v3831_v13 = vpop.f32.mrf.mxu1 }
 0x483   : > { %v7041_v31 = vadd.f32 %v3831_v13, %v6907_v62 }
 0x484   : > { %3922 = vmatmul.bf16.gmra.mxu2 %v7453_v14  ;;  %4100 = vmatmul.bf16.gmra.mxu0 %v6647_v8  ;;  %v7045_v44 = vadd.f32 %v4058_v32, %v3970_v3  ;;  %v7455_v32 = vld [vmem:[#allocation33_spill] sm:$0xff] }
 0x485   : > { %4011 = vmatmul.bf16.gmra.mxu3 %v7454_v57  ;;  %v7458_v3 = vld [vmem:[#allocation17_spill] sm:$0xff] }
 0x487   : > { %v3883_v27 = vpop.f32.mrf.mxu2 }
 0x488   : > { %v3884_v23 = vadd.f32 %v3883_v27, %v6913_v30  ;;  %v3972_v5 = vpop.f32.mrf.mxu3 }
 0x489   : > { %v4063_v12 = vpop.f32.mrf.mxu0 }
 0x48a   : > { %v3973_v15 = vadd.f32 %v3972_v5, %v3884_v23  ;;  %v3834_v58 = vpop.f32.mrf.mxu1  ;;  %v7461_v23 = vld [vmem:[#allocation15_spill] sm:$0xff] }
 0x48b   : > { %v7050_v17 = vadd.f32 %v3834_v58, %v6915_v56 }
 0x48c   : > { %v7052_v62 = vadd.f32 %v4061_v33, %v3973_v15 }
 0x48d   : > { %4149 = vmatmul.bf16.gmra.mxu1 %v7441_v49 }
 0x48f   : > { %v3885_v16 = vpop.f32.mrf.mxu2 }
 0x490   : > { %v3886_v8 = vadd.f32 %v3885_v16, %v6921_v18  ;;  %v3974_v37 = vpop.f32.mrf.mxu3 }
 0x492   : > { %v3975_v43 = vadd.f32 %v3974_v37, %v3886_v8  ;;  %v3836_v61 = vpop.f32.mrf.mxu1 }
 0x493   : > { %v7057_v30 = vadd.f32 %v3836_v61, %v6925_v7  ;;  %v7457_v7 = vld [vmem:[#allocation49_spill] sm:$0xff] }
 0x494   : > { %3927 = vmatmul.bf16.gmra.mxu2 %v7455_v32  ;;  %4105 = vmatmul.bf16.gmra.mxu0 %v7430_v63  ;;  %v7061_v56 = vadd.f32 %v4063_v12, %v3975_v43 }
 0x495   : > { %4016 = vmatmul.bf16.gmra.mxu3 %v7456_v47  ;;  %v4066_v47 = vpop.f32.mrf.mxu0 }
 0x49a   : > { %v3839_v50 = vpop.f32.mrf.mxu1 }
 0x49b   : > { %v7065_v49 = vadd.f32 %v3839_v50, %v6933_v9 }
 0x49d   : > { %4154 = vmatmul.bf16.gmra.mxu1 %v7443_v39  ;;  %v7459_v39 = vld [vmem:[#allocation36_spill] sm:$0xff] }
 0x4a2   : > { %v3841_v18 = vpop.f32.mrf.mxu1 }
 0x4a3   : > { %v7069_v0 = vadd.f32 %v3841_v18, %v6943_v40  ;;  %v7460_v40 = vld [vmem:[#allocation37_spill] sm:$0xff] }
 0x4a4   : > { %3932 = vmatmul.bf16.gmra.mxu2 %v7457_v7  ;;  %4110 = vmatmul.bf16.gmra.mxu0 %v6691_v6 }
 0x4a5   : > { %4021 = vmatmul.bf16.gmra.mxu3 %v7458_v3  ;;  %v7110_v3 = vpop.f32.mrf.mxu0 }
 0x4aa   : > { %v3844_v63 = vpop.f32.mrf.mxu1 }
 0x4ab   : > { %v7075_v13 = vadd.f32 %v3844_v63, %v6951_v46  ;;  %v7088_v46 = vld [vmem:[#allocation2 + $0xc8] sm:$0xff] }
 0x4ad   : > { %4159 = vmatmul.bf16.gmra.mxu1 %v7445_v41  ;;  %v2832_v41 = vpack.c.bf16 %v7088_v46, %v7088_v46 }
 0x4b2   : > { %v3846_v9 = vpop.f32.mrf.mxu1 }
 0x4b3   : > { %v7079_v57 = vadd.f32 %v3846_v9, %v6961_v26  ;;  %v2831_v26 = vpack.c.bf16 %v7461_v23, %v7461_v23 }
 0x4b4   : > { %3937 = vmatmul.bf16.gmra.mxu2 %v7459_v39  ;;  %4115 = vmatmul.bf16.gmra.mxu0 %v6719_v59  ;;  %v7462_v59 = vld [vmem:[#allocation18_spill] sm:$0xff] }
 0x4b5   : > { %4026 = vmatmul.bf16.gmra.mxu3 %v7460_v40 }
 0x4ba   : > { %v3849_v27 = vpop.f32.mrf.mxu1 }
 0x4bb   : > { %v7085_v6 = vadd.f32 %v3849_v27, %v6969_v1 }
 0x4bd   : > { %4164 = vmatmul.bf16.gmra.mxu1 %v7447_v52 }
 0x4c2   : > { %v3851_v5 = vpop.f32.mrf.mxu1 }
 0x4c3   : > { %v7095_v33 = vadd.f32 %v3851_v5, %v6979_v2  ;;  %v3888_v2 = vpop.f32.mrf.mxu2 }
 0x4c4   : > { %3942 = vmatmul.bf16.gmra.mxu2 %v7462_v59  ;;  %4120 = vmatmul.bf16.gmra.mxu0 %v2832_v41 }
 0x4c5   : > { %4031 = vmatmul.bf16.gmra.mxu3 %v2831_v26  ;;  %v7116_v26 = vpop.f32.mrf.mxu0 }
 0x4ca   : > { %v3854_v1 = vpop.f32.mrf.mxu1 }
 0x4cb   : > { %v7099_v15 = vadd.f32 %v3854_v1, %v6987_v53  ;;  %v3977_v53 = vpop.f32.mrf.mxu3 }
 0x4cd   : > { %4169 = vmatmul.bf16.gmra.mxu1 %v6570_v25  ;;  %v3890_v25 = vpop.f32.mrf.mxu2 }
 0x4d2   : > { %v3856_v52 = vpop.f32.mrf.mxu1 }
 0x4d3   : > { %v7103_v58 = vadd.f32 %v3856_v52, %v6997_v60 }
 0x4da   : > { %v4135_v16 = vpop.f32.mrf.mxu1 }
 0x4db   : > { %v4136_v8 = vadd.f32 %v4135_v16, %v7004_v36  ;;  %v3979_v36 = vpop.f32.mrf.mxu3 }
 0x4dd   : > { %v4215_v37 = vmax.f32 %v4136_v8, 0.0  ;;  %4174 = vmatmul.bf16.gmra.mxu1 %v7449_v38 }
 0x4df   : > { %4247 = vst [vmem:[#allocation3] sm:$0xff] %v4215_v37 }
 0x4e2   : > { %v4137_v43 = vpop.f32.mrf.mxu1 }
 0x4e3   : > { %v4138_v61 = vadd.f32 %v4137_v43, %v7013_v19  ;;  %v3893_v19 = vpop.f32.mrf.mxu2  ;;  %v7113_v40 = vpop.f32.mrf.mxu3 }
 0x4e5   : > { %v4216_v12 = vmax.f32 %v4138_v61, 0.0 }
 0x4e7   : > { %4248 = vst [vmem:[#allocation3 + $0x8] sm:$0xff] %v4216_v12  ;;  %v4073_v12 = vpop.f32.mrf.mxu0 }
 0x4ea   : > { %v4140_v50 = vpop.f32.mrf.mxu1 }
 0x4eb   : > { %v4141_v60 = vadd.f32 %v4140_v50, %v7020_v20  ;;  %v3895_v5 = vpop.f32.mrf.mxu2  ;;  %v3984_v43 = vpop.f32.mrf.mxu3 }
 0x4ed   : > { %v4217_v18 = vmax.f32 %v4141_v60, 0.0  ;;  %4179 = vmatmul.bf16.gmra.mxu1 %v7451_v11 }
 0x4ee   : > { %v4279_v20 = vld [vmem:[#allocation3] ss:$2 sm:$0xff]  ;;  %v4295_v23 = vld [vmem:[#allocation3 + $0x1] ss:$2 sm:$0xff] }
 0x4ef   : > { %4249 = vst [vmem:[#allocation3 + $0x10] sm:$0xff] %v4217_v18 }
 0x4f2   : > { %v4142_v38 = vpop.f32.mrf.mxu1 }
 0x4f3   : > { %v4143_v63 = vadd.f32 %v4142_v38, %v7029_v34  ;;  %v4342_v34 = vmax.f32 %v4279_v20, %v4295_v23  ;;  %v3898_v50 = vpop.f32.mrf.mxu2  ;;  %v3987_v38 = vpop.f32.mrf.mxu3 }
 0x4f5   : > { %v4218_v9 = vmax.f32 %v4143_v63, 0.0  ;;  %v3889_v63 = vadd.f32 %v3888_v2, %v6931_v4 }
 0x4f7   : > { %4250 = vst [vmem:[#allocation3 + $0x18] sm:$0xff] %v4218_v9  ;;  %v4076_v9 = vpop.f32.mrf.mxu0  ;;  %v3978_v20 = vadd.f32 %v3977_v53, %v3889_v63 }
 0x4fa   : > { %v4145_v27 = vpop.f32.mrf.mxu1 }
 0x4fb   : > { %v4146_v41 = vadd.f32 %v4145_v27, %v7036_v54  ;;  %v3900_v27 = vpop.f32.mrf.mxu2 }
 0x4fd   : > { %v4219_v11 = vmax.f32 %v4146_v41, 0.0  ;;  %4184 = vmatmul.bf16.gmra.mxu1 %v7453_v14 }
 0x4fe   : > { %v4311_v1 = vld [vmem:[#allocation3 + $0x10] ss:$2 sm:$0xff]  ;;  %v4327_v52 = vld [vmem:[#allocation3 + $0x11] ss:$2 sm:$0xff] }
 0x4ff   : > { %v4350_v16 = vmax.f32 %v4311_v1, %v4327_v52  ;;  %4251 = vst [vmem:[#allocation3 + $0x20] sm:$0xff] %v4219_v11  ;;  %v3989_v11 = vpop.f32.mrf.mxu3  ;;  %v3891_v1 = vadd.f32 %v3890_v25, %v6939_v22  ;;  %v4067_v52 = vadd.f32 %v4066_v47, %v3978_v20  ;;  %v3894_v22 = vadd.f32 %v3893_v19, %v6949_v28 }
 0x501   : > { %v4358_v8 = vmax.f32 %v4342_v34, %v4350_v16  ;;  %v7129_v34 = vpop.f32.mrf.mxu0  ;;  %v3980_v2 = vadd.f32 %v3979_v36, %v3891_v1  ;;  %v3983_v63 = vadd.f32 %v7113_v40, %v3894_v22  ;;  %v3899_v40 = vadd.f32 %v3898_v50, %v6967_v45 }
 0x502   : > { %v4147_v37 = vpop.f32.mrf.mxu1 }
 0x503   : > { %4366 = vst [vmem:[%s7120_s12] sm:$0xff] %v4358_v8  ;;  %v4148_v54 = vadd.f32 %v4147_v37, %v7045_v44  ;;  %v3903_v16 = vpop.f32.mrf.mxu2  ;;  %v4069_v25 = vadd.f32 %v7110_v3, %v3980_v2  ;;  %v4072_v20 = vadd.f32 %v7116_v26, %v3983_v63  ;;  %v3988_v2 = vadd.f32 %v3987_v38, %v3899_v40 }
 0x504   : > { %v3901_v26 = vadd.f32 %v3900_v27, %v6975_v10  ;;  %v3904_v10 = vadd.f32 %v3903_v16, %v6985_v48  ;;  %v2773_v63 = vrot.slane %v7088_v46, 1 }
 0x505   : > { %v4220_v61 = vmax.f32 %v4148_v54, 0.0 }
 0x506   : > { %v3990_v22 = vadd.f32 %v3989_v11, %v3901_v26 }
 0x507   : > { %4252 = vst [vmem:[#allocation3 + $0x28] sm:$0xff] %v4220_v61 }
 0x508   : > { %v4079_v27 = vadd.f32 %v7129_v34, %v3990_v22 }
 0x509   : > { %v4081_v36 = vpop.f32.mrf.mxu0 }
 0x50a   : > { %v4150_v14 = vpop.f32.mrf.mxu1 }
 0x50b   : > { %v4151_v60 = vadd.f32 %v4150_v14, %v7052_v62  ;;  %v3992_v14 = vpop.f32.mrf.mxu3 }
 0x50d   : > { %v4221_v18 = vmax.f32 %v4151_v60, 0.0  ;;  %4189 = vmatmul.bf16.gmra.mxu1 %v7455_v32 }
 0x50e   : > { %v4281_v8 = vld [vmem:[#allocation3 + $0x20] ss:$2 sm:$0xff]  ;;  %v4297_v4 = vld [vmem:[#allocation3 + $0x21] ss:$2 sm:$0xff] }
 0x50f   : > { %4253 = vst [vmem:[#allocation3 + $0x30] sm:$0xff] %v4221_v18  ;;  %v4343_v54 = vmax.f32 %v4281_v8, %v4297_v4 }
 0x511   : > { %v4083_v3 = vpop.f32.mrf.mxu0 }
 0x512   : > { %v4152_v41 = vpop.f32.mrf.mxu1 }
 0x513   : > { %v4153_v44 = vadd.f32 %v4152_v41, %v7061_v56  ;;  %v3994_v28 = vpop.f32.mrf.mxu3 }
 0x515   : > { %v4222_v23 = vmax.f32 %v4153_v44, 0.0  ;;  %v3905_v44 = vpop.f32.mrf.mxu2 }
 0x517   : > { %4254 = vst [vmem:[#allocation3 + $0x38] sm:$0xff] %v4222_v23 }
 0x51a   : > { %v4155_v62 = vpop.f32.mrf.mxu1 }
 0x51b   : > { %v4156_v32 = vadd.f32 %v4155_v62, %v4067_v52 }
 0x51d   : > { %v4223_v37 = vmax.f32 %v4156_v32, 0.0  ;;  %4194 = vmatmul.bf16.gmra.mxu1 %v7457_v7  ;;  %v3896_v7 = vadd.f32 %v3895_v5, %v6957_v55  ;;  %v3908_v62 = vpop.f32.mrf.mxu2  ;;  %v3997_v55 = vpop.f32.mrf.mxu3 }
 0x51e   : > { %v4313_v56 = vld [vmem:[#allocation3 + $0x30] ss:$2 sm:$0xff]  ;;  %v4329_v53 = vld [vmem:[#allocation3 + $0x31] ss:$2 sm:$0xff]  ;;  %v4086_v5 = vpop.f32.mrf.mxu0 }
 0x51f   : > { %v4351_v61 = vmax.f32 %v4313_v56, %v4329_v53  ;;  %4255 = vst [vmem:[#allocation3 + $0x40] sm:$0xff] %v4223_v37  ;;  %v3985_v19 = vadd.f32 %v3984_v43, %v3896_v7  ;;  %v4077_v56 = vadd.f32 %v4076_v9, %v3988_v2  ;;  %v3909_v2 = vadd.f32 %v3908_v62, %v7002_v21 }
 0x521   : > { %v4359_v47 = vmax.f32 %v4343_v54, %v4351_v61  ;;  %v4074_v32 = vadd.f32 %v4073_v12, %v3985_v19  ;;  %v3906_v19 = vadd.f32 %v3905_v44, %v6993_v24 }
 0x522   : > { %v4157_v60 = vpop.f32.mrf.mxu1 }
 0x523   : > { %4367 = vst [vmem:[%s7120_s12 + $0x8] sm:$0xff] %v4359_v47  ;;  %v4158_v18 = vadd.f32 %v4157_v60, %v4069_v25  ;;  %v2455_v25 = vld [vmem:[#allocation2 + $0xa0] sm:$0x1] }
 0x524   : > { %v2776_v11 = vrot.slane %v2455_v25, 1 }
 0x525   : > { %v4224_v41 = vmax.f32 %v4158_v18, 0.0  ;;  %v3910_v43 = vpop.f32.mrf.mxu2  ;;  %v3999_v60 = vpop.f32.mrf.mxu3 }
 0x526   : > { %v3911_v44 = vadd.f32 %v3910_v43, %v7009_v42 }
 0x527   : > { %4256 = vst [vmem:[#allocation3 + $0x48] sm:$0xff] %v4224_v41  ;;  %v4088_v41 = vpop.f32.mrf.mxu0 }
 0x52a   : > { %v4160_v23 = vpop.f32.mrf.mxu1 }
 0x52b   : > { %v4161_v1 = vadd.f32 %v4160_v23, %v4072_v20  ;;  %v3993_v20 = vadd.f32 %v3992_v14, %v3904_v10 }
 0x52d   : > { %v4225_v52 = vmax.f32 %v4161_v1, 0.0  ;;  %4199 = vmatmul.bf16.gmra.mxu1 %v7459_v39  ;;  %v2777_v1 = vsel %vm664_vm1, %v2773_v63, %v2776_v11  ;;  %v4002_v16 = vpop.f32.mrf.mxu3 }
 0x52e   : > { %v4283_v39 = vld [vmem:[#allocation3 + $0x40] ss:$2 sm:$0xff]  ;;  %v4299_v61 = vld [vmem:[#allocation3 + $0x41] ss:$2 sm:$0xff]  ;;  %v2833_v48 = vpack.c.bf16 %v2777_v1, %v2773_v63 }
 0x52f   : > { %4257 = vst [vmem:[#allocation3 + $0x50] sm:$0xff] %v4225_v52  ;;  %v4344_v50 = vmax.f32 %v4283_v39, %v4299_v61  ;;  %v4082_v52 = vadd.f32 %v4081_v36, %v3993_v20 }
 0x532   : > { %v4162_v8 = vpop.f32.mrf.mxu1 }
 0x533   : > { %v4163_v4 = vadd.f32 %v4162_v8, %v4074_v32  ;;  %v3995_v32 = vadd.f32 %v3994_v28, %v3906_v19  ;;  %v4091_v8 = vpop.f32.mrf.mxu0 }
 0x535   : > { %v4226_v37 = vmax.f32 %v4163_v4, 0.0  ;;  %v4084_v14 = vadd.f32 %v4083_v3, %v3995_v32 }
 0x537   : > { %4258 = vst [vmem:[#allocation3 + $0x58] sm:$0xff] %v4226_v37 }
 0x53a   : > { %v4165_v53 = vpop.f32.mrf.mxu1 }
 0x53b   : > { %v4166_v54 = vadd.f32 %v4165_v53, %v4077_v56  ;;  %v4004_v56 = vpop.f32.mrf.mxu3  ;;  %v3998_v53 = vadd.f32 %v3997_v55, %v3909_v2  ;;  %v4093_v24 = vpop.f32.mrf.mxu0 }
 0x53d   : > { %v4227_v47 = vmax.f32 %v4166_v54, 0.0  ;;  %4204 = vmatmul.bf16.gmra.mxu1 %v7462_v59  ;;  %v3913_v59 = vpop.f32.mrf.mxu2  ;;  %v4087_v39 = vadd.f32 %v4086_v5, %v3998_v53 }
 0x53e   : > { %v4315_v45 = vld [vmem:[#allocation3 + $0x50] ss:$2 sm:$0xff]  ;;  %v4331_v12 = vld [vmem:[#allocation3 + $0x51] ss:$2 sm:$0xff]  ;;  %v3914_v55 = vadd.f32 %v3913_v59, %v7018_v35 }
 0x53f   : > { %v4352_v38 = vmax.f32 %v4315_v45, %v4331_v12  ;;  %4259 = vst [vmem:[#allocation3 + $0x60] sm:$0xff] %v4227_v47  ;;  %v4000_v45 = vadd.f32 %v3999_v60, %v3911_v44 }
 0x541   : > { %v4360_v9 = vmax.f32 %v4344_v50, %v4352_v38 }
 0x542   : > { %v4167_v18 = vpop.f32.mrf.mxu1 }
 0x543   : > { %4368 = vst [vmem:[%s7120_s12 + $0x10] sm:$0xff] %v4360_v9  ;;  %v4168_v7 = vadd.f32 %v4167_v18, %v4079_v27  ;;  %v4007_v21 = vpop.f32.mrf.mxu3  ;;  %v4096_v25 = vpop.f32.mrf.mxu0  ;;  %v4089_v9 = vadd.f32 %v4088_v41, %v4000_v45  ;;  %v4003_v27 = vadd.f32 %v4002_v16, %v3914_v55 }
 0x545   : > { %v4228_v23 = vmax.f32 %v4168_v7, 0.0  ;;  %v3915_v4 = vpop.f32.mrf.mxu2  ;;  %v4092_v11 = vadd.f32 %v4091_v8, %v4003_v27 }
 0x546   : > { %v3916_v63 = vadd.f32 %v3915_v4, %v7025_v51 }
 0x547   : > { %4260 = vst [vmem:[#allocation3 + $0x68] sm:$0xff] %v4228_v23 }
 0x548   : > { %v4005_v19 = vadd.f32 %v4004_v56, %v3916_v63 }
 0x54a   : > { %v4170_v40 = vpop.f32.mrf.mxu1  ;;  %v4094_v59 = vadd.f32 %v4093_v24, %v4005_v19 }
 0x54b   : > { %v4171_v34 = vadd.f32 %v4170_v40, %v4082_v52  ;;  %v4009_v60 = vpop.f32.mrf.mxu3  ;;  %v4098_v20 = vpop.f32.mrf.mxu0 }
 0x54d   : > { %v4229_v46 = vmax.f32 %v4171_v34, 0.0  ;;  %4209 = vmatmul.bf16.gmra.mxu1 %v2833_v48  ;;  %v3918_v36 = vpop.f32.mrf.mxu2 }
 0x54e   : > { %v4285_v22 = vld [vmem:[#allocation3 + $0x60] ss:$2 sm:$0xff]  ;;  %v4301_v47 = vld [vmem:[#allocation3 + $0x61] ss:$2 sm:$0xff]  ;;  %v3919_v41 = vadd.f32 %v3918_v36, %v7034_v29 }
 0x54f   : > { %4261 = vst [vmem:[#allocation3 + $0x70] sm:$0xff] %v4229_v46  ;;  %v4345_v50 = vmax.f32 %v4285_v22, %v4301_v47 }
 0x550   : > { %v4008_v16 = vadd.f32 %v4007_v21, %v3919_v41 }
 0x552   : > { %v4172_v37 = vpop.f32.mrf.mxu1  ;;  %v4097_v8 = vadd.f32 %v4096_v25, %v4008_v16 }
 0x553   : > { %v4173_v26 = vadd.f32 %v4172_v37, %v4084_v14  ;;  %v4012_v52 = vpop.f32.mrf.mxu3  ;;  %v4101_v34 = vpop.f32.mrf.mxu0 }
 0x555   : > { %v4230_v54 = vmax.f32 %v4173_v26, 0.0  ;;  %v3920_v42 = vpop.f32.mrf.mxu2 }
 0x556   : > { %v3921_v51 = vadd.f32 %v3920_v42, %v7041_v31 }
 0x557   : > { %4262 = vst [vmem:[#allocation3 + $0x78] sm:$0xff] %v4230_v54 }
 0x558   : > { %v4010_v56 = vadd.f32 %v4009_v60, %v3921_v51 }
 0x55a   : > { %v4175_v28 = vpop.f32.mrf.mxu1  ;;  %v4099_v31 = vadd.f32 %v4098_v20, %v4010_v56 }
 0x55b   : > { %v4176_v61 = vadd.f32 %v4175_v28, %v4087_v39  ;;  %v4014_v14 = vpop.f32.mrf.mxu3  ;;  %v4103_v24 = vpop.f32.mrf.mxu0 }
 0x55d   : > { %v4231_v12 = vmax.f32 %v4176_v61, 0.0  ;;  %v3923_v1 = vpop.f32.mrf.mxu2 }
 0x55e   : > { %v4317_v3 = vld [vmem:[#allocation3 + $0x70] ss:$2 sm:$0xff]  ;;  %v4333_v62 = vld [vmem:[#allocation3 + $0x71] ss:$2 sm:$0xff]  ;;  %v3924_v28 = vadd.f32 %v3923_v1, %v7050_v17 }
 0x55f   : > { %v4353_v38 = vmax.f32 %v4317_v3, %v4333_v62  ;;  %4263 = vst [vmem:[#allocation3 + $0x80] sm:$0xff] %v4231_v12 }
 0x560   : > { %v4013_v45 = vadd.f32 %v4012_v52, %v3924_v28 }
 0x561   : > { %v4361_v10 = vmax.f32 %v4345_v50, %v4353_v38 }
 0x562   : > { %v4177_v5 = vpop.f32.mrf.mxu1  ;;  %v4102_v50 = vadd.f32 %v4101_v34, %v4013_v45 }
 0x563   : > { %4369 = vst [vmem:[%s7120_s12 + $0x18] sm:$0xff] %v4361_v10  ;;  %v4178_v43 = vadd.f32 %v4177_v5, %v4089_v9  ;;  %v4017_v21 = vpop.f32.mrf.mxu3  ;;  %v4106_v62 = vpop.f32.mrf.mxu0 }
 0x565   : > { %v4232_v18 = vmax.f32 %v4178_v43, 0.0  ;;  %v3925_v46 = vpop.f32.mrf.mxu2 }
 0x566   : > { %v3926_v3 = vadd.f32 %v3925_v46, %v7057_v30 }
 0x567   : > { %4264 = vst [vmem:[#allocation3 + $0x88] sm:$0xff] %v4232_v18 }
 0x568   : > { %v4015_v10 = vadd.f32 %v4014_v14, %v3926_v3 }
 0x56a   : > { %v4180_v7 = vpop.f32.mrf.mxu1  ;;  %v4104_v5 = vadd.f32 %v4103_v24, %v4015_v10 }
 0x56b   : > { %v4181_v23 = vadd.f32 %v4180_v7, %v4092_v11  ;;  %v4019_v17 = vpop.f32.mrf.mxu3  ;;  %v4108_v27 = vpop.f32.mrf.mxu0 }
 0x56d   : > { %v4233_v35 = vmax.f32 %v4181_v23, 0.0  ;;  %v3928_v39 = vpop.f32.mrf.mxu2 }
 0x56e   : > { %v4287_v37 = vld [vmem:[#allocation3 + $0x80] ss:$2 sm:$0xff]  ;;  %v4303_v26 = vld [vmem:[#allocation3 + $0x81] ss:$2 sm:$0xff]  ;;  %v3929_v42 = vadd.f32 %v3928_v39, %v7065_v49 }
 0x56f   : > { %4265 = vst [vmem:[#allocation3 + $0x90] sm:$0xff] %v4233_v35  ;;  %v4346_v36 = vmax.f32 %v4287_v37, %v4303_v26 }
 0x570   : > { %v4018_v63 = vadd.f32 %v4017_v21, %v3929_v42 }
 0x572   : > { %v4182_v48 = vpop.f32.mrf.mxu1  ;;  %v4107_v7 = vadd.f32 %v4106_v62, %v4018_v63 }
 0x573   : > { %v4183_v40 = vadd.f32 %v4182_v48, %v4094_v59  ;;  %v4022_v20 = vpop.f32.mrf.mxu3  ;;  %v4111_v59 = vpop.f32.mrf.mxu0 }
 0x575   : > { %v4234_v32 = vmax.f32 %v4183_v40, 0.0  ;;  %v3930_v38 = vpop.f32.mrf.mxu2 }
 0x576   : > { %v3931_v30 = vadd.f32 %v3930_v38, %v7069_v0 }
 0x577   : > { %4266 = vst [vmem:[#allocation3 + $0x98] sm:$0xff] %v4234_v32 }
 0x578   : > { %v4020_v41 = vadd.f32 %v4019_v17, %v3931_v30 }
 0x57a   : > { %v4185_v4 = vpop.f32.mrf.mxu1  ;;  %v4109_v0 = vadd.f32 %v4108_v27, %v4020_v41 }
 0x57b   : > { %v4186_v2 = vadd.f32 %v4185_v4, %v4097_v8  ;;  %v4024_v4 = vpop.f32.mrf.mxu3  ;;  %v4113_v37 = vpop.f32.mrf.mxu0 }
 0x57d   : > { %v4235_v29 = vmax.f32 %v4186_v2, 0.0  ;;  %v3933_v60 = vpop.f32.mrf.mxu2 }
 0x57e   : > { %v4319_v53 = vld [vmem:[#allocation3 + $0x90] ss:$2 sm:$0xff]  ;;  %v4335_v54 = vld [vmem:[#allocation3 + $0x91] ss:$2 sm:$0xff]  ;;  %v3934_v32 = vadd.f32 %v3933_v60, %v7075_v13 }
 0x57f   : > { %v4354_v44 = vmax.f32 %v4319_v53, %v4335_v54  ;;  %4267 = vst [vmem:[#allocation3 + $0xa0] sm:$0xff] %v4235_v29 }
 0x580   : > { %v4023_v2 = vadd.f32 %v4022_v20, %v3934_v32 }
 0x581   : > { %v4362_v61 = vmax.f32 %v4346_v36, %v4354_v44 }
 0x582   : > { %v4187_v22 = vpop.f32.mrf.mxu1  ;;  %v4112_v29 = vadd.f32 %v4111_v59, %v4023_v2 }
 0x583   : > { %4370 = vst [vmem:[%s7120_s12 + $0x20] sm:$0xff] %v4362_v61  ;;  %v4188_v47 = vadd.f32 %v4187_v22, %v4099_v31  ;;  %v4027_v44 = vpop.f32.mrf.mxu3  ;;  %v4116_v13 = vpop.f32.mrf.mxu0 }
 0x585   : > { %v4236_v12 = vmax.f32 %v4188_v47, 0.0  ;;  %v3935_v52 = vpop.f32.mrf.mxu2 }
 0x586   : > { %v3936_v56 = vadd.f32 %v3935_v52, %v7079_v57 }
 0x587   : > { %4268 = vst [vmem:[#allocation3 + $0xa8] sm:$0xff] %v4236_v12 }
 0x588   : > { %v4025_v24 = vadd.f32 %v4024_v4, %v3936_v56 }
 0x58a   : > { %v4190_v55 = vpop.f32.mrf.mxu1  ;;  %v4114_v28 = vadd.f32 %v4113_v37, %v4025_v24 }
 0x58b   : > { %v4191_v25 = vadd.f32 %v4190_v55, %v4102_v50  ;;  %v4029_v12 = vpop.f32.mrf.mxu3  ;;  %v4118_v50 = vpop.f32.mrf.mxu0 }
 0x58d   : > { %v4237_v9 = vmax.f32 %v4191_v25, 0.0  ;;  %v3938_v26 = vpop.f32.mrf.mxu2 }
 0x58e   : > { %v4289_v19 = vld [vmem:[#allocation3 + $0xa0] ss:$2 sm:$0xff]  ;;  %v4305_v35 = vld [vmem:[#allocation3 + $0xa1] ss:$2 sm:$0xff]  ;;  %v3939_v39 = vadd.f32 %v3938_v26, %v7085_v6 }
 0x58f   : > { %4269 = vst [vmem:[#allocation3 + $0xb0] sm:$0xff] %v4237_v9  ;;  %v4347_v16 = vmax.f32 %v4289_v19, %v4305_v35 }
 0x590   : > { %v4028_v47 = vadd.f32 %v4027_v44, %v3939_v39 }
 0x592   : > { %v4192_v43 = vpop.f32.mrf.mxu1  ;;  %v4117_v21 = vadd.f32 %v4116_v13, %v4028_v47 }
 0x593   : > { %v4193_v18 = vadd.f32 %v4192_v43, %v4104_v5  ;;  %v4032_v43 = vpop.f32.mrf.mxu3 }
 0x595   : > { %v4238_v11 = vmax.f32 %v4193_v18, 0.0  ;;  %v3940_v61 = vpop.f32.mrf.mxu2 }
 0x596   : > { %v3941_v57 = vadd.f32 %v3940_v61, %v7095_v33 }
 0x597   : > { %4270 = vst [vmem:[#allocation3 + $0xb8] sm:$0xff] %v4238_v11  ;;  %v4121_v11 = vpop.f32.mrf.mxu0 }
 0x598   : > { %v4030_v10 = vadd.f32 %v4029_v12, %v3941_v57 }
 0x59a   : > { %v4195_v23 = vpop.f32.mrf.mxu1  ;;  %v4119_v33 = vadd.f32 %v4118_v50, %v4030_v10 }
 0x59b   : > { %v4196_v1 = vadd.f32 %v4195_v23, %v4107_v7  ;;  %v4034_v19 = vpop.f32.mrf.mxu3 }
 0x59d   : > { %v4239_v49 = vmax.f32 %v4196_v1, 0.0  ;;  %v3943_v38 = vpop.f32.mrf.mxu2 }
 0x59e   : > { %v4321_v48 = vld [vmem:[#allocation3 + $0xb0] ss:$2 sm:$0xff]  ;;  %v4337_v40 = vld [vmem:[#allocation3 + $0xb1] ss:$2 sm:$0xff]  ;;  %v3944_v27 = vadd.f32 %v3943_v38, %v7099_v15 }
 0x59f   : > { %v4355_v34 = vmax.f32 %v4321_v48, %v4337_v40  ;;  %4271 = vst [vmem:[#allocation3 + $0xc0] sm:$0xff] %v4239_v49  ;;  %v4123_v49 = vpop.f32.mrf.mxu0 }
 0x5a0   : > { %v4033_v30 = vadd.f32 %v4032_v43, %v3944_v27 }
 0x5a1   : > { %v4363_v46 = vmax.f32 %v4347_v16, %v4355_v34 }
 0x5a2   : > { %v4197_v51 = vpop.f32.mrf.mxu1  ;;  %v4122_v23 = vadd.f32 %v4121_v11, %v4033_v30 }
 0x5a3   : > { %4371 = vst [vmem:[%s7120_s12 + $0x28] sm:$0xff] %v4363_v46  ;;  %v4198_v8 = vadd.f32 %v4197_v51, %v4109_v0 }
 0x5a5   : > { %v4240_v14 = vmax.f32 %v4198_v8, 0.0  ;;  %v3945_v20 = vpop.f32.mrf.mxu2 }
 0x5a6   : > { %v3946_v1 = vadd.f32 %v3945_v20, %v7103_v58 }
 0x5a7   : > { %4272 = vst [vmem:[#allocation3 + $0xc8] sm:$0xff] %v4240_v14 }
 0x5a8   : > { %v4035_v59 = vadd.f32 %v4034_v19, %v3946_v1 }
 0x5aa   : > { %v4200_v53 = vpop.f32.mrf.mxu1  ;;  %v4124_v52 = vadd.f32 %v4123_v49, %v4035_v59 }
 0x5ab   : > { %v4201_v54 = vadd.f32 %v4200_v53, %v4112_v29 }
 0x5ad   : > { %v4241_v36 = vmax.f32 %v4201_v54, 0.0 }
 0x5ae   : > { %v4291_v55 = vld [vmem:[#allocation3 + $0xc0] ss:$2 sm:$0xff]  ;;  %v4307_v25 = vld [vmem:[#allocation3 + $0xc1] ss:$2 sm:$0xff] }
 0x5af   : > { %4273 = vst [vmem:[#allocation3 + $0xd0] sm:$0xff] %v4241_v36  ;;  %v4348_v42 = vmax.f32 %v4291_v55, %v4307_v25 }
 0x5b2   : > { %v4202_v31 = vpop.f32.mrf.mxu1 }
 0x5b3   : > { %v4203_v22 = vadd.f32 %v4202_v31, %v4114_v28 }
 0x5b5   : > { %v4242_v45 = vmax.f32 %v4203_v22, 0.0 }
 0x5b7   : > { %4274 = vst [vmem:[#allocation3 + $0xd8] sm:$0xff] %v4242_v45 }
 0x5ba   : > { %v4205_v3 = vpop.f32.mrf.mxu1 }
 0x5bb   : > { %v4206_v62 = vadd.f32 %v4205_v3, %v4117_v21 }
 0x5bd   : > { %v4243_v6 = vmax.f32 %v4206_v62, 0.0 }
 0x5be   : > { %v4323_v9 = vld [vmem:[#allocation3 + $0xd0] ss:$2 sm:$0xff]  ;;  %v4339_v17 = vld [vmem:[#allocation3 + $0xd1] ss:$2 sm:$0xff] }
 0x5bf   : > { %v4356_v5 = vmax.f32 %v4323_v9, %v4339_v17  ;;  %4275 = vst [vmem:[#allocation3 + $0xe0] sm:$0xff] %v4243_v6 }
 0x5c1   : > { %v4364_v18 = vmax.f32 %v4348_v42, %v4356_v5 }
 0x5c2   : > { %v4207_v60 = vpop.f32.mrf.mxu1 }
 0x5c3   : > { %4372 = vst [vmem:[%s7120_s12 + $0x30] sm:$0xff] %v4364_v18  ;;  %v4208_v63 = vadd.f32 %v4207_v60, %v4119_v33 }
 0x5c5   : > { %v4244_v7 = vmax.f32 %v4208_v63, 0.0 }
 0x5c7   : > { %4276 = vst [vmem:[#allocation3 + $0xe8] sm:$0xff] %v4244_v7 }
 0x5ca   : > { %v4210_v35 = vpop.f32.mrf.mxu1 }
 0x5cb   : > { %v4211_v41 = vadd.f32 %v4210_v35, %v4122_v23 }
 0x5cd   : > { %v4245_v15 = vmax.f32 %v4211_v41, 0.0 }
 0x5ce   : > { %v4293_v58 = vld [vmem:[#allocation3 + $0xe0] ss:$2 sm:$0xff]  ;;  %v4309_v34 = vld [vmem:[#allocation3 + $0xe1] ss:$2 sm:$0xff] }
 0x5cf   : > { %4277 = vst [vmem:[#allocation3 + $0xf0] sm:$0xff] %v4245_v15  ;;  %v4349_v0 = vmax.f32 %v4293_v58, %v4309_v34 }
 0x5d2   : > { %v4212_v48 = vpop.f32.mrf.mxu1 }
 0x5d3   : > { %v4213_v40 = vadd.f32 %v4212_v48, %v4124_v52 }
 0x5d5   : > { %v4246_v16 = vmax.f32 %v4213_v40, 0.0 }
 0x5d7   : > { %4278 = vst [vmem:[#allocation3 + $0xf8] sm:$0xff] %v4246_v16 }
 0x5de   : > { %v4325_v32 = vld [vmem:[#allocation3 + $0xf0] ss:$2 sm:$0xff]  ;;  %v4341_v46 = vld [vmem:[#allocation3 + $0xf1] ss:$2 sm:$0xff] }
 0x5df   : > { %v4357_v51 = vmax.f32 %v4325_v32, %v4341_v46 }
 0x5e1   : > { %v4365_v8 = vmax.f32 %v4349_v0, %v4357_v51 }
 0x5e3   : > { %4373 = vst [vmem:[%s7120_s12 + $0x38] sm:$0xff] %v4365_v8 }
 0x5e4   : > { %5449 = shalt.err (!%p5446_p10)
}
 0x5e5   : > { %s5502_s8 = smov 128   ;;  %s5503_s11 = smov 8  }
 0x5e6   : > { %5263 = dma.vmem_to_hbm [thread:$0]  (%p5600_p3), %s4388_s26, 1024, %s4390_s7, %s4375_s16, %s5502_s8, %s5502_s8, %s5503_s11  }
 0x5e7 PF: > { %s4404_s12 = sand.u32 1, %s5480_s18   ;;  %p7463_p12 = scmp.ge.s32.totalorder %s5492_s21, 2 }
 0x5e8   : > { %s4405_s27 = scalar_lea.sflag [#allocation6], %s4404_s12 }
 0x5e9   : > { %p5277_p13 = pnand %p7463_p12, %p5569_p6 }
 0x5eb   : > { %p5278_p0 = pneg %p5277_p13 }
 0x5ed   : > { %5475 = dma.done.wait (%p5278_p0), %s4405_s27, 1024  }
 0x5ee   : > { %5477 = vsyncadd (%p5278_p0), %s4405_s27, 4294966272  ;;  %p19_p5 = scmp.ge.s32.totalorder %s5590_s14, 4   ;;  %s7464_s18 = smov %s5484_s19 }
 0x5ef   : > { %s7465_s19 = smov %s5488_s20  ;;  %s7466_s20 = smov %s5606_s23 }
 0x5f0   : > { %s7467_s21 = smov %s5590_s14  ;;  %21 = sbr.rel (!%p19_p5) target bundleno = 6 (0x6), region = 125 }
 0x5f5   :  { %4411 = vsyncpa [#allocation5], 1 }
 0x5f6   :  { %4413 = vsyncpa [#allocation5 + $0x1], 1 }
 0x5f7   :  { %4414 = vsyncpa [#allocation8], 1 }
 0x5f8   :  { %4415 = vsyncpa [#allocation6], 1 }
 0x5f9   :  { %4417 = vsyncpa [#allocation6 + $0x1], 1 }

</bundles_post_ra>
